<compile_context>
chip_gen: v6e
topology: v6e:2x2x1
jax: 0.10.0
libtpu: 0.0.40
codegen_flags: <defaults>
</compile_context>

<pallas_src>
import functools

import jax
import jax.numpy as jnp
from jax.experimental import pallas as pl
from jax.experimental.pallas import tpu as pltpu


# ----------------------------------------------------------------------------
# In-kernel helpers
# ----------------------------------------------------------------------------
def _layernorm(x, g, b, eps):
    mean = jnp.mean(x, axis=-1, keepdims=True)
    xc = x - mean
    var = jnp.mean(xc * xc, axis=-1, keepdims=True)
    return xc * jax.lax.rsqrt(var + eps) * g + b


def _gelu(x):
    # tanh-approx GELU (see TODO above).
    return 0.5 * x * (1.0 + jnp.tanh(0.7978845608028654 * (x + 0.044715 * x * x * x)))


def _mxu(a, b):
    """bf16-operand / f32-accumulate matmul (full MXU rate on v5e/v6e/v7x)."""
    return jnp.dot(a.astype(jnp.bfloat16), b.astype(jnp.bfloat16),
                   preferred_element_type=jnp.float32)


def _full_spec(shape):
    """Whole-array block for a grid=(1,) launch."""
    zeros = (0,) * len(shape)
    return pl.BlockSpec(shape, lambda i, _z=zeros: _z)


# ----------------------------------------------------------------------------
# Fully fused forward kernel (embedding LN + L encoder layers + pooler + classifier)
# ----------------------------------------------------------------------------
def _bert_fused_kernel(emb_ref, mask_ref, emb_g_ref, emb_b_ref,
                       qkv_w_ref, qkv_b_ref, o_w_ref, o_b_ref,
                       ln1_g_ref, ln1_b_ref, fc1_w_ref, fc1_b_ref,
                       fc2_w_ref, fc2_b_ref, ln2_g_ref, ln2_b_ref,
                       pool_w_ref, pool_b_ref, cls_w_ref, cls_b_ref,
                       out_ref, *, B, S, heads, D, L, eps):
    H = heads * D
    M = B * S

    # Embedding LayerNorm (residual-free) fused into the same kernel.
    x = _layernorm(emb_ref[...].astype(jnp.float32), emb_g_ref[...], emb_b_ref[...], eps)

    # HF-style extended attention mask, kept (B, S): (1 - mask) * -10000.
    mask_add = (1.0 - mask_ref[...]) * -10000.0
    scale = 1.0 / float(D) ** 0.5

    # Hoisted per-head lane masks: multiplying by the mask zeroes the other heads'
    # columns, so full-H-width contractions are numerically identical to per-head
    # (S, D) slices while keeping the MXU K/N dims lane-dense and everything in vregs.
    lane = jax.lax.broadcasted_iota(jnp.int32, (1, H), 1)
    head_masks = [((lane >= h * D) & (lane < (h + 1) * D)).astype(jnp.float32)
                  for h in range(heads)]

    for l in range(L):                                   # static unroll over layers
        # --- fused Q/K/V projection -----------------------------------------
        qkv = _mxu(x, qkv_w_ref[l]) + qkv_b_ref[l]       # (M, 3H) f32

        # --- scaled dot-product attention (register-resident contexts) -------
        ctx_batches = []
        for b in range(B):
            rows = slice(b * S, (b + 1) * S)
            q_b = qkv[rows, 0:H]
            k_b = qkv[rows, H:2 * H]
            v_b = qkv[rows, 2 * H:3 * H]
            m_b = mask_add[b:b + 1, :]                   # (1, S): broadcast over queries
            ctx_b = jnp.zeros((S, H), jnp.float32)
            for h in range(heads):
                hm = head_masks[h]
                # (S,H) x (S,H) contracting last dims == q_h @ k_h^T (zeroed cols add 0)
                s = jax.lax.dot_general(q_b * hm, k_b, (((1,), (1,)), ((), ())),
                                        preferred_element_type=jnp.float32)
                s = s * scale + m_b
                s = s - jnp.max(s, axis=-1, keepdims=True)
                p = jnp.exp(s)
                p = p * pl.reciprocal(jnp.sum(p, axis=-1, keepdims=True), approx=True)
                # Full-width (S,S)x(S,H); only head h's columns are non-zero.
                ctx_b = ctx_b + jnp.dot(p, v_b * hm, preferred_element_type=jnp.float32)
            ctx_batches.append(ctx_b)
        ctx = jnp.concatenate(ctx_batches, axis=0)       # (M, H), sublane-aligned concat

        # --- output projection + residual + LayerNorm 1 -----------------------
        attn = _mxu(ctx, o_w_ref[l]) + o_b_ref[l]
        x = _layernorm(attn + x, ln1_g_ref[l], ln1_b_ref[l], eps)

        # --- feed-forward (GELU) + residual + LayerNorm 2 ----------------------
        ff = _gelu(_mxu(x, fc1_w_ref[l]) + fc1_b_ref[l])
        ff = _mxu(ff, fc2_w_ref[l]) + fc2_b_ref[l]
        x = _layernorm(ff + x, ln2_g_ref[l], ln2_b_ref[l], eps)

    # --- pooler + classifier on CLS rows -------------------------------------
    # One-hot selection matmul gathers row b*S for each batch (MXU-friendly,
    # avoids a strided sublane gather); exact in f32.
    r = jax.lax.broadcasted_iota(jnp.int32, (B, M), 0)
    c = jax.lax.broadcasted_iota(jnp.int32, (B, M), 1)
    sel = (c == r * S).astype(jnp.float32)               # (B, M)
    cls_rows = jnp.dot(sel, x, preferred_element_type=jnp.float32)   # (B, H)

    pooled = jnp.tanh(_mxu(cls_rows, pool_w_ref[...]) + pool_b_ref[...])
    logits = _mxu(pooled, cls_w_ref[...]) + cls_b_ref[...]            # Dropout(eval)=id
    out_ref[...] = logits.astype(out_ref.dtype)


# ----------------------------------------------------------------------------
# Parameter construction + one-time prep
# ----------------------------------------------------------------------------
CFG = dict(
    vocab_size=64,
    type_vocab_size=2,
    max_position=32,
    hidden=32,
    heads=4,
    intermediate=64,
    layers=2,
    num_labels=5,
)


def init_params(key, cfg):
    """Raw HF-style parameter layout (per-layer dicts, f32)."""
    def nrm(key, shape, std=0.02):
        return jax.random.normal(key, shape, jnp.float32) * std

    keys = iter(jax.random.split(key, 200))
    H, I = cfg["hidden"], cfg["intermediate"]
    p = {
        "word_emb": nrm(next(keys), (cfg["vocab_size"], H)),
        "pos_emb": nrm(next(keys), (cfg["max_position"], H)),
        "type_emb": nrm(next(keys), (cfg["type_vocab_size"], H)),
        "emb_ln_g": jnp.ones((H,), jnp.float32),
        "emb_ln_b": jnp.zeros((H,), jnp.float32),
        "pool_w": nrm(next(keys), (H, H)),
        "pool_b": jnp.zeros((H,), jnp.float32),
        "cls_w": nrm(next(keys), (H, cfg["num_labels"])),
        "cls_b": jnp.zeros((cfg["num_labels"],), jnp.float32),
        "layers": [],
    }
    for _ in range(cfg["layers"]):
        p["layers"].append({
            "q_w": nrm(next(keys), (H, H)), "q_b": jnp.zeros((H,), jnp.float32),
            "k_w": nrm(next(keys), (H, H)), "k_b": jnp.zeros((H,), jnp.float32),
            "v_w": nrm(next(keys), (H, H)), "v_b": jnp.zeros((H,), jnp.float32),
            "o_w": nrm(next(keys), (H, H)), "o_b": jnp.zeros((H,), jnp.float32),
            "ln1_g": jnp.ones((H,), jnp.float32), "ln1_b": jnp.zeros((H,), jnp.float32),
            "fc1_w": nrm(next(keys), (H, I)), "fc1_b": jnp.zeros((I,), jnp.float32),
            "fc2_w": nrm(next(keys), (I, H)), "fc2_b": jnp.zeros((H,), jnp.float32),
            "ln2_g": jnp.ones((H,), jnp.float32), "ln2_b": jnp.zeros((H,), jnp.float32),
        })
    return p


def prepare_params(raw, cfg):
    """One-time prep: fuse QKV, stack layers, reshape biases, cast matmul weights to
    bf16 (the MXU operand dtype).  The jitted forward does no per-call weight work."""
    H, I, L = cfg["hidden"], cfg["intermediate"], cfg["layers"]
    layers = raw["layers"]

    def stack(name):
        return jnp.stack([lyr[name] for lyr in layers])

    qkv_w = jnp.stack([jnp.concatenate([l["q_w"], l["k_w"], l["v_w"]], axis=1)
                       for l in layers])                                    # (L, H, 3H)
    qkv_b = jnp.stack([jnp.concatenate([l["q_b"], l["k_b"], l["v_b"]])
                       for l in layers]).reshape(L, 1, 3 * H)

    return {
        "word_emb": raw["word_emb"], "pos_emb": raw["pos_emb"], "type_emb": raw["type_emb"],
        "emb_ln_g": raw["emb_ln_g"].reshape(1, H), "emb_ln_b": raw["emb_ln_b"].reshape(1, H),
        "qkv_w": qkv_w.astype(jnp.bfloat16), "qkv_b": qkv_b,
        "o_w": stack("o_w").astype(jnp.bfloat16), "o_b": stack("o_b").reshape(L, 1, H),
        "ln1_g": stack("ln1_g").reshape(L, 1, H), "ln1_b": stack("ln1_b").reshape(L, 1, H),
        "fc1_w": stack("fc1_w").astype(jnp.bfloat16), "fc1_b": stack("fc1_b").reshape(L, 1, I),
        "fc2_w": stack("fc2_w").astype(jnp.bfloat16), "fc2_b": stack("fc2_b").reshape(L, 1, H),
        "ln2_g": stack("ln2_g").reshape(L, 1, H), "ln2_b": stack("ln2_b").reshape(L, 1, H),
        "pool_w": raw["pool_w"].astype(jnp.bfloat16), "pool_b": raw["pool_b"].reshape(1, H),
        "cls_w": raw["cls_w"].astype(jnp.bfloat16),
        "cls_b": raw["cls_b"].reshape(1, cfg["num_labels"]),
    }


# ----------------------------------------------------------------------------
# Forward pass (BertModel -> pooled_output -> Dropout(eval)=identity -> classifier)
# ----------------------------------------------------------------------------
def bert_multilabel_forward(prep, input_ids, attention_mask, cfg):
    B, S = input_ids.shape
    H, heads, L = cfg["hidden"], cfg["heads"], cfg["layers"]
    I, NL = cfg["intermediate"], cfg["num_labels"]
    D = H // heads
    M = B * S

    # Embedding gather + add stays in JAX glue (XLA fuses it into one op feeding the
    # kernel); token_type_ids are implicitly all-zero to match the reference call.
    word = jnp.take(prep["word_emb"], input_ids, axis=0)                    # (B, S, H)
    emb = (word + prep["pos_emb"][:S][None, :, :]
           + prep["type_emb"][0][None, None, :]).reshape(M, H)
    mask_f = attention_mask.astype(jnp.float32)

    kernel = functools.partial(_bert_fused_kernel, B=B, S=S, heads=heads, D=D, L=L,
                               eps=1e-12)
    in_specs = [
        _full_spec((M, H)), _full_spec((B, S)),
        _full_spec((1, H)), _full_spec((1, H)),
        _full_spec((L, H, 3 * H)), _full_spec((L, 1, 3 * H)),
        _full_spec((L, H, H)), _full_spec((L, 1, H)),
        _full_spec((L, 1, H)), _full_spec((L, 1, H)),
        _full_spec((L, H, I)), _full_spec((L, 1, I)),
        _full_spec((L, I, H)), _full_spec((L, 1, H)),
        _full_spec((L, 1, H)), _full_spec((L, 1, H)),
        _full_spec((H, H)), _full_spec((1, H)),
        _full_spec((H, NL)), _full_spec((1, NL)),
    ]
    return pl.pallas_call(
        kernel,
        out_shape=jax.ShapeDtypeStruct((B, NL), jnp.float32),
        grid=(1,),
        in_specs=in_specs,
        out_specs=_full_spec((B, NL)),
        compiler_params=pltpu.CompilerParams(dimension_semantics=("arbitrary",)),
    )(emb, mask_f,
      prep["emb_ln_g"], prep["emb_ln_b"],
      prep["qkv_w"], prep["qkv_b"], prep["o_w"], prep["o_b"],
      prep["ln1_g"], prep["ln1_b"],
      prep["fc1_w"], prep["fc1_b"], prep["fc2_w"], prep["fc2_b"],
      prep["ln2_g"], prep["ln2_b"],
      prep["pool_w"], prep["pool_b"], prep["cls_w"], prep["cls_b"])


# ----------------------------------------------------------------------------
if __name__ == "__main__":
    key = jax.random.PRNGKey(0)
    k_param, k_ids = jax.random.split(key)

    B, S = 2, 8
    raw_params = init_params(k_param, CFG)
    params = prepare_params(raw_params, CFG)   # one-time fusion / stacking / bf16 cast

    input_ids = jax.random.randint(k_ids, (B, S), 0, CFG["vocab_size"], dtype=jnp.int32)
    attention_mask = jnp.concatenate(
        [jnp.ones((B, S - 2), jnp.int32), jnp.zeros((B, 2), jnp.int32)], axis=1)

    fwd = jax.jit(functools.partial(bert_multilabel_forward, cfg=CFG))
    logits = fwd(params, input_ids, attention_mask)
    jax.block_until_ready(logits)
    assert logits.shape == (B, CFG["num_labels"])
    assert bool(jnp.all(jnp.isfinite(logits)))
    print("KERNEL_OK")
</pallas_src>

<mosaic_0001>
module attributes {stable_mosaic.version = 11 : i64} {
  func.func @_bert_fused_kernel(%arg0: i32, %arg1: memref<16x32xf32, #tpu.memory_space<vmem>>, %arg2: memref<2x8xf32, #tpu.memory_space<vmem>>, %arg3: memref<1x32xf32, #tpu.memory_space<vmem>>, %arg4: memref<1x32xf32, #tpu.memory_space<vmem>>, %arg5: memref<2x32x96xbf16, #tpu.memory_space<vmem>>, %arg6: memref<2x1x96xf32, #tpu.memory_space<vmem>>, %arg7: memref<2x32x32xbf16, #tpu.memory_space<vmem>>, %arg8: memref<2x1x32xf32, #tpu.memory_space<vmem>>, %arg9: memref<2x1x32xf32, #tpu.memory_space<vmem>>, %arg10: memref<2x1x32xf32, #tpu.memory_space<vmem>>, %arg11: memref<2x32x64xbf16, #tpu.memory_space<vmem>>, %arg12: memref<2x1x64xf32, #tpu.memory_space<vmem>>, %arg13: memref<2x64x32xbf16, #tpu.memory_space<vmem>>, %arg14: memref<2x1x32xf32, #tpu.memory_space<vmem>>, %arg15: memref<2x1x32xf32, #tpu.memory_space<vmem>>, %arg16: memref<2x1x32xf32, #tpu.memory_space<vmem>>, %arg17: memref<32x32xbf16, #tpu.memory_space<vmem>>, %arg18: memref<1x32xf32, #tpu.memory_space<vmem>>, %arg19: memref<32x5xbf16, #tpu.memory_space<vmem>>, %arg20: memref<1x5xf32, #tpu.memory_space<vmem>>, %arg21: memref<2x5xf32, #tpu.memory_space<vmem>>) attributes {dimension_semantics = [#tpu.dimension_semantics<arbitrary>], iteration_bounds = array<i64: 1>, scalar_prefetch = 0 : i64, scratch_operands = 0 : i64, tpu.core_type = #tpu.core_type<tc>, window_params = [{pipeline_mode = #tpu.pipeline_mode<synchronous>, transform_indices = @transform_0, window_bounds = array<i64: 16, 32>}, {pipeline_mode = #tpu.pipeline_mode<synchronous>, transform_indices = @transform_1, window_bounds = array<i64: 2, 8>}, {pipeline_mode = #tpu.pipeline_mode<synchronous>, transform_indices = @transform_2, window_bounds = array<i64: 1, 32>}, {pipeline_mode = #tpu.pipeline_mode<synchronous>, transform_indices = @transform_3, window_bounds = array<i64: 1, 32>}, {pipeline_mode = #tpu.pipeline_mode<synchronous>, transform_indices = @transform_4, window_bounds = array<i64: 2, 32, 96>}, {pipeline_mode = #tpu.pipeline_mode<synchronous>, transform_indices = @transform_5, window_bounds = array<i64: 2, 1, 96>}, {pipeline_mode = #tpu.pipeline_mode<synchronous>, transform_indices = @transform_6, window_bounds = array<i64: 2, 32, 32>}, {pipeline_mode = #tpu.pipeline_mode<synchronous>, transform_indices = @transform_7, window_bounds = array<i64: 2, 1, 32>}, {pipeline_mode = #tpu.pipeline_mode<synchronous>, transform_indices = @transform_8, window_bounds = array<i64: 2, 1, 32>}, {pipeline_mode = #tpu.pipeline_mode<synchronous>, transform_indices = @transform_9, window_bounds = array<i64: 2, 1, 32>}, {pipeline_mode = #tpu.pipeline_mode<synchronous>, transform_indices = @transform_10, window_bounds = array<i64: 2, 32, 64>}, {pipeline_mode = #tpu.pipeline_mode<synchronous>, transform_indices = @transform_11, window_bounds = array<i64: 2, 1, 64>}, {pipeline_mode = #tpu.pipeline_mode<synchronous>, transform_indices = @transform_12, window_bounds = array<i64: 2, 64, 32>}, {pipeline_mode = #tpu.pipeline_mode<synchronous>, transform_indices = @transform_13, window_bounds = array<i64: 2, 1, 32>}, {pipeline_mode = #tpu.pipeline_mode<synchronous>, transform_indices = @transform_14, window_bounds = array<i64: 2, 1, 32>}, {pipeline_mode = #tpu.pipeline_mode<synchronous>, transform_indices = @transform_15, window_bounds = array<i64: 2, 1, 32>}, {pipeline_mode = #tpu.pipeline_mode<synchronous>, transform_indices = @transform_16, window_bounds = array<i64: 32, 32>}, {pipeline_mode = #tpu.pipeline_mode<synchronous>, transform_indices = @transform_17, window_bounds = array<i64: 1, 32>}, {pipeline_mode = #tpu.pipeline_mode<synchronous>, transform_indices = @transform_18, window_bounds = array<i64: 32, 5>}, {pipeline_mode = #tpu.pipeline_mode<synchronous>, transform_indices = @transform_19, window_bounds = array<i64: 1, 5>}, {pipeline_mode = #tpu.pipeline_mode<synchronous>, transform_indices = @transform_20, window_bounds = array<i64: 2, 5>}]} {
    %c0 = arith.constant 0 : index
    %c0_0 = arith.constant 0 : index
    %0 = vector.load %arg1[%c0, %c0_0] : memref<16x32xf32, #tpu.memory_space<vmem>>, vector<16x32xf32>
    %c0_1 = arith.constant 0 : index
    %c0_2 = arith.constant 0 : index
    %1 = vector.load %arg3[%c0_1, %c0_2] : memref<1x32xf32, #tpu.memory_space<vmem>>, vector<1x32xf32>
    %c0_3 = arith.constant 0 : index
    %c0_4 = arith.constant 0 : index
    %2 = vector.load %arg4[%c0_3, %c0_4] : memref<1x32xf32, #tpu.memory_space<vmem>>, vector<1x32xf32>
    %cst = arith.constant dense<0.000000e+00> : vector<16xf32>
    %3 = vector.multi_reduction <add>, %0, %cst [1] : vector<16x32xf32> to vector<16xf32>
    %4 = vector.shape_cast %3 : vector<16xf32> to vector<16x1xf32>
    %cst_5 = arith.constant 3.200000e+01 : f32
    %5 = vector.broadcast %cst_5 : f32 to vector<16x1xf32>
    %6 = arith.divf %4, %5 : vector<16x1xf32>
    %7 = vector.broadcast %6 : vector<16x1xf32> to vector<16x32xf32>
    %8 = arith.subf %0, %7 : vector<16x32xf32>
    %9 = arith.mulf %8, %8 : vector<16x32xf32>
    %cst_6 = arith.constant dense<0.000000e+00> : vector<16xf32>
    %10 = vector.multi_reduction <add>, %9, %cst_6 [1] : vector<16x32xf32> to vector<16xf32>
    %11 = vector.shape_cast %10 : vector<16xf32> to vector<16x1xf32>
    %cst_7 = arith.constant 3.200000e+01 : f32
    %12 = vector.broadcast %cst_7 : f32 to vector<16x1xf32>
    %13 = arith.divf %11, %12 : vector<16x1xf32>
    %cst_8 = arith.constant 9.99999996E-13 : f32
    %14 = vector.broadcast %cst_8 : f32 to vector<16x1xf32>
    %15 = arith.addf %13, %14 : vector<16x1xf32>
    %16 = math.rsqrt %15 : vector<16x1xf32>
    %17 = vector.broadcast %16 : vector<16x1xf32> to vector<16x32xf32>
    %18 = arith.mulf %8, %17 : vector<16x32xf32>
    %19 = vector.broadcast %1 : vector<1x32xf32> to vector<16x32xf32>
    %20 = arith.mulf %18, %19 : vector<16x32xf32>
    %21 = vector.broadcast %2 : vector<1x32xf32> to vector<16x32xf32>
    %22 = arith.addf %20, %21 : vector<16x32xf32>
    %c0_9 = arith.constant 0 : index
    %c0_10 = arith.constant 0 : index
    %23 = vector.load %arg2[%c0_9, %c0_10] : memref<2x8xf32, #tpu.memory_space<vmem>>, vector<2x8xf32>
    %cst_11 = arith.constant 1.000000e+00 : f32
    %24 = vector.broadcast %cst_11 : f32 to vector<2x8xf32>
    %25 = arith.subf %24, %23 : vector<2x8xf32>
    %cst_12 = arith.constant -1.000000e+04 : f32
    %26 = vector.broadcast %cst_12 : f32 to vector<2x8xf32>
    %27 = arith.mulf %25, %26 : vector<2x8xf32>
    %28 = tpu.iota {dimensions = array<i32: 1>} : vector<1x32xi32>
    %c0_i32 = arith.constant 0 : i32
    %29 = vector.broadcast %c0_i32 : i32 to vector<1x32xi32>
    %30 = arith.cmpi sge, %28, %29 : vector<1x32xi32>
    %c8_i32 = arith.constant 8 : i32
    %31 = vector.broadcast %c8_i32 : i32 to vector<1x32xi32>
    %32 = arith.cmpi slt, %28, %31 : vector<1x32xi32>
    %33 = arith.andi %30, %32 : vector<1x32xi1>
    %34 = arith.extui %33 : vector<1x32xi1> to vector<1x32xi32>
    %35 = arith.sitofp %34 : vector<1x32xi32> to vector<1x32xf32>
    %c8_i32_13 = arith.constant 8 : i32
    %36 = vector.broadcast %c8_i32_13 : i32 to vector<1x32xi32>
    %37 = arith.cmpi sge, %28, %36 : vector<1x32xi32>
    %c16_i32 = arith.constant 16 : i32
    %38 = vector.broadcast %c16_i32 : i32 to vector<1x32xi32>
    %39 = arith.cmpi slt, %28, %38 : vector<1x32xi32>
    %40 = arith.andi %37, %39 : vector<1x32xi1>
    %41 = arith.extui %40 : vector<1x32xi1> to vector<1x32xi32>
    %42 = arith.sitofp %41 : vector<1x32xi32> to vector<1x32xf32>
    %c16_i32_14 = arith.constant 16 : i32
    %43 = vector.broadcast %c16_i32_14 : i32 to vector<1x32xi32>
    %44 = arith.cmpi sge, %28, %43 : vector<1x32xi32>
    %c24_i32 = arith.constant 24 : i32
    %45 = vector.broadcast %c24_i32 : i32 to vector<1x32xi32>
    %46 = arith.cmpi slt, %28, %45 : vector<1x32xi32>
    %47 = arith.andi %44, %46 : vector<1x32xi1>
    %48 = arith.extui %47 : vector<1x32xi1> to vector<1x32xi32>
    %49 = arith.sitofp %48 : vector<1x32xi32> to vector<1x32xf32>
    %c24_i32_15 = arith.constant 24 : i32
    %50 = vector.broadcast %c24_i32_15 : i32 to vector<1x32xi32>
    %51 = arith.cmpi sge, %28, %50 : vector<1x32xi32>
    %c32_i32 = arith.constant 32 : i32
    %52 = vector.broadcast %c32_i32 : i32 to vector<1x32xi32>
    %53 = arith.cmpi slt, %28, %52 : vector<1x32xi32>
    %54 = arith.andi %51, %53 : vector<1x32xi1>
    %55 = arith.extui %54 : vector<1x32xi1> to vector<1x32xi32>
    %56 = arith.sitofp %55 : vector<1x32xi32> to vector<1x32xf32>
    %c0_16 = arith.constant 0 : index
    %c0_17 = arith.constant 0 : index
    %c0_18 = arith.constant 0 : index
    %57 = vector.load %arg5[%c0_16, %c0_17, %c0_18] : memref<2x32x96xbf16, #tpu.memory_space<vmem>>, vector<1x32x96xbf16>
    %58 = vector.shape_cast %57 : vector<1x32x96xbf16> to vector<32x96xbf16>
    %59 = arith.truncf %22 : vector<16x32xf32> to vector<16x32xbf16>
    %cst_19 = arith.constant dense<0.000000e+00> : vector<16x96xf32>
    %60 = tpu.matmul %59, %58, %cst_19 {dimension_numbers = #tpu.dot_dimension_numbers<[1], [0], [0], [1], [0, 0, 1, 1], [], []>} : vector<16x32xbf16>, vector<32x96xbf16>, vector<16x96xf32> -> vector<16x96xf32>
    %c0_20 = arith.constant 0 : index
    %c0_21 = arith.constant 0 : index
    %c0_22 = arith.constant 0 : index
    %61 = vector.load %arg6[%c0_20, %c0_21, %c0_22] : memref<2x1x96xf32, #tpu.memory_space<vmem>>, vector<1x1x96xf32>
    %62 = vector.shape_cast %61 : vector<1x1x96xf32> to vector<1x96xf32>
    %63 = vector.broadcast %62 : vector<1x96xf32> to vector<16x96xf32>
    %64 = arith.addf %60, %63 : vector<16x96xf32>
    %65 = vector.extract_strided_slice %64 {offsets = [0, 0], sizes = [8, 32], strides = [1, 1]} : vector<16x96xf32> to vector<8x32xf32>
    %66 = vector.extract_strided_slice %64 {offsets = [0, 32], sizes = [8, 32], strides = [1, 1]} : vector<16x96xf32> to vector<8x32xf32>
    %67 = vector.extract_strided_slice %64 {offsets = [0, 64], sizes = [8, 32], strides = [1, 1]} : vector<16x96xf32> to vector<8x32xf32>
    %68 = vector.extract_strided_slice %27 {offsets = [0, 0], sizes = [1, 8], strides = [1, 1]} : vector<2x8xf32> to vector<1x8xf32>
    %cst_23 = arith.constant 0.000000e+00 : f32
    %69 = vector.broadcast %cst_23 : f32 to vector<8x32xf32>
    %70 = vector.broadcast %35 : vector<1x32xf32> to vector<8x32xf32>
    %71 = arith.mulf %65, %70 : vector<8x32xf32>
    %cst_24 = arith.constant dense<0.000000e+00> : vector<8x8xf32>
    %72 = tpu.matmul %71, %66, %cst_24 {dimension_numbers = #tpu.dot_dimension_numbers<[1], [1], [0], [0], [0, 0, 1, 0], [], []>} : vector<8x32xf32>, vector<8x32xf32>, vector<8x8xf32> -> vector<8x8xf32>
    %cst_25 = arith.constant 0.353553385 : f32
    %73 = vector.broadcast %cst_25 : f32 to vector<8x8xf32>
    %74 = arith.mulf %72, %73 : vector<8x8xf32>
    %75 = vector.broadcast %68 : vector<1x8xf32> to vector<8x8xf32>
    %76 = arith.addf %74, %75 : vector<8x8xf32>
    %cst_26 = arith.constant dense<0xFF800000> : vector<8xf32>
    %77 = vector.multi_reduction <maximumf>, %76, %cst_26 [1] : vector<8x8xf32> to vector<8xf32>
    %78 = vector.shape_cast %77 : vector<8xf32> to vector<8x1xf32>
    %79 = vector.broadcast %78 : vector<8x1xf32> to vector<8x8xf32>
    %80 = arith.subf %76, %79 : vector<8x8xf32>
    %81 = math.exp %80 : vector<8x8xf32>
    %cst_27 = arith.constant dense<0.000000e+00> : vector<8xf32>
    %82 = vector.multi_reduction <add>, %81, %cst_27 [1] : vector<8x8xf32> to vector<8xf32>
    %83 = vector.shape_cast %82 : vector<8xf32> to vector<8x1xf32>
    %84 = tpu.reciprocal %83 {approx = true} : vector<8x1xf32> -> vector<8x1xf32>
    %85 = vector.broadcast %84 : vector<8x1xf32> to vector<8x8xf32>
    %86 = arith.mulf %81, %85 : vector<8x8xf32>
    %87 = vector.broadcast %35 : vector<1x32xf32> to vector<8x32xf32>
    %88 = arith.mulf %67, %87 : vector<8x32xf32>
    %cst_28 = arith.constant dense<0.000000e+00> : vector<8x32xf32>
    %89 = tpu.matmul %86, %88, %cst_28 {dimension_numbers = #tpu.dot_dimension_numbers<[1], [0], [0], [1], [0, 0, 1, 1], [], []>} : vector<8x8xf32>, vector<8x32xf32>, vector<8x32xf32> -> vector<8x32xf32>
    %90 = arith.addf %69, %89 : vector<8x32xf32>
    %91 = vector.broadcast %42 : vector<1x32xf32> to vector<8x32xf32>
    %92 = arith.mulf %65, %91 : vector<8x32xf32>
    %cst_29 = arith.constant dense<0.000000e+00> : vector<8x8xf32>
    %93 = tpu.matmul %92, %66, %cst_29 {dimension_numbers = #tpu.dot_dimension_numbers<[1], [1], [0], [0], [0, 0, 1, 0], [], []>} : vector<8x32xf32>, vector<8x32xf32>, vector<8x8xf32> -> vector<8x8xf32>
    %cst_30 = arith.constant 0.353553385 : f32
    %94 = vector.broadcast %cst_30 : f32 to vector<8x8xf32>
    %95 = arith.mulf %93, %94 : vector<8x8xf32>
    %96 = vector.broadcast %68 : vector<1x8xf32> to vector<8x8xf32>
    %97 = arith.addf %95, %96 : vector<8x8xf32>
    %cst_31 = arith.constant dense<0xFF800000> : vector<8xf32>
    %98 = vector.multi_reduction <maximumf>, %97, %cst_31 [1] : vector<8x8xf32> to vector<8xf32>
    %99 = vector.shape_cast %98 : vector<8xf32> to vector<8x1xf32>
    %100 = vector.broadcast %99 : vector<8x1xf32> to vector<8x8xf32>
    %101 = arith.subf %97, %100 : vector<8x8xf32>
    %102 = math.exp %101 : vector<8x8xf32>
    %cst_32 = arith.constant dense<0.000000e+00> : vector<8xf32>
    %103 = vector.multi_reduction <add>, %102, %cst_32 [1] : vector<8x8xf32> to vector<8xf32>
    %104 = vector.shape_cast %103 : vector<8xf32> to vector<8x1xf32>
    %105 = tpu.reciprocal %104 {approx = true} : vector<8x1xf32> -> vector<8x1xf32>
    %106 = vector.broadcast %105 : vector<8x1xf32> to vector<8x8xf32>
    %107 = arith.mulf %102, %106 : vector<8x8xf32>
    %108 = vector.broadcast %42 : vector<1x32xf32> to vector<8x32xf32>
    %109 = arith.mulf %67, %108 : vector<8x32xf32>
    %cst_33 = arith.constant dense<0.000000e+00> : vector<8x32xf32>
    %110 = tpu.matmul %107, %109, %cst_33 {dimension_numbers = #tpu.dot_dimension_numbers<[1], [0], [0], [1], [0, 0, 1, 1], [], []>} : vector<8x8xf32>, vector<8x32xf32>, vector<8x32xf32> -> vector<8x32xf32>
    %111 = arith.addf %90, %110 : vector<8x32xf32>
    %112 = vector.broadcast %49 : vector<1x32xf32> to vector<8x32xf32>
    %113 = arith.mulf %65, %112 : vector<8x32xf32>
    %cst_34 = arith.constant dense<0.000000e+00> : vector<8x8xf32>
    %114 = tpu.matmul %113, %66, %cst_34 {dimension_numbers = #tpu.dot_dimension_numbers<[1], [1], [0], [0], [0, 0, 1, 0], [], []>} : vector<8x32xf32>, vector<8x32xf32>, vector<8x8xf32> -> vector<8x8xf32>
    %cst_35 = arith.constant 0.353553385 : f32
    %115 = vector.broadcast %cst_35 : f32 to vector<8x8xf32>
    %116 = arith.mulf %114, %115 : vector<8x8xf32>
    %117 = vector.broadcast %68 : vector<1x8xf32> to vector<8x8xf32>
    %118 = arith.addf %116, %117 : vector<8x8xf32>
    %cst_36 = arith.constant dense<0xFF800000> : vector<8xf32>
    %119 = vector.multi_reduction <maximumf>, %118, %cst_36 [1] : vector<8x8xf32> to vector<8xf32>
    %120 = vector.shape_cast %119 : vector<8xf32> to vector<8x1xf32>
    %121 = vector.broadcast %120 : vector<8x1xf32> to vector<8x8xf32>
    %122 = arith.subf %118, %121 : vector<8x8xf32>
    %123 = math.exp %122 : vector<8x8xf32>
    %cst_37 = arith.constant dense<0.000000e+00> : vector<8xf32>
    %124 = vector.multi_reduction <add>, %123, %cst_37 [1] : vector<8x8xf32> to vector<8xf32>
    %125 = vector.shape_cast %124 : vector<8xf32> to vector<8x1xf32>
    %126 = tpu.reciprocal %125 {approx = true} : vector<8x1xf32> -> vector<8x1xf32>
    %127 = vector.broadcast %126 : vector<8x1xf32> to vector<8x8xf32>
    %128 = arith.mulf %123, %127 : vector<8x8xf32>
    %129 = vector.broadcast %49 : vector<1x32xf32> to vector<8x32xf32>
    %130 = arith.mulf %67, %129 : vector<8x32xf32>
    %cst_38 = arith.constant dense<0.000000e+00> : vector<8x32xf32>
    %131 = tpu.matmul %128, %130, %cst_38 {dimension_numbers = #tpu.dot_dimension_numbers<[1], [0], [0], [1], [0, 0, 1, 1], [], []>} : vector<8x8xf32>, vector<8x32xf32>, vector<8x32xf32> -> vector<8x32xf32>
    %132 = arith.addf %111, %131 : vector<8x32xf32>
    %133 = vector.broadcast %56 : vector<1x32xf32> to vector<8x32xf32>
    %134 = arith.mulf %65, %133 : vector<8x32xf32>
    %cst_39 = arith.constant dense<0.000000e+00> : vector<8x8xf32>
    %135 = tpu.matmul %134, %66, %cst_39 {dimension_numbers = #tpu.dot_dimension_numbers<[1], [1], [0], [0], [0, 0, 1, 0], [], []>} : vector<8x32xf32>, vector<8x32xf32>, vector<8x8xf32> -> vector<8x8xf32>
    %cst_40 = arith.constant 0.353553385 : f32
    %136 = vector.broadcast %cst_40 : f32 to vector<8x8xf32>
    %137 = arith.mulf %135, %136 : vector<8x8xf32>
    %138 = vector.broadcast %68 : vector<1x8xf32> to vector<8x8xf32>
    %139 = arith.addf %137, %138 : vector<8x8xf32>
    %cst_41 = arith.constant dense<0xFF800000> : vector<8xf32>
    %140 = vector.multi_reduction <maximumf>, %139, %cst_41 [1] : vector<8x8xf32> to vector<8xf32>
    %141 = vector.shape_cast %140 : vector<8xf32> to vector<8x1xf32>
    %142 = vector.broadcast %141 : vector<8x1xf32> to vector<8x8xf32>
    %143 = arith.subf %139, %142 : vector<8x8xf32>
    %144 = math.exp %143 : vector<8x8xf32>
    %cst_42 = arith.constant dense<0.000000e+00> : vector<8xf32>
    %145 = vector.multi_reduction <add>, %144, %cst_42 [1] : vector<8x8xf32> to vector<8xf32>
    %146 = vector.shape_cast %145 : vector<8xf32> to vector<8x1xf32>
    %147 = tpu.reciprocal %146 {approx = true} : vector<8x1xf32> -> vector<8x1xf32>
    %148 = vector.broadcast %147 : vector<8x1xf32> to vector<8x8xf32>
    %149 = arith.mulf %144, %148 : vector<8x8xf32>
    %150 = vector.broadcast %56 : vector<1x32xf32> to vector<8x32xf32>
    %151 = arith.mulf %67, %150 : vector<8x32xf32>
    %cst_43 = arith.constant dense<0.000000e+00> : vector<8x32xf32>
    %152 = tpu.matmul %149, %151, %cst_43 {dimension_numbers = #tpu.dot_dimension_numbers<[1], [0], [0], [1], [0, 0, 1, 1], [], []>} : vector<8x8xf32>, vector<8x32xf32>, vector<8x32xf32> -> vector<8x32xf32>
    %153 = arith.addf %132, %152 : vector<8x32xf32>
    %154 = vector.extract_strided_slice %64 {offsets = [8, 0], sizes = [8, 32], strides = [1, 1]} : vector<16x96xf32> to vector<8x32xf32>
    %155 = vector.extract_strided_slice %64 {offsets = [8, 32], sizes = [8, 32], strides = [1, 1]} : vector<16x96xf32> to vector<8x32xf32>
    %156 = vector.extract_strided_slice %64 {offsets = [8, 64], sizes = [8, 32], strides = [1, 1]} : vector<16x96xf32> to vector<8x32xf32>
    %157 = vector.extract_strided_slice %27 {offsets = [1, 0], sizes = [1, 8], strides = [1, 1]} : vector<2x8xf32> to vector<1x8xf32>
    %cst_44 = arith.constant 0.000000e+00 : f32
    %158 = vector.broadcast %cst_44 : f32 to vector<8x32xf32>
    %159 = vector.broadcast %35 : vector<1x32xf32> to vector<8x32xf32>
    %160 = arith.mulf %154, %159 : vector<8x32xf32>
    %cst_45 = arith.constant dense<0.000000e+00> : vector<8x8xf32>
    %161 = tpu.matmul %160, %155, %cst_45 {dimension_numbers = #tpu.dot_dimension_numbers<[1], [1], [0], [0], [0, 0, 1, 0], [], []>} : vector<8x32xf32>, vector<8x32xf32>, vector<8x8xf32> -> vector<8x8xf32>
    %cst_46 = arith.constant 0.353553385 : f32
    %162 = vector.broadcast %cst_46 : f32 to vector<8x8xf32>
    %163 = arith.mulf %161, %162 : vector<8x8xf32>
    %164 = vector.broadcast %157 : vector<1x8xf32> to vector<8x8xf32>
    %165 = arith.addf %163, %164 : vector<8x8xf32>
    %cst_47 = arith.constant dense<0xFF800000> : vector<8xf32>
    %166 = vector.multi_reduction <maximumf>, %165, %cst_47 [1] : vector<8x8xf32> to vector<8xf32>
    %167 = vector.shape_cast %166 : vector<8xf32> to vector<8x1xf32>
    %168 = vector.broadcast %167 : vector<8x1xf32> to vector<8x8xf32>
    %169 = arith.subf %165, %168 : vector<8x8xf32>
    %170 = math.exp %169 : vector<8x8xf32>
    %cst_48 = arith.constant dense<0.000000e+00> : vector<8xf32>
    %171 = vector.multi_reduction <add>, %170, %cst_48 [1] : vector<8x8xf32> to vector<8xf32>
    %172 = vector.shape_cast %171 : vector<8xf32> to vector<8x1xf32>
    %173 = tpu.reciprocal %172 {approx = true} : vector<8x1xf32> -> vector<8x1xf32>
    %174 = vector.broadcast %173 : vector<8x1xf32> to vector<8x8xf32>
    %175 = arith.mulf %170, %174 : vector<8x8xf32>
    %176 = vector.broadcast %35 : vector<1x32xf32> to vector<8x32xf32>
    %177 = arith.mulf %156, %176 : vector<8x32xf32>
    %cst_49 = arith.constant dense<0.000000e+00> : vector<8x32xf32>
    %178 = tpu.matmul %175, %177, %cst_49 {dimension_numbers = #tpu.dot_dimension_numbers<[1], [0], [0], [1], [0, 0, 1, 1], [], []>} : vector<8x8xf32>, vector<8x32xf32>, vector<8x32xf32> -> vector<8x32xf32>
    %179 = arith.addf %158, %178 : vector<8x32xf32>
    %180 = vector.broadcast %42 : vector<1x32xf32> to vector<8x32xf32>
    %181 = arith.mulf %154, %180 : vector<8x32xf32>
    %cst_50 = arith.constant dense<0.000000e+00> : vector<8x8xf32>
    %182 = tpu.matmul %181, %155, %cst_50 {dimension_numbers = #tpu.dot_dimension_numbers<[1], [1], [0], [0], [0, 0, 1, 0], [], []>} : vector<8x32xf32>, vector<8x32xf32>, vector<8x8xf32> -> vector<8x8xf32>
    %cst_51 = arith.constant 0.353553385 : f32
    %183 = vector.broadcast %cst_51 : f32 to vector<8x8xf32>
    %184 = arith.mulf %182, %183 : vector<8x8xf32>
    %185 = vector.broadcast %157 : vector<1x8xf32> to vector<8x8xf32>
    %186 = arith.addf %184, %185 : vector<8x8xf32>
    %cst_52 = arith.constant dense<0xFF800000> : vector<8xf32>
    %187 = vector.multi_reduction <maximumf>, %186, %cst_52 [1] : vector<8x8xf32> to vector<8xf32>
    %188 = vector.shape_cast %187 : vector<8xf32> to vector<8x1xf32>
    %189 = vector.broadcast %188 : vector<8x1xf32> to vector<8x8xf32>
    %190 = arith.subf %186, %189 : vector<8x8xf32>
    %191 = math.exp %190 : vector<8x8xf32>
    %cst_53 = arith.constant dense<0.000000e+00> : vector<8xf32>
    %192 = vector.multi_reduction <add>, %191, %cst_53 [1] : vector<8x8xf32> to vector<8xf32>
    %193 = vector.shape_cast %192 : vector<8xf32> to vector<8x1xf32>
    %194 = tpu.reciprocal %193 {approx = true} : vector<8x1xf32> -> vector<8x1xf32>
    %195 = vector.broadcast %194 : vector<8x1xf32> to vector<8x8xf32>
    %196 = arith.mulf %191, %195 : vector<8x8xf32>
    %197 = vector.broadcast %42 : vector<1x32xf32> to vector<8x32xf32>
    %198 = arith.mulf %156, %197 : vector<8x32xf32>
    %cst_54 = arith.constant dense<0.000000e+00> : vector<8x32xf32>
    %199 = tpu.matmul %196, %198, %cst_54 {dimension_numbers = #tpu.dot_dimension_numbers<[1], [0], [0], [1], [0, 0, 1, 1], [], []>} : vector<8x8xf32>, vector<8x32xf32>, vector<8x32xf32> -> vector<8x32xf32>
    %200 = arith.addf %179, %199 : vector<8x32xf32>
    %201 = vector.broadcast %49 : vector<1x32xf32> to vector<8x32xf32>
    %202 = arith.mulf %154, %201 : vector<8x32xf32>
    %cst_55 = arith.constant dense<0.000000e+00> : vector<8x8xf32>
    %203 = tpu.matmul %202, %155, %cst_55 {dimension_numbers = #tpu.dot_dimension_numbers<[1], [1], [0], [0], [0, 0, 1, 0], [], []>} : vector<8x32xf32>, vector<8x32xf32>, vector<8x8xf32> -> vector<8x8xf32>
    %cst_56 = arith.constant 0.353553385 : f32
    %204 = vector.broadcast %cst_56 : f32 to vector<8x8xf32>
    %205 = arith.mulf %203, %204 : vector<8x8xf32>
    %206 = vector.broadcast %157 : vector<1x8xf32> to vector<8x8xf32>
    %207 = arith.addf %205, %206 : vector<8x8xf32>
    %cst_57 = arith.constant dense<0xFF800000> : vector<8xf32>
    %208 = vector.multi_reduction <maximumf>, %207, %cst_57 [1] : vector<8x8xf32> to vector<8xf32>
    %209 = vector.shape_cast %208 : vector<8xf32> to vector<8x1xf32>
    %210 = vector.broadcast %209 : vector<8x1xf32> to vector<8x8xf32>
    %211 = arith.subf %207, %210 : vector<8x8xf32>
    %212 = math.exp %211 : vector<8x8xf32>
    %cst_58 = arith.constant dense<0.000000e+00> : vector<8xf32>
    %213 = vector.multi_reduction <add>, %212, %cst_58 [1] : vector<8x8xf32> to vector<8xf32>
    %214 = vector.shape_cast %213 : vector<8xf32> to vector<8x1xf32>
    %215 = tpu.reciprocal %214 {approx = true} : vector<8x1xf32> -> vector<8x1xf32>
    %216 = vector.broadcast %215 : vector<8x1xf32> to vector<8x8xf32>
    %217 = arith.mulf %212, %216 : vector<8x8xf32>
    %218 = vector.broadcast %49 : vector<1x32xf32> to vector<8x32xf32>
    %219 = arith.mulf %156, %218 : vector<8x32xf32>
    %cst_59 = arith.constant dense<0.000000e+00> : vector<8x32xf32>
    %220 = tpu.matmul %217, %219, %cst_59 {dimension_numbers = #tpu.dot_dimension_numbers<[1], [0], [0], [1], [0, 0, 1, 1], [], []>} : vector<8x8xf32>, vector<8x32xf32>, vector<8x32xf32> -> vector<8x32xf32>
    %221 = arith.addf %200, %220 : vector<8x32xf32>
    %222 = vector.broadcast %56 : vector<1x32xf32> to vector<8x32xf32>
    %223 = arith.mulf %154, %222 : vector<8x32xf32>
    %cst_60 = arith.constant dense<0.000000e+00> : vector<8x8xf32>
    %224 = tpu.matmul %223, %155, %cst_60 {dimension_numbers = #tpu.dot_dimension_numbers<[1], [1], [0], [0], [0, 0, 1, 0], [], []>} : vector<8x32xf32>, vector<8x32xf32>, vector<8x8xf32> -> vector<8x8xf32>
    %cst_61 = arith.constant 0.353553385 : f32
    %225 = vector.broadcast %cst_61 : f32 to vector<8x8xf32>
    %226 = arith.mulf %224, %225 : vector<8x8xf32>
    %227 = vector.broadcast %157 : vector<1x8xf32> to vector<8x8xf32>
    %228 = arith.addf %226, %227 : vector<8x8xf32>
    %cst_62 = arith.constant dense<0xFF800000> : vector<8xf32>
    %229 = vector.multi_reduction <maximumf>, %228, %cst_62 [1] : vector<8x8xf32> to vector<8xf32>
    %230 = vector.shape_cast %229 : vector<8xf32> to vector<8x1xf32>
    %231 = vector.broadcast %230 : vector<8x1xf32> to vector<8x8xf32>
    %232 = arith.subf %228, %231 : vector<8x8xf32>
    %233 = math.exp %232 : vector<8x8xf32>
    %cst_63 = arith.constant dense<0.000000e+00> : vector<8xf32>
    %234 = vector.multi_reduction <add>, %233, %cst_63 [1] : vector<8x8xf32> to vector<8xf32>
    %235 = vector.shape_cast %234 : vector<8xf32> to vector<8x1xf32>
    %236 = tpu.reciprocal %235 {approx = true} : vector<8x1xf32> -> vector<8x1xf32>
    %237 = vector.broadcast %236 : vector<8x1xf32> to vector<8x8xf32>
    %238 = arith.mulf %233, %237 : vector<8x8xf32>
    %239 = vector.broadcast %56 : vector<1x32xf32> to vector<8x32xf32>
    %240 = arith.mulf %156, %239 : vector<8x32xf32>
    %cst_64 = arith.constant dense<0.000000e+00> : vector<8x32xf32>
    %241 = tpu.matmul %238, %240, %cst_64 {dimension_numbers = #tpu.dot_dimension_numbers<[1], [0], [0], [1], [0, 0, 1, 1], [], []>} : vector<8x8xf32>, vector<8x32xf32>, vector<8x32xf32> -> vector<8x32xf32>
    %242 = arith.addf %221, %241 : vector<8x32xf32>
    %243 = tpu.concatenate %153, %242 in 0 : vector<8x32xf32>, vector<8x32xf32> -> vector<16x32xf32>
    %c0_65 = arith.constant 0 : index
    %c0_66 = arith.constant 0 : index
    %c0_67 = arith.constant 0 : index
    %244 = vector.load %arg7[%c0_65, %c0_66, %c0_67] : memref<2x32x32xbf16, #tpu.memory_space<vmem>>, vector<1x32x32xbf16>
    %245 = vector.shape_cast %244 : vector<1x32x32xbf16> to vector<32x32xbf16>
    %246 = arith.truncf %243 : vector<16x32xf32> to vector<16x32xbf16>
    %cst_68 = arith.constant dense<0.000000e+00> : vector<16x32xf32>
    %247 = tpu.matmul %246, %245, %cst_68 {dimension_numbers = #tpu.dot_dimension_numbers<[1], [0], [0], [1], [0, 0, 1, 1], [], []>} : vector<16x32xbf16>, vector<32x32xbf16>, vector<16x32xf32> -> vector<16x32xf32>
    %c0_69 = arith.constant 0 : index
    %c0_70 = arith.constant 0 : index
    %c0_71 = arith.constant 0 : index
    %248 = vector.load %arg8[%c0_69, %c0_70, %c0_71] : memref<2x1x32xf32, #tpu.memory_space<vmem>>, vector<1x1x32xf32>
    %249 = vector.shape_cast %248 : vector<1x1x32xf32> to vector<1x32xf32>
    %250 = vector.broadcast %249 : vector<1x32xf32> to vector<16x32xf32>
    %251 = arith.addf %247, %250 : vector<16x32xf32>
    %252 = arith.addf %251, %22 : vector<16x32xf32>
    %c0_72 = arith.constant 0 : index
    %c0_73 = arith.constant 0 : index
    %c0_74 = arith.constant 0 : index
    %253 = vector.load %arg9[%c0_72, %c0_73, %c0_74] : memref<2x1x32xf32, #tpu.memory_space<vmem>>, vector<1x1x32xf32>
    %254 = vector.shape_cast %253 : vector<1x1x32xf32> to vector<1x32xf32>
    %c0_75 = arith.constant 0 : index
    %c0_76 = arith.constant 0 : index
    %c0_77 = arith.constant 0 : index
    %255 = vector.load %arg10[%c0_75, %c0_76, %c0_77] : memref<2x1x32xf32, #tpu.memory_space<vmem>>, vector<1x1x32xf32>
    %256 = vector.shape_cast %255 : vector<1x1x32xf32> to vector<1x32xf32>
    %cst_78 = arith.constant dense<0.000000e+00> : vector<16xf32>
    %257 = vector.multi_reduction <add>, %252, %cst_78 [1] : vector<16x32xf32> to vector<16xf32>
    %258 = vector.shape_cast %257 : vector<16xf32> to vector<16x1xf32>
    %cst_79 = arith.constant 3.200000e+01 : f32
    %259 = vector.broadcast %cst_79 : f32 to vector<16x1xf32>
    %260 = arith.divf %258, %259 : vector<16x1xf32>
    %261 = vector.broadcast %260 : vector<16x1xf32> to vector<16x32xf32>
    %262 = arith.subf %252, %261 : vector<16x32xf32>
    %263 = arith.mulf %262, %262 : vector<16x32xf32>
    %cst_80 = arith.constant dense<0.000000e+00> : vector<16xf32>
    %264 = vector.multi_reduction <add>, %263, %cst_80 [1] : vector<16x32xf32> to vector<16xf32>
    %265 = vector.shape_cast %264 : vector<16xf32> to vector<16x1xf32>
    %cst_81 = arith.constant 3.200000e+01 : f32
    %266 = vector.broadcast %cst_81 : f32 to vector<16x1xf32>
    %267 = arith.divf %265, %266 : vector<16x1xf32>
    %cst_82 = arith.constant 9.99999996E-13 : f32
    %268 = vector.broadcast %cst_82 : f32 to vector<16x1xf32>
    %269 = arith.addf %267, %268 : vector<16x1xf32>
    %270 = math.rsqrt %269 : vector<16x1xf32>
    %271 = vector.broadcast %270 : vector<16x1xf32> to vector<16x32xf32>
    %272 = arith.mulf %262, %271 : vector<16x32xf32>
    %273 = vector.broadcast %254 : vector<1x32xf32> to vector<16x32xf32>
    %274 = arith.mulf %272, %273 : vector<16x32xf32>
    %275 = vector.broadcast %256 : vector<1x32xf32> to vector<16x32xf32>
    %276 = arith.addf %274, %275 : vector<16x32xf32>
    %c0_83 = arith.constant 0 : index
    %c0_84 = arith.constant 0 : index
    %c0_85 = arith.constant 0 : index
    %277 = vector.load %arg11[%c0_83, %c0_84, %c0_85] : memref<2x32x64xbf16, #tpu.memory_space<vmem>>, vector<1x32x64xbf16>
    %278 = vector.shape_cast %277 : vector<1x32x64xbf16> to vector<32x64xbf16>
    %279 = arith.truncf %276 : vector<16x32xf32> to vector<16x32xbf16>
    %cst_86 = arith.constant dense<0.000000e+00> : vector<16x64xf32>
    %280 = tpu.matmul %279, %278, %cst_86 {dimension_numbers = #tpu.dot_dimension_numbers<[1], [0], [0], [1], [0, 0, 1, 1], [], []>} : vector<16x32xbf16>, vector<32x64xbf16>, vector<16x64xf32> -> vector<16x64xf32>
    %c0_87 = arith.constant 0 : index
    %c0_88 = arith.constant 0 : index
    %c0_89 = arith.constant 0 : index
    %281 = vector.load %arg12[%c0_87, %c0_88, %c0_89] : memref<2x1x64xf32, #tpu.memory_space<vmem>>, vector<1x1x64xf32>
    %282 = vector.shape_cast %281 : vector<1x1x64xf32> to vector<1x64xf32>
    %283 = vector.broadcast %282 : vector<1x64xf32> to vector<16x64xf32>
    %284 = arith.addf %280, %283 : vector<16x64xf32>
    %cst_90 = arith.constant 5.000000e-01 : f32
    %285 = vector.broadcast %cst_90 : f32 to vector<16x64xf32>
    %286 = arith.mulf %285, %284 : vector<16x64xf32>
    %cst_91 = arith.constant 4.471500e-02 : f32
    %287 = vector.broadcast %cst_91 : f32 to vector<16x64xf32>
    %288 = arith.mulf %287, %284 : vector<16x64xf32>
    %289 = arith.mulf %288, %284 : vector<16x64xf32>
    %290 = arith.mulf %289, %284 : vector<16x64xf32>
    %291 = arith.addf %284, %290 : vector<16x64xf32>
    %cst_92 = arith.constant 0.797884583 : f32
    %292 = vector.broadcast %cst_92 : f32 to vector<16x64xf32>
    %293 = arith.mulf %292, %291 : vector<16x64xf32>
    %294 = math.tanh %293 : vector<16x64xf32>
    %cst_93 = arith.constant 1.000000e+00 : f32
    %295 = vector.broadcast %cst_93 : f32 to vector<16x64xf32>
    %296 = arith.addf %295, %294 : vector<16x64xf32>
    %297 = arith.mulf %286, %296 : vector<16x64xf32>
    %c0_94 = arith.constant 0 : index
    %c0_95 = arith.constant 0 : index
    %c0_96 = arith.constant 0 : index
    %298 = vector.load %arg13[%c0_94, %c0_95, %c0_96] : memref<2x64x32xbf16, #tpu.memory_space<vmem>>, vector<1x64x32xbf16>
    %299 = vector.shape_cast %298 : vector<1x64x32xbf16> to vector<64x32xbf16>
    %300 = arith.truncf %297 : vector<16x64xf32> to vector<16x64xbf16>
    %cst_97 = arith.constant dense<0.000000e+00> : vector<16x32xf32>
    %301 = tpu.matmul %300, %299, %cst_97 {dimension_numbers = #tpu.dot_dimension_numbers<[1], [0], [0], [1], [0, 0, 1, 1], [], []>} : vector<16x64xbf16>, vector<64x32xbf16>, vector<16x32xf32> -> vector<16x32xf32>
    %c0_98 = arith.constant 0 : index
    %c0_99 = arith.constant 0 : index
    %c0_100 = arith.constant 0 : index
    %302 = vector.load %arg14[%c0_98, %c0_99, %c0_100] : memref<2x1x32xf32, #tpu.memory_space<vmem>>, vector<1x1x32xf32>
    %303 = vector.shape_cast %302 : vector<1x1x32xf32> to vector<1x32xf32>
    %304 = vector.broadcast %303 : vector<1x32xf32> to vector<16x32xf32>
    %305 = arith.addf %301, %304 : vector<16x32xf32>
    %306 = arith.addf %305, %276 : vector<16x32xf32>
    %c0_101 = arith.constant 0 : index
    %c0_102 = arith.constant 0 : index
    %c0_103 = arith.constant 0 : index
    %307 = vector.load %arg15[%c0_101, %c0_102, %c0_103] : memref<2x1x32xf32, #tpu.memory_space<vmem>>, vector<1x1x32xf32>
    %308 = vector.shape_cast %307 : vector<1x1x32xf32> to vector<1x32xf32>
    %c0_104 = arith.constant 0 : index
    %c0_105 = arith.constant 0 : index
    %c0_106 = arith.constant 0 : index
    %309 = vector.load %arg16[%c0_104, %c0_105, %c0_106] : memref<2x1x32xf32, #tpu.memory_space<vmem>>, vector<1x1x32xf32>
    %310 = vector.shape_cast %309 : vector<1x1x32xf32> to vector<1x32xf32>
    %cst_107 = arith.constant dense<0.000000e+00> : vector<16xf32>
    %311 = vector.multi_reduction <add>, %306, %cst_107 [1] : vector<16x32xf32> to vector<16xf32>
    %312 = vector.shape_cast %311 : vector<16xf32> to vector<16x1xf32>
    %cst_108 = arith.constant 3.200000e+01 : f32
    %313 = vector.broadcast %cst_108 : f32 to vector<16x1xf32>
    %314 = arith.divf %312, %313 : vector<16x1xf32>
    %315 = vector.broadcast %314 : vector<16x1xf32> to vector<16x32xf32>
    %316 = arith.subf %306, %315 : vector<16x32xf32>
    %317 = arith.mulf %316, %316 : vector<16x32xf32>
    %cst_109 = arith.constant dense<0.000000e+00> : vector<16xf32>
    %318 = vector.multi_reduction <add>, %317, %cst_109 [1] : vector<16x32xf32> to vector<16xf32>
    %319 = vector.shape_cast %318 : vector<16xf32> to vector<16x1xf32>
    %cst_110 = arith.constant 3.200000e+01 : f32
    %320 = vector.broadcast %cst_110 : f32 to vector<16x1xf32>
    %321 = arith.divf %319, %320 : vector<16x1xf32>
    %cst_111 = arith.constant 9.99999996E-13 : f32
    %322 = vector.broadcast %cst_111 : f32 to vector<16x1xf32>
    %323 = arith.addf %321, %322 : vector<16x1xf32>
    %324 = math.rsqrt %323 : vector<16x1xf32>
    %325 = vector.broadcast %324 : vector<16x1xf32> to vector<16x32xf32>
    %326 = arith.mulf %316, %325 : vector<16x32xf32>
    %327 = vector.broadcast %308 : vector<1x32xf32> to vector<16x32xf32>
    %328 = arith.mulf %326, %327 : vector<16x32xf32>
    %329 = vector.broadcast %310 : vector<1x32xf32> to vector<16x32xf32>
    %330 = arith.addf %328, %329 : vector<16x32xf32>
    %c1 = arith.constant 1 : index
    %c0_112 = arith.constant 0 : index
    %c0_113 = arith.constant 0 : index
    %331 = vector.load %arg5[%c1, %c0_112, %c0_113] : memref<2x32x96xbf16, #tpu.memory_space<vmem>>, vector<1x32x96xbf16>
    %332 = vector.shape_cast %331 : vector<1x32x96xbf16> to vector<32x96xbf16>
    %333 = arith.truncf %330 : vector<16x32xf32> to vector<16x32xbf16>
    %cst_114 = arith.constant dense<0.000000e+00> : vector<16x96xf32>
    %334 = tpu.matmul %333, %332, %cst_114 {dimension_numbers = #tpu.dot_dimension_numbers<[1], [0], [0], [1], [0, 0, 1, 1], [], []>} : vector<16x32xbf16>, vector<32x96xbf16>, vector<16x96xf32> -> vector<16x96xf32>
    %c1_115 = arith.constant 1 : index
    %c0_116 = arith.constant 0 : index
    %c0_117 = arith.constant 0 : index
    %335 = vector.load %arg6[%c1_115, %c0_116, %c0_117] : memref<2x1x96xf32, #tpu.memory_space<vmem>>, vector<1x1x96xf32>
    %336 = vector.shape_cast %335 : vector<1x1x96xf32> to vector<1x96xf32>
    %337 = vector.broadcast %336 : vector<1x96xf32> to vector<16x96xf32>
    %338 = arith.addf %334, %337 : vector<16x96xf32>
    %339 = vector.extract_strided_slice %338 {offsets = [0, 0], sizes = [8, 32], strides = [1, 1]} : vector<16x96xf32> to vector<8x32xf32>
    %340 = vector.extract_strided_slice %338 {offsets = [0, 32], sizes = [8, 32], strides = [1, 1]} : vector<16x96xf32> to vector<8x32xf32>
    %341 = vector.extract_strided_slice %338 {offsets = [0, 64], sizes = [8, 32], strides = [1, 1]} : vector<16x96xf32> to vector<8x32xf32>
    %342 = vector.extract_strided_slice %27 {offsets = [0, 0], sizes = [1, 8], strides = [1, 1]} : vector<2x8xf32> to vector<1x8xf32>
    %cst_118 = arith.constant 0.000000e+00 : f32
    %343 = vector.broadcast %cst_118 : f32 to vector<8x32xf32>
    %344 = vector.broadcast %35 : vector<1x32xf32> to vector<8x32xf32>
    %345 = arith.mulf %339, %344 : vector<8x32xf32>
    %cst_119 = arith.constant dense<0.000000e+00> : vector<8x8xf32>
    %346 = tpu.matmul %345, %340, %cst_119 {dimension_numbers = #tpu.dot_dimension_numbers<[1], [1], [0], [0], [0, 0, 1, 0], [], []>} : vector<8x32xf32>, vector<8x32xf32>, vector<8x8xf32> -> vector<8x8xf32>
    %cst_120 = arith.constant 0.353553385 : f32
    %347 = vector.broadcast %cst_120 : f32 to vector<8x8xf32>
    %348 = arith.mulf %346, %347 : vector<8x8xf32>
    %349 = vector.broadcast %342 : vector<1x8xf32> to vector<8x8xf32>
    %350 = arith.addf %348, %349 : vector<8x8xf32>
    %cst_121 = arith.constant dense<0xFF800000> : vector<8xf32>
    %351 = vector.multi_reduction <maximumf>, %350, %cst_121 [1] : vector<8x8xf32> to vector<8xf32>
    %352 = vector.shape_cast %351 : vector<8xf32> to vector<8x1xf32>
    %353 = vector.broadcast %352 : vector<8x1xf32> to vector<8x8xf32>
    %354 = arith.subf %350, %353 : vector<8x8xf32>
    %355 = math.exp %354 : vector<8x8xf32>
    %cst_122 = arith.constant dense<0.000000e+00> : vector<8xf32>
    %356 = vector.multi_reduction <add>, %355, %cst_122 [1] : vector<8x8xf32> to vector<8xf32>
    %357 = vector.shape_cast %356 : vector<8xf32> to vector<8x1xf32>
    %358 = tpu.reciprocal %357 {approx = true} : vector<8x1xf32> -> vector<8x1xf32>
    %359 = vector.broadcast %358 : vector<8x1xf32> to vector<8x8xf32>
    %360 = arith.mulf %355, %359 : vector<8x8xf32>
    %361 = vector.broadcast %35 : vector<1x32xf32> to vector<8x32xf32>
    %362 = arith.mulf %341, %361 : vector<8x32xf32>
    %cst_123 = arith.constant dense<0.000000e+00> : vector<8x32xf32>
    %363 = tpu.matmul %360, %362, %cst_123 {dimension_numbers = #tpu.dot_dimension_numbers<[1], [0], [0], [1], [0, 0, 1, 1], [], []>} : vector<8x8xf32>, vector<8x32xf32>, vector<8x32xf32> -> vector<8x32xf32>
    %364 = arith.addf %343, %363 : vector<8x32xf32>
    %365 = vector.broadcast %42 : vector<1x32xf32> to vector<8x32xf32>
    %366 = arith.mulf %339, %365 : vector<8x32xf32>
    %cst_124 = arith.constant dense<0.000000e+00> : vector<8x8xf32>
    %367 = tpu.matmul %366, %340, %cst_124 {dimension_numbers = #tpu.dot_dimension_numbers<[1], [1], [0], [0], [0, 0, 1, 0], [], []>} : vector<8x32xf32>, vector<8x32xf32>, vector<8x8xf32> -> vector<8x8xf32>
    %cst_125 = arith.constant 0.353553385 : f32
    %368 = vector.broadcast %cst_125 : f32 to vector<8x8xf32>
    %369 = arith.mulf %367, %368 : vector<8x8xf32>
    %370 = vector.broadcast %342 : vector<1x8xf32> to vector<8x8xf32>
    %371 = arith.addf %369, %370 : vector<8x8xf32>
    %cst_126 = arith.constant dense<0xFF800000> : vector<8xf32>
    %372 = vector.multi_reduction <maximumf>, %371, %cst_126 [1] : vector<8x8xf32> to vector<8xf32>
    %373 = vector.shape_cast %372 : vector<8xf32> to vector<8x1xf32>
    %374 = vector.broadcast %373 : vector<8x1xf32> to vector<8x8xf32>
    %375 = arith.subf %371, %374 : vector<8x8xf32>
    %376 = math.exp %375 : vector<8x8xf32>
    %cst_127 = arith.constant dense<0.000000e+00> : vector<8xf32>
    %377 = vector.multi_reduction <add>, %376, %cst_127 [1] : vector<8x8xf32> to vector<8xf32>
    %378 = vector.shape_cast %377 : vector<8xf32> to vector<8x1xf32>
    %379 = tpu.reciprocal %378 {approx = true} : vector<8x1xf32> -> vector<8x1xf32>
    %380 = vector.broadcast %379 : vector<8x1xf32> to vector<8x8xf32>
    %381 = arith.mulf %376, %380 : vector<8x8xf32>
    %382 = vector.broadcast %42 : vector<1x32xf32> to vector<8x32xf32>
    %383 = arith.mulf %341, %382 : vector<8x32xf32>
    %cst_128 = arith.constant dense<0.000000e+00> : vector<8x32xf32>
    %384 = tpu.matmul %381, %383, %cst_128 {dimension_numbers = #tpu.dot_dimension_numbers<[1], [0], [0], [1], [0, 0, 1, 1], [], []>} : vector<8x8xf32>, vector<8x32xf32>, vector<8x32xf32> -> vector<8x32xf32>
    %385 = arith.addf %364, %384 : vector<8x32xf32>
    %386 = vector.broadcast %49 : vector<1x32xf32> to vector<8x32xf32>
    %387 = arith.mulf %339, %386 : vector<8x32xf32>
    %cst_129 = arith.constant dense<0.000000e+00> : vector<8x8xf32>
    %388 = tpu.matmul %387, %340, %cst_129 {dimension_numbers = #tpu.dot_dimension_numbers<[1], [1], [0], [0], [0, 0, 1, 0], [], []>} : vector<8x32xf32>, vector<8x32xf32>, vector<8x8xf32> -> vector<8x8xf32>
    %cst_130 = arith.constant 0.353553385 : f32
    %389 = vector.broadcast %cst_130 : f32 to vector<8x8xf32>
    %390 = arith.mulf %388, %389 : vector<8x8xf32>
    %391 = vector.broadcast %342 : vector<1x8xf32> to vector<8x8xf32>
    %392 = arith.addf %390, %391 : vector<8x8xf32>
    %cst_131 = arith.constant dense<0xFF800000> : vector<8xf32>
    %393 = vector.multi_reduction <maximumf>, %392, %cst_131 [1] : vector<8x8xf32> to vector<8xf32>
    %394 = vector.shape_cast %393 : vector<8xf32> to vector<8x1xf32>
    %395 = vector.broadcast %394 : vector<8x1xf32> to vector<8x8xf32>
    %396 = arith.subf %392, %395 : vector<8x8xf32>
    %397 = math.exp %396 : vector<8x8xf32>
    %cst_132 = arith.constant dense<0.000000e+00> : vector<8xf32>
    %398 = vector.multi_reduction <add>, %397, %cst_132 [1] : vector<8x8xf32> to vector<8xf32>
    %399 = vector.shape_cast %398 : vector<8xf32> to vector<8x1xf32>
    %400 = tpu.reciprocal %399 {approx = true} : vector<8x1xf32> -> vector<8x1xf32>
    %401 = vector.broadcast %400 : vector<8x1xf32> to vector<8x8xf32>
    %402 = arith.mulf %397, %401 : vector<8x8xf32>
    %403 = vector.broadcast %49 : vector<1x32xf32> to vector<8x32xf32>
    %404 = arith.mulf %341, %403 : vector<8x32xf32>
    %cst_133 = arith.constant dense<0.000000e+00> : vector<8x32xf32>
    %405 = tpu.matmul %402, %404, %cst_133 {dimension_numbers = #tpu.dot_dimension_numbers<[1], [0], [0], [1], [0, 0, 1, 1], [], []>} : vector<8x8xf32>, vector<8x32xf32>, vector<8x32xf32> -> vector<8x32xf32>
    %406 = arith.addf %385, %405 : vector<8x32xf32>
    %407 = vector.broadcast %56 : vector<1x32xf32> to vector<8x32xf32>
    %408 = arith.mulf %339, %407 : vector<8x32xf32>
    %cst_134 = arith.constant dense<0.000000e+00> : vector<8x8xf32>
    %409 = tpu.matmul %408, %340, %cst_134 {dimension_numbers = #tpu.dot_dimension_numbers<[1], [1], [0], [0], [0, 0, 1, 0], [], []>} : vector<8x32xf32>, vector<8x32xf32>, vector<8x8xf32> -> vector<8x8xf32>
    %cst_135 = arith.constant 0.353553385 : f32
    %410 = vector.broadcast %cst_135 : f32 to vector<8x8xf32>
    %411 = arith.mulf %409, %410 : vector<8x8xf32>
    %412 = vector.broadcast %342 : vector<1x8xf32> to vector<8x8xf32>
    %413 = arith.addf %411, %412 : vector<8x8xf32>
    %cst_136 = arith.constant dense<0xFF800000> : vector<8xf32>
    %414 = vector.multi_reduction <maximumf>, %413, %cst_136 [1] : vector<8x8xf32> to vector<8xf32>
    %415 = vector.shape_cast %414 : vector<8xf32> to vector<8x1xf32>
    %416 = vector.broadcast %415 : vector<8x1xf32> to vector<8x8xf32>
    %417 = arith.subf %413, %416 : vector<8x8xf32>
    %418 = math.exp %417 : vector<8x8xf32>
    %cst_137 = arith.constant dense<0.000000e+00> : vector<8xf32>
    %419 = vector.multi_reduction <add>, %418, %cst_137 [1] : vector<8x8xf32> to vector<8xf32>
    %420 = vector.shape_cast %419 : vector<8xf32> to vector<8x1xf32>
    %421 = tpu.reciprocal %420 {approx = true} : vector<8x1xf32> -> vector<8x1xf32>
    %422 = vector.broadcast %421 : vector<8x1xf32> to vector<8x8xf32>
    %423 = arith.mulf %418, %422 : vector<8x8xf32>
    %424 = vector.broadcast %56 : vector<1x32xf32> to vector<8x32xf32>
    %425 = arith.mulf %341, %424 : vector<8x32xf32>
    %cst_138 = arith.constant dense<0.000000e+00> : vector<8x32xf32>
    %426 = tpu.matmul %423, %425, %cst_138 {dimension_numbers = #tpu.dot_dimension_numbers<[1], [0], [0], [1], [0, 0, 1, 1], [], []>} : vector<8x8xf32>, vector<8x32xf32>, vector<8x32xf32> -> vector<8x32xf32>
    %427 = arith.addf %406, %426 : vector<8x32xf32>
    %428 = vector.extract_strided_slice %338 {offsets = [8, 0], sizes = [8, 32], strides = [1, 1]} : vector<16x96xf32> to vector<8x32xf32>
    %429 = vector.extract_strided_slice %338 {offsets = [8, 32], sizes = [8, 32], strides = [1, 1]} : vector<16x96xf32> to vector<8x32xf32>
    %430 = vector.extract_strided_slice %338 {offsets = [8, 64], sizes = [8, 32], strides = [1, 1]} : vector<16x96xf32> to vector<8x32xf32>
    %431 = vector.extract_strided_slice %27 {offsets = [1, 0], sizes = [1, 8], strides = [1, 1]} : vector<2x8xf32> to vector<1x8xf32>
    %cst_139 = arith.constant 0.000000e+00 : f32
    %432 = vector.broadcast %cst_139 : f32 to vector<8x32xf32>
    %433 = vector.broadcast %35 : vector<1x32xf32> to vector<8x32xf32>
    %434 = arith.mulf %428, %433 : vector<8x32xf32>
    %cst_140 = arith.constant dense<0.000000e+00> : vector<8x8xf32>
    %435 = tpu.matmul %434, %429, %cst_140 {dimension_numbers = #tpu.dot_dimension_numbers<[1], [1], [0], [0], [0, 0, 1, 0], [], []>} : vector<8x32xf32>, vector<8x32xf32>, vector<8x8xf32> -> vector<8x8xf32>
    %cst_141 = arith.constant 0.353553385 : f32
    %436 = vector.broadcast %cst_141 : f32 to vector<8x8xf32>
    %437 = arith.mulf %435, %436 : vector<8x8xf32>
    %438 = vector.broadcast %431 : vector<1x8xf32> to vector<8x8xf32>
    %439 = arith.addf %437, %438 : vector<8x8xf32>
    %cst_142 = arith.constant dense<0xFF800000> : vector<8xf32>
    %440 = vector.multi_reduction <maximumf>, %439, %cst_142 [1] : vector<8x8xf32> to vector<8xf32>
    %441 = vector.shape_cast %440 : vector<8xf32> to vector<8x1xf32>
    %442 = vector.broadcast %441 : vector<8x1xf32> to vector<8x8xf32>
    %443 = arith.subf %439, %442 : vector<8x8xf32>
    %444 = math.exp %443 : vector<8x8xf32>
    %cst_143 = arith.constant dense<0.000000e+00> : vector<8xf32>
    %445 = vector.multi_reduction <add>, %444, %cst_143 [1] : vector<8x8xf32> to vector<8xf32>
    %446 = vector.shape_cast %445 : vector<8xf32> to vector<8x1xf32>
    %447 = tpu.reciprocal %446 {approx = true} : vector<8x1xf32> -> vector<8x1xf32>
    %448 = vector.broadcast %447 : vector<8x1xf32> to vector<8x8xf32>
    %449 = arith.mulf %444, %448 : vector<8x8xf32>
    %450 = vector.broadcast %35 : vector<1x32xf32> to vector<8x32xf32>
    %451 = arith.mulf %430, %450 : vector<8x32xf32>
    %cst_144 = arith.constant dense<0.000000e+00> : vector<8x32xf32>
    %452 = tpu.matmul %449, %451, %cst_144 {dimension_numbers = #tpu.dot_dimension_numbers<[1], [0], [0], [1], [0, 0, 1, 1], [], []>} : vector<8x8xf32>, vector<8x32xf32>, vector<8x32xf32> -> vector<8x32xf32>
    %453 = arith.addf %432, %452 : vector<8x32xf32>
    %454 = vector.broadcast %42 : vector<1x32xf32> to vector<8x32xf32>
    %455 = arith.mulf %428, %454 : vector<8x32xf32>
    %cst_145 = arith.constant dense<0.000000e+00> : vector<8x8xf32>
    %456 = tpu.matmul %455, %429, %cst_145 {dimension_numbers = #tpu.dot_dimension_numbers<[1], [1], [0], [0], [0, 0, 1, 0], [], []>} : vector<8x32xf32>, vector<8x32xf32>, vector<8x8xf32> -> vector<8x8xf32>
    %cst_146 = arith.constant 0.353553385 : f32
    %457 = vector.broadcast %cst_146 : f32 to vector<8x8xf32>
    %458 = arith.mulf %456, %457 : vector<8x8xf32>
    %459 = vector.broadcast %431 : vector<1x8xf32> to vector<8x8xf32>
    %460 = arith.addf %458, %459 : vector<8x8xf32>
    %cst_147 = arith.constant dense<0xFF800000> : vector<8xf32>
    %461 = vector.multi_reduction <maximumf>, %460, %cst_147 [1] : vector<8x8xf32> to vector<8xf32>
    %462 = vector.shape_cast %461 : vector<8xf32> to vector<8x1xf32>
    %463 = vector.broadcast %462 : vector<8x1xf32> to vector<8x8xf32>
    %464 = arith.subf %460, %463 : vector<8x8xf32>
    %465 = math.exp %464 : vector<8x8xf32>
    %cst_148 = arith.constant dense<0.000000e+00> : vector<8xf32>
    %466 = vector.multi_reduction <add>, %465, %cst_148 [1] : vector<8x8xf32> to vector<8xf32>
    %467 = vector.shape_cast %466 : vector<8xf32> to vector<8x1xf32>
    %468 = tpu.reciprocal %467 {approx = true} : vector<8x1xf32> -> vector<8x1xf32>
    %469 = vector.broadcast %468 : vector<8x1xf32> to vector<8x8xf32>
    %470 = arith.mulf %465, %469 : vector<8x8xf32>
    %471 = vector.broadcast %42 : vector<1x32xf32> to vector<8x32xf32>
    %472 = arith.mulf %430, %471 : vector<8x32xf32>
    %cst_149 = arith.constant dense<0.000000e+00> : vector<8x32xf32>
    %473 = tpu.matmul %470, %472, %cst_149 {dimension_numbers = #tpu.dot_dimension_numbers<[1], [0], [0], [1], [0, 0, 1, 1], [], []>} : vector<8x8xf32>, vector<8x32xf32>, vector<8x32xf32> -> vector<8x32xf32>
    %474 = arith.addf %453, %473 : vector<8x32xf32>
    %475 = vector.broadcast %49 : vector<1x32xf32> to vector<8x32xf32>
    %476 = arith.mulf %428, %475 : vector<8x32xf32>
    %cst_150 = arith.constant dense<0.000000e+00> : vector<8x8xf32>
    %477 = tpu.matmul %476, %429, %cst_150 {dimension_numbers = #tpu.dot_dimension_numbers<[1], [1], [0], [0], [0, 0, 1, 0], [], []>} : vector<8x32xf32>, vector<8x32xf32>, vector<8x8xf32> -> vector<8x8xf32>
    %cst_151 = arith.constant 0.353553385 : f32
    %478 = vector.broadcast %cst_151 : f32 to vector<8x8xf32>
    %479 = arith.mulf %477, %478 : vector<8x8xf32>
    %480 = vector.broadcast %431 : vector<1x8xf32> to vector<8x8xf32>
    %481 = arith.addf %479, %480 : vector<8x8xf32>
    %cst_152 = arith.constant dense<0xFF800000> : vector<8xf32>
    %482 = vector.multi_reduction <maximumf>, %481, %cst_152 [1] : vector<8x8xf32> to vector<8xf32>
    %483 = vector.shape_cast %482 : vector<8xf32> to vector<8x1xf32>
    %484 = vector.broadcast %483 : vector<8x1xf32> to vector<8x8xf32>
    %485 = arith.subf %481, %484 : vector<8x8xf32>
    %486 = math.exp %485 : vector<8x8xf32>
    %cst_153 = arith.constant dense<0.000000e+00> : vector<8xf32>
    %487 = vector.multi_reduction <add>, %486, %cst_153 [1] : vector<8x8xf32> to vector<8xf32>
    %488 = vector.shape_cast %487 : vector<8xf32> to vector<8x1xf32>
    %489 = tpu.reciprocal %488 {approx = true} : vector<8x1xf32> -> vector<8x1xf32>
    %490 = vector.broadcast %489 : vector<8x1xf32> to vector<8x8xf32>
    %491 = arith.mulf %486, %490 : vector<8x8xf32>
    %492 = vector.broadcast %49 : vector<1x32xf32> to vector<8x32xf32>
    %493 = arith.mulf %430, %492 : vector<8x32xf32>
    %cst_154 = arith.constant dense<0.000000e+00> : vector<8x32xf32>
    %494 = tpu.matmul %491, %493, %cst_154 {dimension_numbers = #tpu.dot_dimension_numbers<[1], [0], [0], [1], [0, 0, 1, 1], [], []>} : vector<8x8xf32>, vector<8x32xf32>, vector<8x32xf32> -> vector<8x32xf32>
    %495 = arith.addf %474, %494 : vector<8x32xf32>
    %496 = vector.broadcast %56 : vector<1x32xf32> to vector<8x32xf32>
    %497 = arith.mulf %428, %496 : vector<8x32xf32>
    %cst_155 = arith.constant dense<0.000000e+00> : vector<8x8xf32>
    %498 = tpu.matmul %497, %429, %cst_155 {dimension_numbers = #tpu.dot_dimension_numbers<[1], [1], [0], [0], [0, 0, 1, 0], [], []>} : vector<8x32xf32>, vector<8x32xf32>, vector<8x8xf32> -> vector<8x8xf32>
    %cst_156 = arith.constant 0.353553385 : f32
    %499 = vector.broadcast %cst_156 : f32 to vector<8x8xf32>
    %500 = arith.mulf %498, %499 : vector<8x8xf32>
    %501 = vector.broadcast %431 : vector<1x8xf32> to vector<8x8xf32>
    %502 = arith.addf %500, %501 : vector<8x8xf32>
    %cst_157 = arith.constant dense<0xFF800000> : vector<8xf32>
    %503 = vector.multi_reduction <maximumf>, %502, %cst_157 [1] : vector<8x8xf32> to vector<8xf32>
    %504 = vector.shape_cast %503 : vector<8xf32> to vector<8x1xf32>
    %505 = vector.broadcast %504 : vector<8x1xf32> to vector<8x8xf32>
    %506 = arith.subf %502, %505 : vector<8x8xf32>
    %507 = math.exp %506 : vector<8x8xf32>
    %cst_158 = arith.constant dense<0.000000e+00> : vector<8xf32>
    %508 = vector.multi_reduction <add>, %507, %cst_158 [1] : vector<8x8xf32> to vector<8xf32>
    %509 = vector.shape_cast %508 : vector<8xf32> to vector<8x1xf32>
    %510 = tpu.reciprocal %509 {approx = true} : vector<8x1xf32> -> vector<8x1xf32>
    %511 = vector.broadcast %510 : vector<8x1xf32> to vector<8x8xf32>
    %512 = arith.mulf %507, %511 : vector<8x8xf32>
    %513 = vector.broadcast %56 : vector<1x32xf32> to vector<8x32xf32>
    %514 = arith.mulf %430, %513 : vector<8x32xf32>
    %cst_159 = arith.constant dense<0.000000e+00> : vector<8x32xf32>
    %515 = tpu.matmul %512, %514, %cst_159 {dimension_numbers = #tpu.dot_dimension_numbers<[1], [0], [0], [1], [0, 0, 1, 1], [], []>} : vector<8x8xf32>, vector<8x32xf32>, vector<8x32xf32> -> vector<8x32xf32>
    %516 = arith.addf %495, %515 : vector<8x32xf32>
    %517 = tpu.concatenate %427, %516 in 0 : vector<8x32xf32>, vector<8x32xf32> -> vector<16x32xf32>
    %c1_160 = arith.constant 1 : index
    %c0_161 = arith.constant 0 : index
    %c0_162 = arith.constant 0 : index
    %518 = vector.load %arg7[%c1_160, %c0_161, %c0_162] : memref<2x32x32xbf16, #tpu.memory_space<vmem>>, vector<1x32x32xbf16>
    %519 = vector.shape_cast %518 : vector<1x32x32xbf16> to vector<32x32xbf16>
    %520 = arith.truncf %517 : vector<16x32xf32> to vector<16x32xbf16>
    %cst_163 = arith.constant dense<0.000000e+00> : vector<16x32xf32>
    %521 = tpu.matmul %520, %519, %cst_163 {dimension_numbers = #tpu.dot_dimension_numbers<[1], [0], [0], [1], [0, 0, 1, 1], [], []>} : vector<16x32xbf16>, vector<32x32xbf16>, vector<16x32xf32> -> vector<16x32xf32>
    %c1_164 = arith.constant 1 : index
    %c0_165 = arith.constant 0 : index
    %c0_166 = arith.constant 0 : index
    %522 = vector.load %arg8[%c1_164, %c0_165, %c0_166] : memref<2x1x32xf32, #tpu.memory_space<vmem>>, vector<1x1x32xf32>
    %523 = vector.shape_cast %522 : vector<1x1x32xf32> to vector<1x32xf32>
    %524 = vector.broadcast %523 : vector<1x32xf32> to vector<16x32xf32>
    %525 = arith.addf %521, %524 : vector<16x32xf32>
    %526 = arith.addf %525, %330 : vector<16x32xf32>
    %c1_167 = arith.constant 1 : index
    %c0_168 = arith.constant 0 : index
    %c0_169 = arith.constant 0 : index
    %527 = vector.load %arg9[%c1_167, %c0_168, %c0_169] : memref<2x1x32xf32, #tpu.memory_space<vmem>>, vector<1x1x32xf32>
    %528 = vector.shape_cast %527 : vector<1x1x32xf32> to vector<1x32xf32>
    %c1_170 = arith.constant 1 : index
    %c0_171 = arith.constant 0 : index
    %c0_172 = arith.constant 0 : index
    %529 = vector.load %arg10[%c1_170, %c0_171, %c0_172] : memref<2x1x32xf32, #tpu.memory_space<vmem>>, vector<1x1x32xf32>
    %530 = vector.shape_cast %529 : vector<1x1x32xf32> to vector<1x32xf32>
    %cst_173 = arith.constant dense<0.000000e+00> : vector<16xf32>
    %531 = vector.multi_reduction <add>, %526, %cst_173 [1] : vector<16x32xf32> to vector<16xf32>
    %532 = vector.shape_cast %531 : vector<16xf32> to vector<16x1xf32>
    %cst_174 = arith.constant 3.200000e+01 : f32
    %533 = vector.broadcast %cst_174 : f32 to vector<16x1xf32>
    %534 = arith.divf %532, %533 : vector<16x1xf32>
    %535 = vector.broadcast %534 : vector<16x1xf32> to vector<16x32xf32>
    %536 = arith.subf %526, %535 : vector<16x32xf32>
    %537 = arith.mulf %536, %536 : vector<16x32xf32>
    %cst_175 = arith.constant dense<0.000000e+00> : vector<16xf32>
    %538 = vector.multi_reduction <add>, %537, %cst_175 [1] : vector<16x32xf32> to vector<16xf32>
    %539 = vector.shape_cast %538 : vector<16xf32> to vector<16x1xf32>
    %cst_176 = arith.constant 3.200000e+01 : f32
    %540 = vector.broadcast %cst_176 : f32 to vector<16x1xf32>
    %541 = arith.divf %539, %540 : vector<16x1xf32>
    %cst_177 = arith.constant 9.99999996E-13 : f32
    %542 = vector.broadcast %cst_177 : f32 to vector<16x1xf32>
    %543 = arith.addf %541, %542 : vector<16x1xf32>
    %544 = math.rsqrt %543 : vector<16x1xf32>
    %545 = vector.broadcast %544 : vector<16x1xf32> to vector<16x32xf32>
    %546 = arith.mulf %536, %545 : vector<16x32xf32>
    %547 = vector.broadcast %528 : vector<1x32xf32> to vector<16x32xf32>
    %548 = arith.mulf %546, %547 : vector<16x32xf32>
    %549 = vector.broadcast %530 : vector<1x32xf32> to vector<16x32xf32>
    %550 = arith.addf %548, %549 : vector<16x32xf32>
    %c1_178 = arith.constant 1 : index
    %c0_179 = arith.constant 0 : index
    %c0_180 = arith.constant 0 : index
    %551 = vector.load %arg11[%c1_178, %c0_179, %c0_180] : memref<2x32x64xbf16, #tpu.memory_space<vmem>>, vector<1x32x64xbf16>
    %552 = vector.shape_cast %551 : vector<1x32x64xbf16> to vector<32x64xbf16>
    %553 = arith.truncf %550 : vector<16x32xf32> to vector<16x32xbf16>
    %cst_181 = arith.constant dense<0.000000e+00> : vector<16x64xf32>
    %554 = tpu.matmul %553, %552, %cst_181 {dimension_numbers = #tpu.dot_dimension_numbers<[1], [0], [0], [1], [0, 0, 1, 1], [], []>} : vector<16x32xbf16>, vector<32x64xbf16>, vector<16x64xf32> -> vector<16x64xf32>
    %c1_182 = arith.constant 1 : index
    %c0_183 = arith.constant 0 : index
    %c0_184 = arith.constant 0 : index
    %555 = vector.load %arg12[%c1_182, %c0_183, %c0_184] : memref<2x1x64xf32, #tpu.memory_space<vmem>>, vector<1x1x64xf32>
    %556 = vector.shape_cast %555 : vector<1x1x64xf32> to vector<1x64xf32>
    %557 = vector.broadcast %556 : vector<1x64xf32> to vector<16x64xf32>
    %558 = arith.addf %554, %557 : vector<16x64xf32>
    %cst_185 = arith.constant 5.000000e-01 : f32
    %559 = vector.broadcast %cst_185 : f32 to vector<16x64xf32>
    %560 = arith.mulf %559, %558 : vector<16x64xf32>
    %cst_186 = arith.constant 4.471500e-02 : f32
    %561 = vector.broadcast %cst_186 : f32 to vector<16x64xf32>
    %562 = arith.mulf %561, %558 : vector<16x64xf32>
    %563 = arith.mulf %562, %558 : vector<16x64xf32>
    %564 = arith.mulf %563, %558 : vector<16x64xf32>
    %565 = arith.addf %558, %564 : vector<16x64xf32>
    %cst_187 = arith.constant 0.797884583 : f32
    %566 = vector.broadcast %cst_187 : f32 to vector<16x64xf32>
    %567 = arith.mulf %566, %565 : vector<16x64xf32>
    %568 = math.tanh %567 : vector<16x64xf32>
    %cst_188 = arith.constant 1.000000e+00 : f32
    %569 = vector.broadcast %cst_188 : f32 to vector<16x64xf32>
    %570 = arith.addf %569, %568 : vector<16x64xf32>
    %571 = arith.mulf %560, %570 : vector<16x64xf32>
    %c1_189 = arith.constant 1 : index
    %c0_190 = arith.constant 0 : index
    %c0_191 = arith.constant 0 : index
    %572 = vector.load %arg13[%c1_189, %c0_190, %c0_191] : memref<2x64x32xbf16, #tpu.memory_space<vmem>>, vector<1x64x32xbf16>
    %573 = vector.shape_cast %572 : vector<1x64x32xbf16> to vector<64x32xbf16>
    %574 = arith.truncf %571 : vector<16x64xf32> to vector<16x64xbf16>
    %cst_192 = arith.constant dense<0.000000e+00> : vector<16x32xf32>
    %575 = tpu.matmul %574, %573, %cst_192 {dimension_numbers = #tpu.dot_dimension_numbers<[1], [0], [0], [1], [0, 0, 1, 1], [], []>} : vector<16x64xbf16>, vector<64x32xbf16>, vector<16x32xf32> -> vector<16x32xf32>
    %c1_193 = arith.constant 1 : index
    %c0_194 = arith.constant 0 : index
    %c0_195 = arith.constant 0 : index
    %576 = vector.load %arg14[%c1_193, %c0_194, %c0_195] : memref<2x1x32xf32, #tpu.memory_space<vmem>>, vector<1x1x32xf32>
    %577 = vector.shape_cast %576 : vector<1x1x32xf32> to vector<1x32xf32>
    %578 = vector.broadcast %577 : vector<1x32xf32> to vector<16x32xf32>
    %579 = arith.addf %575, %578 : vector<16x32xf32>
    %580 = arith.addf %579, %550 : vector<16x32xf32>
    %c1_196 = arith.constant 1 : index
    %c0_197 = arith.constant 0 : index
    %c0_198 = arith.constant 0 : index
    %581 = vector.load %arg15[%c1_196, %c0_197, %c0_198] : memref<2x1x32xf32, #tpu.memory_space<vmem>>, vector<1x1x32xf32>
    %582 = vector.shape_cast %581 : vector<1x1x32xf32> to vector<1x32xf32>
    %c1_199 = arith.constant 1 : index
    %c0_200 = arith.constant 0 : index
    %c0_201 = arith.constant 0 : index
    %583 = vector.load %arg16[%c1_199, %c0_200, %c0_201] : memref<2x1x32xf32, #tpu.memory_space<vmem>>, vector<1x1x32xf32>
    %584 = vector.shape_cast %583 : vector<1x1x32xf32> to vector<1x32xf32>
    %cst_202 = arith.constant dense<0.000000e+00> : vector<16xf32>
    %585 = vector.multi_reduction <add>, %580, %cst_202 [1] : vector<16x32xf32> to vector<16xf32>
    %586 = vector.shape_cast %585 : vector<16xf32> to vector<16x1xf32>
    %cst_203 = arith.constant 3.200000e+01 : f32
    %587 = vector.broadcast %cst_203 : f32 to vector<16x1xf32>
    %588 = arith.divf %586, %587 : vector<16x1xf32>
    %589 = vector.broadcast %588 : vector<16x1xf32> to vector<16x32xf32>
    %590 = arith.subf %580, %589 : vector<16x32xf32>
    %591 = arith.mulf %590, %590 : vector<16x32xf32>
    %cst_204 = arith.constant dense<0.000000e+00> : vector<16xf32>
    %592 = vector.multi_reduction <add>, %591, %cst_204 [1] : vector<16x32xf32> to vector<16xf32>
    %593 = vector.shape_cast %592 : vector<16xf32> to vector<16x1xf32>
    %cst_205 = arith.constant 3.200000e+01 : f32
    %594 = vector.broadcast %cst_205 : f32 to vector<16x1xf32>
    %595 = arith.divf %593, %594 : vector<16x1xf32>
    %cst_206 = arith.constant 9.99999996E-13 : f32
    %596 = vector.broadcast %cst_206 : f32 to vector<16x1xf32>
    %597 = arith.addf %595, %596 : vector<16x1xf32>
    %598 = math.rsqrt %597 : vector<16x1xf32>
    %599 = vector.broadcast %598 : vector<16x1xf32> to vector<16x32xf32>
    %600 = arith.mulf %590, %599 : vector<16x32xf32>
    %601 = vector.broadcast %582 : vector<1x32xf32> to vector<16x32xf32>
    %602 = arith.mulf %600, %601 : vector<16x32xf32>
    %603 = vector.broadcast %584 : vector<1x32xf32> to vector<16x32xf32>
    %604 = arith.addf %602, %603 : vector<16x32xf32>
    %605 = tpu.iota {dimensions = array<i32: 0>} : vector<2x16xi32>
    %606 = tpu.iota {dimensions = array<i32: 1>} : vector<2x16xi32>
    %c8_i32_207 = arith.constant 8 : i32
    %607 = vector.broadcast %c8_i32_207 : i32 to vector<2x16xi32>
    %608 = arith.muli %605, %607 : vector<2x16xi32>
    %609 = arith.cmpi eq, %606, %608 : vector<2x16xi32>
    %610 = arith.extui %609 : vector<2x16xi1> to vector<2x16xi32>
    %611 = arith.sitofp %610 : vector<2x16xi32> to vector<2x16xf32>
    %cst_208 = arith.constant dense<0.000000e+00> : vector<2x32xf32>
    %612 = tpu.matmul %611, %604, %cst_208 {dimension_numbers = #tpu.dot_dimension_numbers<[1], [0], [0], [1], [0, 0, 1, 1], [], []>} : vector<2x16xf32>, vector<16x32xf32>, vector<2x32xf32> -> vector<2x32xf32>
    %c0_209 = arith.constant 0 : index
    %c0_210 = arith.constant 0 : index
    %613 = vector.load %arg17[%c0_209, %c0_210] : memref<32x32xbf16, #tpu.memory_space<vmem>>, vector<32x32xbf16>
    %614 = arith.truncf %612 : vector<2x32xf32> to vector<2x32xbf16>
    %cst_211 = arith.constant dense<0.000000e+00> : vector<2x32xf32>
    %615 = tpu.matmul %614, %613, %cst_211 {dimension_numbers = #tpu.dot_dimension_numbers<[1], [0], [0], [1], [0, 0, 1, 1], [], []>} : vector<2x32xbf16>, vector<32x32xbf16>, vector<2x32xf32> -> vector<2x32xf32>
    %c0_212 = arith.constant 0 : index
    %c0_213 = arith.constant 0 : index
    %616 = vector.load %arg18[%c0_212, %c0_213] : memref<1x32xf32, #tpu.memory_space<vmem>>, vector<1x32xf32>
    %617 = vector.broadcast %616 : vector<1x32xf32> to vector<2x32xf32>
    %618 = arith.addf %615, %617 : vector<2x32xf32>
    %619 = math.tanh %618 : vector<2x32xf32>
    %c0_214 = arith.constant 0 : index
    %c0_215 = arith.constant 0 : index
    %620 = vector.load %arg19[%c0_214, %c0_215] : memref<32x5xbf16, #tpu.memory_space<vmem>>, vector<32x5xbf16>
    %621 = arith.truncf %619 : vector<2x32xf32> to vector<2x32xbf16>
    %cst_216 = arith.constant dense<0.000000e+00> : vector<2x5xf32>
    %622 = tpu.matmul %621, %620, %cst_216 {dimension_numbers = #tpu.dot_dimension_numbers<[1], [0], [0], [1], [0, 0, 1, 1], [], []>} : vector<2x32xbf16>, vector<32x5xbf16>, vector<2x5xf32> -> vector<2x5xf32>
    %c0_217 = arith.constant 0 : index
    %c0_218 = arith.constant 0 : index
    %623 = vector.load %arg20[%c0_217, %c0_218] : memref<1x5xf32, #tpu.memory_space<vmem>>, vector<1x5xf32>
    %624 = vector.broadcast %623 : vector<1x5xf32> to vector<2x5xf32>
    %625 = arith.addf %622, %624 : vector<2x5xf32>
    %c0_219 = arith.constant 0 : index
    %c0_220 = arith.constant 0 : index
    %626 = vector.load %arg21[%c0_219, %c0_220] : memref<2x5xf32, #tpu.memory_space<vmem>>, vector<2x5xf32>
    tpu.vector_store %arg21[%c0_219, %c0_220], %625 {strides = array<i32>} : memref<2x5xf32, #tpu.memory_space<vmem>>, vector<2x5xf32>,
    return
  }
  func.func @transform_0(%arg0: i32) -> (i32, i32) {
    %c0_i32 = arith.constant 0 : i32
    %c0_i32_0 = arith.constant 0 : i32
    %c0_i32_1 = arith.constant 0 : i32
    return %c0_i32, %c0_i32_0 : i32, i32
  }
  func.func @transform_1(%arg0: i32) -> (i32, i32) {
    %c0_i32 = arith.constant 0 : i32
    %c0_i32_0 = arith.constant 0 : i32
    %c0_i32_1 = arith.constant 0 : i32
    return %c0_i32, %c0_i32_0 : i32, i32
  }
  func.func @transform_2(%arg0: i32) -> (i32, i32) {
    %c0_i32 = arith.constant 0 : i32
    %c0_i32_0 = arith.constant 0 : i32
    %c0_i32_1 = arith.constant 0 : i32
    return %c0_i32, %c0_i32_0 : i32, i32
  }
  func.func @transform_3(%arg0: i32) -> (i32, i32) {
    %c0_i32 = arith.constant 0 : i32
    %c0_i32_0 = arith.constant 0 : i32
    %c0_i32_1 = arith.constant 0 : i32
    return %c0_i32, %c0_i32_0 : i32, i32
  }
  func.func @transform_4(%arg0: i32) -> (i32, i32, i32) {
    %c0_i32 = arith.constant 0 : i32
    %c0_i32_0 = arith.constant 0 : i32
    %c0_i32_1 = arith.constant 0 : i32
    %c0_i32_2 = arith.constant 0 : i32
    return %c0_i32, %c0_i32_0, %c0_i32_1 : i32, i32, i32
  }
  func.func @transform_5(%arg0: i32) -> (i32, i32, i32) {
    %c0_i32 = arith.constant 0 : i32
    %c0_i32_0 = arith.constant 0 : i32
    %c0_i32_1 = arith.constant 0 : i32
    %c0_i32_2 = arith.constant 0 : i32
    return %c0_i32, %c0_i32_0, %c0_i32_1 : i32, i32, i32
  }
  func.func @transform_6(%arg0: i32) -> (i32, i32, i32) {
    %c0_i32 = arith.constant 0 : i32
    %c0_i32_0 = arith.constant 0 : i32
    %c0_i32_1 = arith.constant 0 : i32
    %c0_i32_2 = arith.constant 0 : i32
    return %c0_i32, %c0_i32_0, %c0_i32_1 : i32, i32, i32
  }
  func.func @transform_7(%arg0: i32) -> (i32, i32, i32) {
    %c0_i32 = arith.constant 0 : i32
    %c0_i32_0 = arith.constant 0 : i32
    %c0_i32_1 = arith.constant 0 : i32
    %c0_i32_2 = arith.constant 0 : i32
    return %c0_i32, %c0_i32_0, %c0_i32_1 : i32, i32, i32
  }
  func.func @transform_8(%arg0: i32) -> (i32, i32, i32) {
    %c0_i32 = arith.constant 0 : i32
    %c0_i32_0 = arith.constant 0 : i32
    %c0_i32_1 = arith.constant 0 : i32
    %c0_i32_2 = arith.constant 0 : i32
    return %c0_i32, %c0_i32_0, %c0_i32_1 : i32, i32, i32
  }
  func.func @transform_9(%arg0: i32) -> (i32, i32, i32) {
    %c0_i32 = arith.constant 0 : i32
    %c0_i32_0 = arith.constant 0 : i32
    %c0_i32_1 = arith.constant 0 : i32
    %c0_i32_2 = arith.constant 0 : i32
    return %c0_i32, %c0_i32_0, %c0_i32_1 : i32, i32, i32
  }
  func.func @transform_10(%arg0: i32) -> (i32, i32, i32) {
    %c0_i32 = arith.constant 0 : i32
    %c0_i32_0 = arith.constant 0 : i32
    %c0_i32_1 = arith.constant 0 : i32
    %c0_i32_2 = arith.constant 0 : i32
    return %c0_i32, %c0_i32_0, %c0_i32_1 : i32, i32, i32
  }
  func.func @transform_11(%arg0: i32) -> (i32, i32, i32) {
    %c0_i32 = arith.constant 0 : i32
    %c0_i32_0 = arith.constant 0 : i32
    %c0_i32_1 = arith.constant 0 : i32
    %c0_i32_2 = arith.constant 0 : i32
    return %c0_i32, %c0_i32_0, %c0_i32_1 : i32, i32, i32
  }
  func.func @transform_12(%arg0: i32) -> (i32, i32, i32) {
    %c0_i32 = arith.constant 0 : i32
    %c0_i32_0 = arith.constant 0 : i32
    %c0_i32_1 = arith.constant 0 : i32
    %c0_i32_2 = arith.constant 0 : i32
    return %c0_i32, %c0_i32_0, %c0_i32_1 : i32, i32, i32
  }
  func.func @transform_13(%arg0: i32) -> (i32, i32, i32) {
    %c0_i32 = arith.constant 0 : i32
    %c0_i32_0 = arith.constant 0 : i32
    %c0_i32_1 = arith.constant 0 : i32
    %c0_i32_2 = arith.constant 0 : i32
    return %c0_i32, %c0_i32_0, %c0_i32_1 : i32, i32, i32
  }
  func.func @transform_14(%arg0: i32) -> (i32, i32, i32) {
    %c0_i32 = arith.constant 0 : i32
    %c0_i32_0 = arith.constant 0 : i32
    %c0_i32_1 = arith.constant 0 : i32
    %c0_i32_2 = arith.constant 0 : i32
    return %c0_i32, %c0_i32_0, %c0_i32_1 : i32, i32, i32
  }
  func.func @transform_15(%arg0: i32) -> (i32, i32, i32) {
    %c0_i32 = arith.constant 0 : i32
    %c0_i32_0 = arith.constant 0 : i32
    %c0_i32_1 = arith.constant 0 : i32
    %c0_i32_2 = arith.constant 0 : i32
    return %c0_i32, %c0_i32_0, %c0_i32_1 : i32, i32, i32
  }
  func.func @transform_16(%arg0: i32) -> (i32, i32) {
    %c0_i32 = arith.constant 0 : i32
    %c0_i32_0 = arith.constant 0 : i32
    %c0_i32_1 = arith.constant 0 : i32
    return %c0_i32, %c0_i32_0 : i32, i32
  }
  func.func @transform_17(%arg0: i32) -> (i32, i32) {
    %c0_i32 = arith.constant 0 : i32
    %c0_i32_0 = arith.constant 0 : i32
    %c0_i32_1 = arith.constant 0 : i32
    return %c0_i32, %c0_i32_0 : i32, i32
  }
  func.func @transform_18(%arg0: i32) -> (i32, i32) {
    %c0_i32 = arith.constant 0 : i32
    %c0_i32_0 = arith.constant 0 : i32
    %c0_i32_1 = arith.constant 0 : i32
    return %c0_i32, %c0_i32_0 : i32, i32
  }
  func.func @transform_19(%arg0: i32) -> (i32, i32) {
    %c0_i32 = arith.constant 0 : i32
    %c0_i32_0 = arith.constant 0 : i32
    %c0_i32_1 = arith.constant 0 : i32
    return %c0_i32, %c0_i32_0 : i32, i32
  }
  func.func @transform_20(%arg0: i32) -> (i32, i32) {
    %c0_i32 = arith.constant 0 : i32
    %c0_i32_0 = arith.constant 0 : i32
    %c0_i32_1 = arith.constant 0 : i32
    return %c0_i32, %c0_i32_0 : i32, i32
  }
}

</mosaic_0001>

<bundles_post_ra>
// kernel: bert_multilabel_forward.1
= control target key start
LH: loop header
LB: loop body
LE: loop exit
PB: predicated region body
PF: predicated region fallthrough
CT: control target
= control target key end

     0   :  { %s5234_s0 = inlined_call_operand.vmem [shape: f32[16,32], index: 0, kind: input, shape index: {}]   ;;  %s5235_s1 = inlined_call_operand.vmem [shape: f32[2,8], index: 1, kind: input, shape index: {}]   ;;  %s5236_s2 = inlined_call_operand.vmem [shape: f32[1,32], index: 2, kind: input, shape index: {}]   ;;  %s5237_s3 = inlined_call_operand.vmem [shape: f32[1,32], index: 3, kind: input, shape index: {}]   ;;  %s5238_s4 = inlined_call_operand.vmem [shape: bf16[2,32,96], index: 4, kind: input, shape index: {}]   ;;  %s5239_s5 = inlined_call_operand.vmem [shape: f32[2,1,96], index: 5, kind: input, shape index: {}]   ;;  %s5240_s6 = inlined_call_operand.vmem [shape: bf16[2,32,32], index: 6, kind: input, shape index: {}]   ;;  %s5241_s7 = inlined_call_operand.vmem [shape: f32[2,1,32], index: 7, kind: input, shape index: {}]   ;;  %s5242_s8 = inlined_call_operand.vmem [shape: f32[2,1,32], index: 8, kind: input, shape index: {}]   ;;  %s5243_s9 = inlined_call_operand.vmem [shape: f32[2,1,32], index: 9, kind: input, shape index: {}]   ;;  %s5244_s10 = inlined_call_operand.vmem [shape: bf16[2,32,64], index: 10, kind: input, shape index: {}]   ;;  %s5245_s11 = inlined_call_operand.vmem [shape: f32[2,1,64], index: 11, kind: input, shape index: {}]   ;;  %s5246_s12 = inlined_call_operand.vmem [shape: bf16[2,64,32], index: 12, kind: input, shape index: {}]   ;;  %s5247_s13 = inlined_call_operand.vmem [shape: f32[2,1,32], index: 13, kind: input, shape index: {}]   ;;  %s5248_s14 = inlined_call_operand.vmem [shape: f32[2,1,32], index: 14, kind: input, shape index: {}]   ;;  %s5249_s15 = inlined_call_operand.vmem [shape: f32[2,1,32], index: 15, kind: input, shape index: {}]   ;;  %s5250_s16 = inlined_call_operand.vmem [shape: bf16[32,32], index: 16, kind: input, shape index: {}]   ;;  %s5251_s17 = inlined_call_operand.vmem [shape: f32[1,32], index: 17, kind: input, shape index: {}]   ;;  %s5252_s18 = inlined_call_operand.vmem [shape: bf16[32,5], index: 18, kind: input, shape index: {}]   ;;  %s5253_s19 = inlined_call_operand.vmem [shape: f32[1,5], index: 19, kind: input, shape index: {}]   ;;  %s5254_s20 = inlined_call_operand.hbm [shape: f32[2,5], index: 20, kind: output, shape index: {}]  }
   0x1   :  { %5257 = sst [smem:[#allocation5_spill]] %s5234_s0 }
   0x2   :  { %5258 = sst [smem:[#allocation6_spill]] %s5235_s1 }
   0x3   :  { %5259 = sst [smem:[#allocation7_spill]] %s5236_s2 }
   0x4   :  { %5260 = sst [smem:[#allocation8_spill]] %s5237_s3 }
   0x5   :  { %5261 = sst [smem:[#allocation9_spill]] %s5238_s4 }
   0x6   :  { %s5262_s23 = sld [smem:[#allocation5_spill]]  ;;  %vm71_vm0 = vcmask 261120  }
   0xc   :  { %v67_v0 = vld [vmem:[%s5262_s23] sm:$0xff]  ;;  %v68_v1 = vld [vmem:[%s5262_s23 + $0x8] sm:$0xff] }
   0xd   :  { %v72_v2 = vsel %vm71_vm0, %v67_v0, 0.0  ;;  %v75_v3 = vsel %vm71_vm0, %v68_v1, 0.0 }
   0xe   :  { %73 = vadd.xlane.f32.xlu0 %v72_v2 }
  0x12   :  { %76 = vadd.xlane.f32.xlu0 %v75_v3 }
  0x13   :  { %25 = vsyncpa [#allocation3], 0  ;;  %s5263_s26 = sld [smem:[#allocation9_spill]]  ;;  %v4510_v15 = vmov 0.0   ;;  %vm4511_vm1 = vmmov 0   ;;  %s4512_s24 = smov 96   ;;  %v118_v41 = vlaneseq }
  0x14   :  { %4110 = vmatprep.subr.bf16.mxu0 %v4510_v15  ;;  %4114 = vmatprep.mubr.msk.bf16.mxu0 %vm4511_vm1, %v4510_v15  ;;  %s5264_s30 = sld [smem:[#allocation7_spill]]  ;;  %v3879_v34 = vld [vmem:[%s5239_s5] ss:$0 sm:$0xff]  ;;  %vm293_vm6 = vcmask 64512   ;;  %s4513_s27 = smov 64   ;;  %vm1807_vm13 = vcmask 523264  }
  0x15   :  { %4118 = vmatprep.subr.mxu1 %v4510_v15  ;;  %4120 = vmatprep.mubr.msk.f32.mxu1 %vm4511_vm1, %v4510_v15  ;;  %s5265_s1 = sld [smem:[#allocation8_spill]]  ;;  %v4668_v42 = vand.u32 127, %v118_v41  ;;  %v4700_v50 = vshrl.u32 %v118_v41, 7  ;;  %vm3648_vm15 = vcmask 130048  }
  0x16   :  { %s5266_s3 = sld [smem:[#allocation6_spill]] }
  0x17   :  { %vm121_vm2 = vcmp.lt.s32.totalorder %v4668_v42, 8  ;;  %vm125_vm3 = vcmp.ge.s32.totalorder %v4668_v42, 8  ;;  %vm126_vm4 = vcmp.lt.s32.totalorder %v4668_v42, 16  ;;  %v290_v53 = vsub.s32 0, %v4700_v50 }
  0x18   :  { %v4674_v43 = vsel %vm121_vm2, 1.0, %v4510_v15  ;;  %vm127_vm5 = vmand %vm125_vm3, %vm126_vm4  ;;  %vm130_vm7 = vcmp.ge.s32.totalorder %v4668_v42, 16  ;;  %vm131_vm8 = vcmp.lt.s32.totalorder %v4668_v42, 24  ;;  %vm135_vm10 = vcmp.ge.s32.totalorder %v4668_v42, 24 }
  0x19   :  { %v4370_v14 = vld [vmem:[%s5263_s26 + $0x8] sm:$0xff]   ;;  %v4371_v16 = vld [vmem:[%s5263_s26] sm:$0xff]   ;;  %v4684_v46 = vsel %vm127_vm5, 1.0, %v4510_v15  ;;  %vm132_vm9 = vmand %vm130_vm7, %vm131_vm8  ;;  %vm136_vm11 = vcmp.lt.s32.totalorder %v4668_v42, 32 }
  0x1a   :  { %4111 = vmatpush3.bf16.msra.mxu0 %v4370_v14  ;;  %v3873_v25 = vld [vmem:[%s5264_s30] ss:$0 sm:$0xff]  ;;  %vm137_vm12 = vmand %vm135_vm10, %vm136_vm11 }
  0x1b   :  { %4112 = vmatprep.subr.bf16.mxu0 %v4510_v15  ;;  %v3874_v29 = vld [vmem:[%s5265_s1] ss:$0 sm:$0xff] }
  0x1c   :  { %v115_v48 = vld [vmem:[%s5266_s3] sm:$0x3] }
  0x1d   :  { %v116_v49 = vsub.f32 1.0, %v115_v48 }
  0x1e   :  { %4113 = vmatpush3.bf16.msra.mxu0 %v4371_v16 }
  0x1f   :  { %4133 = vmatprep.subr.mxu0 %v4510_v15  ;;  %v4702_v52 = vmul.f32 -10000.0, %v116_v49 }
  0x21   :  { %v4706_v57 = vrot.slane %v4702_v52, %v290_v53 }
  0x97   :  { %v74_v4 = vpop.xlane.xlu0 %73 }
  0x98   :  { %v79_v5 = vmul.f32 0.03125, %v74_v4 }
  0x9a   :  { %v81_v6 = vsub.f32 %v67_v0, %v79_v5 }
  0x9b   :  { %v77_v7 = vpop.xlane.xlu0 %76 }
  0x9c   :  { %v80_v8 = vmul.f32 0.03125, %v77_v7  ;;  %v83_v9 = vmul.f32 %v81_v6, %v81_v6 }
  0x9e   :  { %v82_v10 = vsub.f32 %v68_v1, %v80_v8  ;;  %v85_v11 = vsel %vm71_vm0, %v83_v9, 0.0 }
  0x9f   :  { %86 = vadd.xlane.f32.xlu1 %v85_v11  ;;  %v4726_v11 = vsel %vm132_vm9, 1.0, %v4510_v15 }
  0xa0   :  { %v84_v12 = vmul.f32 %v82_v10, %v82_v10 }
  0xa2   :  { %v88_v13 = vsel %vm71_vm0, %v84_v12, 0.0 }
  0xa3   :  { %89 = vadd.xlane.f32.xlu1 %v88_v13  ;;  %v4737_v13 = vsel %vm137_vm12, 1.0, %v4510_v15 }
 0x128   :  { %v87_v17 = vpop.xlane.xlu1 %86 }
 0x129   :  { %v91_v18 = vmul.f32 0.03125, %v87_v17 }
 0x12b   :  { %v93_v19 = vadd.f32 1e-12, %v91_v18 }
 0x12c   :  { %v90_v20 = vpop.xlane.xlu1 %89 }
 0x12d   :  { %4394 = vrsqrt.f32 %v93_v19  ;;  %v92_v21 = vmul.f32 0.03125, %v90_v20 }
 0x12f   :  { %v94_v22 = vadd.f32 1e-12, %v92_v21 }
 0x131   :  { %4396 = vrsqrt.f32 %v94_v22 }
 0x13a   :  { %v4395_v23 = vpop.eup %4394 }
 0x13b   :  { %v97_v24 = vmul.f32 %v4395_v23, %v81_v6 }
 0x13d   :  { %v105_v28 = vmul.f32 %v3873_v25, %v97_v24 }
 0x13e   :  { %v4397_v26 = vpop.eup %4396 }
 0x13f   :  { %v98_v27 = vmul.f32 %v4397_v26, %v82_v10  ;;  %v4650_v31 = vadd.f32 %v3874_v29, %v105_v28 }
 0x141   :  { %v106_v30 = vmul.f32 %v3873_v25, %v98_v27 }
 0x143   :  { %v4652_v32 = vadd.f32 %v3874_v29, %v106_v30 }
 0x145   :  { %v144_v33 = vpack.c.bf16 %v4652_v32, %v4650_v31 }
 0x147   :  { %4115 = vmatmul.mubr.msk.bf16.vlgmr.msra.gmra.mxu0 %vm71_vm0, %v144_v33 }
 0x148   :  { %4135 = vmatprep.mubr.msk.f32.mxu0 %vm4511_vm1, %v4510_v15 }
 0x207   :  { %v201_v35 = vpop.f32.mrf.mxu0 }
 0x208   :  { %v4662_v36 = vadd.f32 %v3879_v34, %v201_v35 }
 0x209   :  { %v4116_v37 = vpop.f32.mrf.mxu0 }
 0x20a   :  { %210 = vrot.lane.b32.xlu0 %v4662_v36, %s4512_s24  ;;  %v208_v45 = vmul.f32 %v4674_v43, %v4662_v36  ;;  %v310_v47 = vmul.f32 %v4684_v46, %v4662_v36  ;;  %v556_v12 = vmul.f32 %v4726_v11, %v4662_v36  ;;  %v726_v14 = vmul.f32 %v4737_v13, %v4662_v36 }
 0x20b   :  { %v204_v38 = vpop.f32.mrf.mxu0 }
 0x20c   :  { %v4666_v39 = vadd.f32 %v3879_v34, %v204_v38 }
 0x20d   :  { %v4117_v40 = vpop.f32.mrf.mxu0 }
 0x27c   :  { %v4676_v44 = vpop.permute.xlu0 %210 }
 0x27d   :  { %4119 = vmatpush3.xpose.msk.msra.mxu1 %vm71_vm0, %v4676_v44 }
 0x27e   :  { %4123 = vmatprep.subr.mxu1 %v4510_v15 }
 0x280   :  { %4121 = vmatmul.mubr.msk.f32.vlgmr.msra.gmra.mxu1 %vm71_vm0, %v208_v45 }
 0x281   :  { %4124 = vmatpush3.xpose.msk.msra.mxu1 %vm71_vm0, %v4676_v44  ;;  %4125 = vmatprep.mubr.msk.f32.mxu1 %vm4511_vm1, %v4510_v15 }
 0x282   :  { %4128 = vmatprep.subr.mxu1 %v4510_v15 }
 0x284   :  { %4126 = vmatmul.mubr.msk.f32.vlgmr.msra.gmra.mxu1 %vm71_vm0, %v310_v47 }
 0x285   :  { %4130 = vmatprep.mubr.msk.f32.mxu1 %vm4511_vm1, %v4510_v15 }
 0x340   :  { %v283_v51 = vpop.f32.mrf.mxu1 }
 0x341   :  { %v287_v4 = vmul.f32 0.35355338, %v283_v51 }
 0x342   :  { %v4122_v54 = vpop.f32.mrf.mxu1 }
 0x343   :  { %v292_v5 = vadd.f32 %v4706_v57, %v287_v4 }
 0x344   :  { %v380_v55 = vpop.f32.mrf.mxu1 }
 0x345   :  { %v384_v56 = vmul.f32 0.35355338, %v380_v55  ;;  %v294_v6 = vsel %vm293_vm6, %v292_v5, -inf }
 0x346   :  { %v4127_v58 = vpop.f32.mrf.mxu1 }
 0x347   :  { %v385_v59 = vadd.f32 %v384_v56, %v4706_v57 }
 0x349   :  { %v386_v60 = vsel %vm293_vm6, %v385_v59, -inf }
 0x34a   :  { %387 = vmax.xlane.f32.xlu1 %v386_v60 }
 0x35b   :  { %398 = vrot.lane.b32.xlu1 %v4684_v46, %s4513_s27 }
 0x3d3   :  { %v388_v61 = vpop.xlane.xlu1 %387 }
 0x3d4   :  { %v389_v62 = vsub.f32 %v385_v59, %v388_v61 }
 0x3d6   :  { %v390_v63 = vmul.f32 1.442695, %v389_v62 }
 0x3d7   :  { %v4712_v0 = vpop.permute.xlu1 %398 }
 0x3d8   :  { %4398 = vpow2.f32 %v390_v63  ;;  %v401_v1 = vmul.f32 %v4712_v0, %v4662_v36  ;;  %v896_v63 = vmul.f32 %v4674_v43, %v4666_v39 }
 0x3da   :  { %403 = vrot.lane.b32.xlu0 %v401_v1, %s4513_s27 }
 0x3e5   :  { %v4399_v2 = vpop.eup %4398 }
 0x3e6   :  { %v392_v3 = vsel %vm293_vm6, %v4399_v2, 0.0 }
 0x3e7   :  { %393 = vadd.xlane.f32.xlu1 %v392_v3 }
 0x3f9   :  { %295 = vmax.xlane.f32.xlu0 %v294_v6 }
 0x44c   :  { %v404_v7 = vpop.permute.xlu0 %403 }
 0x44d   :  { %4129 = vmatpush3.msra.mxu1 %v404_v7 }
 0x44e   :  { %4138 = vmatprep.subr.mxu1 %v4510_v15 }
 0x470   :  { %v394_v8 = vpop.xlane.xlu1 %393 }
 0x471   :  { %4400 = vrcp.f32 %v394_v8 }
 0x47e   :  { %v4401_v9 = vpop.eup %4400 }
 0x47f   :  { %v396_v10 = vmul.f32 %v4401_v9, %v4399_v2  ;;  %v993_v9 = vmul.f32 %v4684_v46, %v4666_v39 }
 0x481   :  { %4131 = vmatmul.mubr.msk.f32.vlgmr.msra.gmra.mxu1 %vm293_vm6, %v396_v10 }
 0x482   :  { %4139 = vmatpush3.xpose.msk.msra.mxu1 %vm71_vm0, %v4676_v44  ;;  %4140 = vmatprep.mubr.msk.f32.mxu1 %vm4511_vm1, %v4510_v15  ;;  %v296_v28 = vpop.xlane.xlu0 %295 }
 0x483   :  { %4148 = vmatprep.subr.mxu1 %v4510_v15  ;;  %v297_v29 = vsub.f32 %v292_v5, %v296_v28 }
 0x485   :  { %4141 = vmatmul.mubr.msk.f32.vlgmr.msra.gmra.mxu1 %vm71_vm0, %v556_v12  ;;  %v298_v30 = vmul.f32 1.442695, %v297_v29 }
 0x486   :  { %4149 = vmatpush3.xpose.msk.msra.mxu1 %vm71_vm0, %v4676_v44  ;;  %4150 = vmatprep.mubr.msk.f32.mxu1 %vm4511_vm1, %v4510_v15 }
 0x487   :  { %4158 = vmatprep.subr.mxu1 %v4510_v15  ;;  %4402 = vpow2.f32 %v298_v30 }
 0x489   :  { %4151 = vmatmul.mubr.msk.f32.vlgmr.msra.gmra.mxu1 %vm71_vm0, %v726_v14 }
 0x48a   :  { %4160 = vmatprep.mubr.msk.f32.mxu1 %vm4511_vm1, %v4510_v15 }
 0x494   :  { %v4403_v33 = vpop.eup %4402 }
 0x495   :  { %v300_v34 = vsel %vm293_vm6, %v4403_v33, 0.0 }
 0x541   :  { %v4750_v16 = vpop.f32.mrf.mxu1 }
 0x543   :  { %v4132_v17 = vpop.f32.mrf.mxu1 }
 0x545   :  { %v626_v18 = vpop.f32.mrf.mxu1 }
 0x546   :  { %v630_v19 = vmul.f32 0.35355338, %v626_v18 }
 0x547   :  { %v4142_v20 = vpop.f32.mrf.mxu1 }
 0x548   :  { %v631_v21 = vadd.f32 %v630_v19, %v4706_v57 }
 0x549   :  { %v796_v22 = vpop.f32.mrf.mxu1 }
 0x54a   :  { %v800_v23 = vmul.f32 0.35355338, %v796_v22  ;;  %v632_v24 = vsel %vm293_vm6, %v631_v21, -inf }
 0x54b   :  { %633 = vmax.xlane.f32.xlu0 %v632_v24  ;;  %v4152_v25 = vpop.f32.mrf.mxu1  ;;  %v978_v24 = vsub.s32 1, %v4700_v50 }
 0x54c   :  { %v801_v26 = vadd.f32 %v800_v23, %v4706_v57 }
 0x54d   :  { %v4817_v28 = vrot.slane %v4702_v52, %v978_v24 }
 0x54e   :  { %v802_v27 = vsel %vm293_vm6, %v801_v26, -inf }
 0x54f   :  { %803 = vmax.xlane.f32.xlu1 %v802_v27 }
 0x560   :  { %644 = vrot.lane.b32.xlu1 %v4726_v11, %s4513_s27 }
 0x561   :  { %306 = vrot.lane.b32.xlu0 %v4674_v43, %s4513_s27 }
 0x564   :  { %814 = vrot.lane.b32.xlu1 %v4737_v13, %s4513_s27 }
 0x588   :  { %301 = vadd.xlane.f32.xlu1 %v300_v34 }
 0x5d4   :  { %v634_v35 = vpop.xlane.xlu0 %633 }
 0x5d5   :  { %v635_v37 = vsub.f32 %v631_v21, %v634_v35 }
 0x5d7   :  { %v636_v38 = vmul.f32 1.442695, %v635_v37 }
 0x5d8   :  { %v804_v40 = vpop.xlane.xlu1 %803  ;;  %v4777_v56 = vpop.permute.xlu0 %306 }
 0x5d9   :  { %4404 = vpow2.f32 %v636_v38  ;;  %v805_v41 = vsub.f32 %v801_v26, %v804_v40  ;;  %v309_v58 = vmul.f32 %v4777_v56, %v4662_v36 }
 0x5db   :  { %v806_v44 = vmul.f32 1.442695, %v805_v41 }
 0x5dc   :  { %v4763_v45 = vpop.permute.xlu1 %644 }
 0x5dd   :  { %4406 = vpow2.f32 %v806_v44  ;;  %v647_v47 = vmul.f32 %v4763_v45, %v4662_v36 }
 0x5df   :  { %649 = vrot.lane.b32.xlu1 %v647_v47, %s4513_s27 }
 0x5e0   :  { %v4768_v48 = vpop.permute.xlu1 %814 }
 0x5e1   :  { %v817_v49 = vmul.f32 %v4768_v48, %v4662_v36 }
 0x5e3   :  { %819 = vrot.lane.b32.xlu1 %v817_v49, %s4513_s27 }
 0x5e6   :  { %v4405_v51 = vpop.eup %4404 }
 0x5e7   :  { %898 = vrot.lane.b32.xlu1 %v4666_v39, %s4512_s24  ;;  %v638_v53 = vsel %vm293_vm6, %v4405_v51, 0.0 }
 0x5e8   :  { %639 = vadd.xlane.f32.xlu0 %v638_v53 }
 0x5ea   :  { %v4407_v54 = vpop.eup %4406 }
 0x5eb   :  { %v808_v55 = vsel %vm293_vm6, %v4407_v54, 0.0 }
 0x5ec   :  { %809 = vadd.xlane.f32.xlu0 %v808_v55  ;;  %v1401_v55 = vmul.f32 %v4737_v13, %v4666_v39 }
 0x602   :  { %480 = vrot.lane.b32.xlu0 %v309_v58, %s4513_s27 }
 0x611   :  { %v302_v59 = vpop.xlane.xlu1 %301 }
 0x612   :  { %4408 = vrcp.f32 %v302_v59 }
 0x61f   :  { %v4409_v2 = vpop.eup %4408 }
 0x620   :  { %v304_v4 = vmul.f32 %v4409_v2, %v4403_v33 }
 0x651   :  { %v650_v60 = vpop.permute.xlu1 %649 }
 0x655   :  { %v820_v61 = vpop.permute.xlu1 %819 }
 0x659   :  { %v4782_v62 = vpop.permute.xlu1 %898 }
 0x65a   :  { %4159 = vmatpush3.xpose.msk.msra.mxu1 %vm71_vm0, %v4782_v62 }
 0x65b   :  { %4168 = vmatprep.subr.mxu1 %v4510_v15 }
 0x65d   :  { %4161 = vmatmul.mubr.msk.f32.vlgmr.msra.gmra.mxu1 %vm71_vm0, %v896_v63 }
 0x65e   :  { %4170 = vmatprep.mubr.msk.f32.mxu1 %vm4511_vm1, %v4510_v15 }
 0x671   :  { %v640_v36 = vpop.xlane.xlu0 %639 }
 0x672   :  { %4410 = vrcp.f32 %v640_v36 }
 0x675   :  { %v810_v1 = vpop.xlane.xlu0 %809 }
 0x676   :  { %4412 = vrcp.f32 %v810_v1 }
 0x679   :  { %v481_v3 = vpop.permute.xlu0 %480 }
 0x67a   :  { %4134 = vmatpush3.msra.mxu0 %v481_v3 }
 0x67b   :  { %4136 = vmatmul.mubr.msk.f32.vlgmr.msra.gmra.mxu0 %vm293_vm6, %v304_v4  ;;  %4143 = vmatprep.subr.mxu0 %v4510_v15 }
 0x67c   :  { %4144 = vmatpush3.msra.mxu0 %v650_v60  ;;  %4145 = vmatprep.mubr.msk.f32.mxu0 %vm4511_vm1, %v4510_v15 }
 0x67d   :  { %4153 = vmatprep.subr.mxu0 %v4510_v15 }
 0x67f   :  { %v4411_v5 = vpop.eup %4410 }
 0x680   :  { %v642_v6 = vmul.f32 %v4411_v5, %v4405_v51 }
 0x682   :  { %4146 = vmatmul.mubr.msk.f32.vlgmr.msra.gmra.mxu0 %vm293_vm6, %v642_v6 }
 0x683   :  { %v4413_v7 = vpop.eup %4412  ;;  %4154 = vmatpush3.msra.mxu0 %v820_v61  ;;  %4155 = vmatprep.mubr.msk.f32.mxu0 %vm4511_vm1, %v4510_v15 }
 0x684   :  { %4163 = vmatprep.subr.mxu0 %v4510_v15  ;;  %v812_v8 = vmul.f32 %v4413_v7, %v4407_v54  ;;  %v1235_v54 = vmul.f32 %v4726_v11, %v4666_v39 }
 0x686   :  { %4156 = vmatmul.mubr.msk.f32.vlgmr.msra.gmra.mxu0 %vm293_vm6, %v812_v8 }
 0x687   :  { %4164 = vmatpush3.xpose.msk.msra.mxu0 %vm71_vm0, %v4782_v62  ;;  %4165 = vmatprep.mubr.msk.f32.mxu0 %vm4511_vm1, %v4510_v15 }
 0x688   :  { %4173 = vmatprep.subr.mxu0 %v4510_v15 }
 0x68a   :  { %4166 = vmatmul.mubr.msk.f32.vlgmr.msra.gmra.mxu0 %vm71_vm0, %v993_v9 }
 0x68b   :  { %4175 = vmatprep.mubr.msk.f32.mxu0 %vm4511_vm1, %v4510_v15 }
 0x71d   :  { %v971_v10 = vpop.f32.mrf.mxu1 }
 0x71e   :  { %v975_v52 = vmul.f32 0.35355338, %v971_v10 }
 0x71f   :  { %v4162_v12 = vpop.f32.mrf.mxu1 }
 0x720   :  { %v980_v44 = vadd.f32 %v4817_v28, %v975_v52  ;;  %v992_v12 = vmul.f32 %v4777_v56, %v4666_v39 }
 0x722   :  { %v981_v47 = vsel %vm293_vm6, %v980_v44, -inf }
 0x73b   :  { %v552_v14 = vpop.f32.mrf.mxu0 }
 0x73c   :  { %v553_v18 = vadd.f32 %v552_v14, %v4750_v16  ;;  %v1080_v16 = vmul.f32 %v4712_v0, %v4666_v39  ;;  %v1322_v14 = vmul.f32 %v4763_v45, %v4666_v39 }
 0x73d   :  { %v4137_v17 = vpop.f32.mrf.mxu0 }
 0x742   :  { %v721_v19 = vpop.f32.mrf.mxu0 }
 0x743   :  { %v725_v20 = vadd.f32 %v721_v19, %v553_v18 }
 0x744   :  { %v4147_v21 = vpop.f32.mrf.mxu0 }
 0x746   :  { %v891_v22 = vpop.f32.mrf.mxu0 }
 0x747   :  { %v4813_v23 = vadd.f32 %v891_v22, %v725_v20 }
 0x748   :  { %v4157_v25 = vpop.f32.mrf.mxu0 }
 0x74a   :  { %v1063_v26 = vpop.f32.mrf.mxu0 }
 0x74b   :  { %v1067_v27 = vmul.f32 0.35355338, %v1063_v26 }
 0x74c   :  { %v4167_v29 = vpop.f32.mrf.mxu0 }
 0x74d   :  { %v1068_v30 = vadd.f32 %v1067_v27, %v4817_v28 }
 0x74f   :  { %v1069_v33 = vsel %vm293_vm6, %v1068_v30, -inf }
 0x750   :  { %1070 = vmax.xlane.f32.xlu0 %v1069_v33 }
 0x766   :  { %1082 = vrot.lane.b32.xlu0 %v1080_v16, %s4513_s27 }
 0x7d9   :  { %v1071_v34 = vpop.xlane.xlu0 %1070 }
 0x7da   :  { %v1072_v35 = vsub.f32 %v1068_v30, %v1071_v34 }
 0x7dc   :  { %v1073_v37 = vmul.f32 1.442695, %v1072_v35  ;;  %v1488_v35 = vmul.f32 %v4768_v48, %v4666_v39 }
 0x7dd   :  { %v1083_v38 = vpop.permute.xlu0 %1082 }
 0x7de   :  { %4414 = vpow2.f32 %v1073_v37  ;;  %4169 = vmatpush3.msra.mxu1 %v1083_v38 }
 0x7df   :  { %4178 = vmatprep.subr.mxu1 %v4510_v15 }
 0x7eb   :  { %v4415_v40 = vpop.eup %4414 }
 0x7ec   :  { %v1075_v41 = vsel %vm293_vm6, %v4415_v40, 0.0 }
 0x7ed   :  { %1076 = vadd.xlane.f32.xlu1 %v1075_v41 }
 0x7f1   :  { %982 = vmax.xlane.f32.xlu1 %v981_v47 }
 0x876   :  { %v1077_v49 = vpop.xlane.xlu1 %1076 }
 0x877   :  { %4416 = vrcp.f32 %v1077_v49 }
 0x87a   :  { %v983_v58 = vpop.xlane.xlu1 %982 }
 0x87b   :  { %v984_v59 = vsub.f32 %v980_v44, %v983_v58 }
 0x87d   :  { %v985_v60 = vmul.f32 1.442695, %v984_v59 }
 0x87f   :  { %4418 = vpow2.f32 %v985_v60 }
 0x884   :  { %v4417_v51 = vpop.eup %4416 }
 0x885   :  { %v1079_v53 = vmul.f32 %v4417_v51, %v4415_v40  ;;  %v4372_v51 = vld [vmem:[%s5240_s6 + $0x8] sm:$0xff]  }
 0x887   :  { %4171 = vmatmul.mubr.msk.f32.vlgmr.msra.gmra.mxu1 %vm293_vm6, %v1079_v53  ;;  %v4373_v53 = vld [vmem:[%s5240_s6] sm:$0xff]  }
 0x888   :  { %4179 = vmatpush3.xpose.msk.msra.mxu1 %vm71_vm0, %v4782_v62  ;;  %4180 = vmatprep.mubr.msk.f32.mxu1 %vm4511_vm1, %v4510_v15 }
 0x889   :  { %4188 = vmatprep.subr.mxu1 %v4510_v15 }
 0x88b   :  { %4181 = vmatmul.mubr.msk.f32.vlgmr.msra.gmra.mxu1 %vm71_vm0, %v1235_v54 }
 0x88c   :  { %4189 = vmatpush3.xpose.msk.msra.mxu1 %vm71_vm0, %v4782_v62  ;;  %4190 = vmatprep.mubr.msk.f32.mxu1 %vm4511_vm1, %v4510_v15  ;;  %v4419_v9 = vpop.eup %4418 }
 0x88d   :  { %4198 = vmatprep.subr.bf16.mxu1 %v4510_v15  ;;  %v987_v10 = vsel %vm293_vm6, %v4419_v9, 0.0 }
 0x88f   :  { %4191 = vmatmul.mubr.msk.f32.vlgmr.msra.gmra.mxu1 %vm71_vm0, %v1401_v55 }
 0x890   :  { %4202 = vmatprep.mubr.msk.bf16.mxu1 %vm4511_vm1, %v4510_v15  ;;  %4199 = vmatpush3.bf16.msra.mxu1 %v4372_v51  ;;  %v4377_v51 = vld [vmem:[%s5246_s12 + $0x10] sm:$0xff]  }
 0x891   :  { %4200 = vmatprep.subr.bf16.mxu1 %v4510_v15 }
 0x894   :  { %4201 = vmatpush3.bf16.msra.mxu1 %v4373_v53  ;;  %v4378_v53 = vld [vmem:[%s5246_s12 + $0x8] sm:$0xff]  }
 0x895   :  { %4214 = vmatprep.subr.bf16.mxu1 %v4510_v15 }
 0x947   :  { %v4847_v61 = vpop.f32.mrf.mxu1 }
 0x949   :  { %v4172_v62 = vpop.f32.mrf.mxu1 }
 0x94b   :  { %v1305_v63 = vpop.f32.mrf.mxu1 }
 0x94c   :  { %v1309_v36 = vmul.f32 0.35355338, %v1305_v63 }
 0x94d   :  { %v4182_v1 = vpop.f32.mrf.mxu1 }
 0x94e   :  { %v1310_v2 = vadd.f32 %v1309_v36, %v4817_v28  ;;  %v3907_v1 = vld [vmem:[%s5241_s7] ss:$0 sm:$0xff] }
 0x94f   :  { %v1471_v3 = vpop.f32.mrf.mxu1 }
 0x950   :  { %v1475_v4 = vmul.f32 0.35355338, %v1471_v3  ;;  %v1311_v5 = vsel %vm293_vm6, %v1310_v2, -inf }
 0x951   :  { %1312 = vmax.xlane.f32.xlu1 %v1311_v5  ;;  %v4192_v6 = vpop.f32.mrf.mxu1 }
 0x952   :  { %v1476_v7 = vadd.f32 %v1475_v4, %v4817_v28 }
 0x954   :  { %v1477_v8 = vsel %vm293_vm6, %v1476_v7, -inf }
 0x955   :  { %1478 = vmax.xlane.f32.xlu1 %v1477_v8 }
 0x959   :  { %988 = vadd.xlane.f32.xlu1 %v987_v10 }
 0x96a   :  { %1159 = vrot.lane.b32.xlu1 %v992_v12, %s4513_s27 }
 0x96e   :  { %1324 = vrot.lane.b32.xlu1 %v1322_v14, %s4513_s27 }
 0x9da   :  { %v1313_v17 = vpop.xlane.xlu1 %1312 }
 0x9db   :  { %v1314_v18 = vsub.f32 %v1310_v2, %v1313_v17 }
 0x9dd   :  { %v1315_v19 = vmul.f32 1.442695, %v1314_v18 }
 0x9de   :  { %v1479_v20 = vpop.xlane.xlu1 %1478 }
 0x9df   :  { %4420 = vpow2.f32 %v1315_v19  ;;  %v1480_v21 = vsub.f32 %v1476_v7, %v1479_v20 }
 0x9e1   :  { %v1481_v22 = vmul.f32 1.442695, %v1480_v21 }
 0x9e2   :  { %v989_v24 = vpop.xlane.xlu1 %988 }
 0x9e3   :  { %4422 = vpow2.f32 %v1481_v22 }
 0x9e4   :  { %4424 = vrcp.f32 %v989_v24  ;;  %v4375_v24 = vld [vmem:[%s5244_s10] sm:$0xff]  }
 0x9e6   :  { %v1160_v25 = vpop.permute.xlu1 %1159 }
 0x9e7   :  { %4174 = vmatpush3.msra.mxu0 %v1160_v25 }
 0x9e8   :  { %4183 = vmatprep.subr.mxu0 %v4510_v15 }
 0x9ea   :  { %v1325_v34 = vpop.permute.xlu1 %1324 }
 0x9ec   :  { %v4421_v26 = vpop.eup %4420 }
 0x9ed   :  { %v1317_v27 = vsel %vm293_vm6, %v4421_v26, 0.0 }
 0x9ee   :  { %1318 = vadd.xlane.f32.xlu0 %v1317_v27 }
 0x9f0   :  { %v4423_v29 = vpop.eup %4422 }
 0x9f1   :  { %v4425_v30 = vpop.eup %4424  ;;  %v1483_v33 = vsel %vm293_vm6, %v4423_v29, 0.0 }
 0x9f2   :  { %1484 = vadd.xlane.f32.xlu1 %v1483_v33  ;;  %v991_v16 = vmul.f32 %v4425_v30, %v4419_v9 }
 0x9f4   :  { %4176 = vmatmul.mubr.msk.f32.vlgmr.msra.gmra.mxu0 %vm293_vm6, %v991_v16 }
 0x9f5   :  { %4184 = vmatpush3.msra.mxu0 %v1325_v34  ;;  %4185 = vmatprep.mubr.msk.f32.mxu0 %vm4511_vm1, %v4510_v15 }
 0x9f6   :  { %4193 = vmatprep.subr.mxu0 %v4510_v15 }
 0xa03   :  { %1490 = vrot.lane.b32.xlu1 %v1488_v35, %s4513_s27  ;;  %v3911_v35 = vld [vmem:[%s5242_s8] ss:$0 sm:$0xff] }
 0xa77   :  { %v1319_v37 = vpop.xlane.xlu0 %1318 }
 0xa78   :  { %4426 = vrcp.f32 %v1319_v37 }
 0xa7b   :  { %v1485_v38 = vpop.xlane.xlu1 %1484 }
 0xa7c   :  { %4428 = vrcp.f32 %v1485_v38 }
 0xa7f   :  { %v1491_v41 = vpop.permute.xlu1 %1490 }
 0xa85   :  { %v4427_v52 = vpop.eup %4426 }
 0xa86   :  { %v1321_v40 = vmul.f32 %v4427_v52, %v4421_v26 }
 0xa88   :  { %4186 = vmatmul.mubr.msk.f32.vlgmr.msra.gmra.mxu0 %vm293_vm6, %v1321_v40  ;;  %v3912_v40 = vld [vmem:[%s5243_s9] ss:$0 sm:$0xff] }
 0xa89   :  { %v4429_v44 = vpop.eup %4428  ;;  %4194 = vmatpush3.msra.mxu0 %v1491_v41  ;;  %4195 = vmatprep.mubr.msk.f32.mxu0 %vm4511_vm1, %v4510_v15 }
 0xa8a   :  { %v1487_v47 = vmul.f32 %v4429_v44, %v4423_v29  ;;  %4206 = vmatprep.subr.bf16.mxu0 %v4510_v15 }
 0xa8c   :  { %4196 = vmatmul.mubr.msk.f32.vlgmr.msra.gmra.mxu0 %vm293_vm6, %v1487_v47 }
 0xa8d   :  { %4210 = vmatprep.mubr.msk.bf16.mxu0 %vm4511_vm1, %v4510_v15 }
 0xab4   :  { %v1231_v39 = vpop.f32.mrf.mxu0 }
 0xab5   :  { %v1232_v55 = vadd.f32 %v1231_v39, %v4847_v61 }
 0xab6   :  { %v4177_v49 = vpop.f32.mrf.mxu0 }
 0xab7   :  { %v4376_v49 = vld [vmem:[%s5246_s12 + $0x18] sm:$0xff]  }
 0xb48   :  { %v1396_v54 = vpop.f32.mrf.mxu0 }
 0xb49   :  { %v1400_v59 = vadd.f32 %v1396_v54, %v1232_v55  ;;  %v4379_v54 = vld [vmem:[%s5246_s12] sm:$0xff]  }
 0xb4a   :  { %v4187_v58 = vpop.f32.mrf.mxu0  ;;  %v3913_v55 = vld [vmem:[%s5245_s11] ss:$0 sm:$0xff] }
 0xb4c   :  { %v1562_v60 = vpop.f32.mrf.mxu0 }
 0xb4d   :  { %v1566_v62 = vadd.f32 %v1562_v60, %v1400_v59 }
 0xb4e   :  { %v4197_v63 = vpop.f32.mrf.mxu0 }
 0xb4f   :  { %v1571_v36 = vpack.c.bf16 %v1566_v62, %v4813_v23 }
 0xb51   :  { %4203 = vmatmul.mubr.msk.bf16.vlgmr.msra.gmra.mxu1 %vm71_vm0, %v1571_v36 }
 0xb52   :  { %4222 = vmatprep.mubr.msk.bf16.mxu1 %vm4511_vm1, %v4510_v15  ;;  %4215 = vmatpush3.bf16.msra.mxu1 %v4376_v49 }
 0xb53   :  { %4216 = vmatprep.subr.bf16.mxu1 %v4510_v15 }
 0xb56   :  { %4217 = vmatpush3.bf16.msra.mxu1 %v4377_v51  ;;  %v4381_v51 = vld [vmem:[%s5263_s26 + $0x10] sm:$0xff]  }
 0xb57   :  { %4218 = vmatprep.subr.bf16.mxu1 %v4510_v15 }
 0xb5a   :  { %4219 = vmatpush3.bf16.msra.mxu1 %v4378_v53 }
 0xb5b   :  { %4220 = vmatprep.subr.bf16.mxu1 %v4510_v15 }
 0xb5e   :  { %4221 = vmatpush3.bf16.msra.mxu1 %v4379_v54 }
 0xb5f   :  { %4244 = vmatprep.subr.mxu1 %v4510_v15 }
 0xc11   :  { %v1628_v2 = vpop.f32.mrf.mxu1 }
 0xc12   :  { %v1629_v3 = vadd.f32 %v3907_v1, %v1628_v2 }
 0xc13   :  { %v4204_v4 = vpop.f32.mrf.mxu1 }
 0xc14   :  { %v1635_v61 = vadd.f32 %v1629_v3, %v4650_v31 }
 0xc15   :  { %v1631_v5 = vpop.f32.mrf.mxu1 }
 0xc16   :  { %v1632_v6 = vadd.f32 %v3907_v1, %v1631_v5  ;;  %v1639_v7 = vsel %vm71_vm0, %v1635_v61, 0.0 }
 0xc17   :  { %1640 = vadd.xlane.f32.xlu0 %v1639_v7  ;;  %v4205_v23 = vpop.f32.mrf.mxu1 }
 0xc18   :  { %v1636_v8 = vadd.f32 %v1632_v6, %v4652_v32  ;;  %v4374_v32 = vld [vmem:[%s5244_s10 + $0x8] sm:$0xff]  }
 0xc19   :  { %4207 = vmatpush3.bf16.msra.mxu0 %v4374_v32 }
 0xc1a   :  { %v1642_v9 = vsel %vm71_vm0, %v1636_v8, 0.0  ;;  %4208 = vmatprep.subr.bf16.mxu0 %v4510_v15 }
 0xc1b   :  { %1643 = vadd.xlane.f32.xlu1 %v1642_v9 }
 0xc1d   :  { %4209 = vmatpush3.bf16.msra.mxu0 %v4375_v24 }
 0xc1e   :  { %4226 = vmatprep.subr.bf16.mxu0 %v4510_v15 }
 0xca0   :  { %v1641_v10 = vpop.xlane.xlu0 %1640 }
 0xca1   :  { %v1645_v12 = vmul.f32 0.03125, %v1641_v10 }
 0xca3   :  { %v1647_v14 = vsub.f32 %v1635_v61, %v1645_v12 }
 0xca4   :  { %v1644_v17 = vpop.xlane.xlu1 %1643 }
 0xca5   :  { %v1646_v18 = vmul.f32 0.03125, %v1644_v17  ;;  %v1649_v19 = vmul.f32 %v1647_v14, %v1647_v14 }
 0xca7   :  { %v1648_v20 = vsub.f32 %v1636_v8, %v1646_v18  ;;  %v1651_v31 = vsel %vm71_vm0, %v1649_v19, 0.0 }
 0xca8   :  { %1652 = vadd.xlane.f32.xlu0 %v1651_v31 }
 0xca9   :  { %v1650_v21 = vmul.f32 %v1648_v20, %v1648_v20 }
 0xcab   :  { %v1654_v22 = vsel %vm71_vm0, %v1650_v21, 0.0  ;;  %v3917_v21 = vld [vmem:[%s5247_s13] ss:$0 sm:$0xff] }
 0xcac   :  { %1655 = vadd.xlane.f32.xlu0 %v1654_v22 }
 0xd31   :  { %v1653_v25 = vpop.xlane.xlu0 %1652 }
 0xd32   :  { %v1657_v26 = vmul.f32 0.03125, %v1653_v25 }
 0xd34   :  { %v1659_v27 = vadd.f32 1e-12, %v1657_v26 }
 0xd35   :  { %v1656_v29 = vpop.xlane.xlu0 %1655 }
 0xd36   :  { %4430 = vrsqrt.f32 %v1659_v27  ;;  %v1658_v30 = vmul.f32 0.03125, %v1656_v29 }
 0xd38   :  { %v1660_v33 = vadd.f32 1e-12, %v1658_v30 }
 0xd3a   :  { %4432 = vrsqrt.f32 %v1660_v33 }
 0xd43   :  { %v4431_v16 = vpop.eup %4430 }
 0xd44   :  { %v1663_v34 = vmul.f32 %v4431_v16, %v1647_v14 }
 0xd46   :  { %v1671_v52 = vmul.f32 %v3911_v35, %v1663_v34 }
 0xd47   :  { %v4433_v37 = vpop.eup %4432 }
 0xd48   :  { %v1664_v38 = vmul.f32 %v4433_v37, %v1648_v20  ;;  %v1679_v44 = vadd.f32 %v3912_v40, %v1671_v52 }
 0xd4a   :  { %v1672_v41 = vmul.f32 %v3911_v35, %v1664_v38 }
 0xd4c   :  { %v1680_v47 = vadd.f32 %v3912_v40, %v1672_v41 }
 0xd4e   :  { %v1685_v39 = vpack.c.bf16 %v1680_v47, %v1679_v44 }
 0xd50   :  { %4211 = vmatmul.mubr.msk.bf16.vlgmr.msra.gmra.mxu0 %vm71_vm0, %v1685_v39 }
 0xd51   :  { %4230 = vmatprep.mubr.msk.bf16.mxu0 %vm4511_vm1, %v4510_v15 }
 0xe10   :  { %v1742_v58 = vpop.f32.mrf.mxu0 }
 0xe11   :  { %v1743_v59 = vadd.f32 %v3913_v55, %v1742_v58 }
 0xe12   :  { %v4212_v60 = vpop.f32.mrf.mxu0 }
 0xe13   :  { %v1751_v62 = vmul.f32 0.044715, %v1743_v59  ;;  %v1749_v14 = vmul.f32 0.5, %v1743_v59 }
 0xe14   :  { %v1745_v63 = vpop.f32.mrf.mxu0 }
 0xe15   :  { %v1753_v36 = vmul.f32 %v1751_v62, %v1743_v59  ;;  %v1746_v1 = vadd.f32 %v3913_v55, %v1745_v63 }
 0xe16   :  { %v4213_v2 = vpop.f32.mrf.mxu0 }
 0xe17   :  { %v1755_v3 = vmul.f32 %v1753_v36, %v1743_v59  ;;  %v1752_v4 = vmul.f32 0.044715, %v1746_v1  ;;  %v1750_v17 = vmul.f32 0.5, %v1746_v1  ;;  %v3923_v36 = vld [vmem:[%s5248_s14] ss:$0 sm:$0xff] }
 0xe19   :  { %v1757_v61 = vadd.f32 %v1755_v3, %v1743_v59  ;;  %v1754_v5 = vmul.f32 %v1752_v4, %v1746_v1  ;;  %v3924_v4 = vld [vmem:[%s5249_s15] ss:$0 sm:$0xff] }
 0xe1b   :  { %v1759_v6 = vmul.f32 0.7978846, %v1757_v61  ;;  %v1756_v7 = vmul.f32 %v1754_v5, %v1746_v1 }
 0xe1d   :  { %4434 = vtanh.f32 %v1759_v6  ;;  %v1758_v23 = vadd.f32 %v1756_v7, %v1746_v1 }
 0xe1f   :  { %v1760_v8 = vmul.f32 0.7978846, %v1758_v23  ;;  %v3930_v23 = vld [vmem:[%s5239_s5 + $0x1] ss:$0 sm:$0xff] }
 0xe21   :  { %4436 = vtanh.f32 %v1760_v8 }
 0xe2a   :  { %v4435_v9 = vpop.eup %4434 }
 0xe2b   :  { %v1763_v10 = vadd.f32 1.0, %v4435_v9 }
 0xe2d   :  { %v1765_v19 = vmul.f32 %v1763_v10, %v1749_v14 }
 0xe2e   :  { %v4437_v12 = vpop.eup %4436 }
 0xe2f   :  { %v1764_v18 = vadd.f32 1.0, %v4437_v12 }
 0xe31   :  { %v1766_v20 = vmul.f32 %v1764_v18, %v1750_v17 }
 0xe33   :  { %v1775_v31 = vpack.c.bf16 %v1766_v20, %v1765_v19 }
 0xe35   :  { %4223 = vmatmul.mubr.msk.bf16.vlgmr.msra.gmra.mxu1 %vm1807_vm13, %v1775_v31 }
 0xe36   :  { %4246 = vmatprep.mubr.msk.f32.mxu1 %vm4511_vm1, %v4510_v15 }
 0xef5   :  { %v1845_v22 = vpop.f32.mrf.mxu1 }
 0xef6   :  { %v1846_v32 = vadd.f32 %v3917_v21, %v1845_v22 }
 0xef7   :  { %v4224_v24 = vpop.f32.mrf.mxu1 }
 0xef8   :  { %v1852_v25 = vadd.f32 %v1846_v32, %v1679_v44 }
 0xef9   :  { %v1848_v26 = vpop.f32.mrf.mxu1 }
 0xefa   :  { %v1849_v27 = vadd.f32 %v3917_v21, %v1848_v26  ;;  %v1856_v29 = vsel %vm71_vm0, %v1852_v25, 0.0 }
 0xefb   :  { %1857 = vadd.xlane.f32.xlu0 %v1856_v29  ;;  %v4225_v30 = vpop.f32.mrf.mxu1 }
 0xefc   :  { %v1853_v33 = vadd.f32 %v1849_v27, %v1680_v47  ;;  %v4380_v47 = vld [vmem:[%s5263_s26 + $0x18] sm:$0xff]  }
 0xefd   :  { %4227 = vmatpush3.bf16.msra.mxu0 %v4380_v47 }
 0xefe   :  { %v1859_v16 = vsel %vm71_vm0, %v1853_v33, 0.0  ;;  %4228 = vmatprep.subr.bf16.mxu0 %v4510_v15 }
 0xeff   :  { %1860 = vadd.xlane.f32.xlu0 %v1859_v16 }
 0xf01   :  { %4229 = vmatpush3.bf16.msra.mxu0 %v4381_v51 }
 0xf02   :  { %4234 = vmatprep.subr.mxu0 %v4510_v15 }
 0xf84   :  { %v1858_v34 = vpop.xlane.xlu0 %1857 }
 0xf85   :  { %v1862_v35 = vmul.f32 0.03125, %v1858_v34 }
 0xf87   :  { %v1864_v37 = vsub.f32 %v1852_v25, %v1862_v35 }
 0xf88   :  { %v1861_v38 = vpop.xlane.xlu0 %1860 }
 0xf89   :  { %v1863_v52 = vmul.f32 0.03125, %v1861_v38  ;;  %v1866_v40 = vmul.f32 %v1864_v37, %v1864_v37 }
 0xf8b   :  { %v1865_v41 = vsub.f32 %v1853_v33, %v1863_v52  ;;  %v1868_v39 = vsel %vm71_vm0, %v1866_v40, 0.0 }
 0xf8c   :  { %1869 = vadd.xlane.f32.xlu0 %v1868_v39 }
 0xf8d   :  { %v1867_v44 = vmul.f32 %v1865_v41, %v1865_v41 }
 0xf8f   :  { %v1871_v49 = vsel %vm71_vm0, %v1867_v44, 0.0 }
 0xf90   :  { %1872 = vadd.xlane.f32.xlu0 %v1871_v49 }
0x1015   :  { %v1870_v53 = vpop.xlane.xlu0 %1869 }
0x1016   :  { %v1874_v54 = vmul.f32 0.03125, %v1870_v53 }
0x1018   :  { %v1876_v55 = vadd.f32 1e-12, %v1874_v54 }
0x1019   :  { %v1873_v58 = vpop.xlane.xlu0 %1872 }
0x101a   :  { %4438 = vrsqrt.f32 %v1876_v55  ;;  %v1875_v59 = vmul.f32 0.03125, %v1873_v58 }
0x101c   :  { %v1877_v60 = vadd.f32 1e-12, %v1875_v59 }
0x101e   :  { %4440 = vrsqrt.f32 %v1877_v60 }
0x1027   :  { %v4439_v62 = vpop.eup %4438 }
0x1028   :  { %v1880_v63 = vmul.f32 %v4439_v62, %v1864_v37 }
0x102a   :  { %v1888_v3 = vmul.f32 %v3923_v36, %v1880_v63 }
0x102b   :  { %v4441_v1 = vpop.eup %4440 }
0x102c   :  { %v1881_v2 = vmul.f32 %v4441_v1, %v1865_v41  ;;  %v4959_v5 = vadd.f32 %v3924_v4, %v1888_v3 }
0x102e   :  { %v1889_v61 = vmul.f32 %v3923_v36, %v1881_v2 }
0x1030   :  { %v4961_v6 = vadd.f32 %v3924_v4, %v1889_v61 }
0x1032   :  { %v1903_v7 = vpack.c.bf16 %v4961_v6, %v4959_v5 }
0x1034   :  { %4231 = vmatmul.mubr.msk.bf16.vlgmr.msra.gmra.mxu0 %vm71_vm0, %v1903_v7 }
0x1035   :  { %4236 = vmatprep.mubr.msk.f32.mxu0 %vm4511_vm1, %v4510_v15 }
0x10f4   :  { %v1961_v8 = vpop.f32.mrf.mxu0 }
0x10f5   :  { %v4971_v9 = vadd.f32 %v3930_v23, %v1961_v8 }
0x10f6   :  { %v4232_v10 = vpop.f32.mrf.mxu0 }
0x10f7   :  { %1970 = vrot.lane.b32.xlu0 %v4971_v9, %s4512_s24  ;;  %v1968_v19 = vmul.f32 %v4674_v43, %v4971_v9  ;;  %v2061_v20 = vmul.f32 %v4684_v46, %v4971_v9  ;;  %v2148_v38 = vmul.f32 %v4971_v9, %v4712_v0  ;;  %v2303_v44 = vmul.f32 %v4726_v11, %v4971_v9 }
0x10f8   :  { %v1964_v12 = vpop.f32.mrf.mxu0  ;;  %v2469_v49 = vmul.f32 %v4737_v13, %v4971_v9  ;;  %v2556_v8 = vmul.f32 %v4971_v9, %v4768_v48 }
0x10f9   :  { %v4975_v14 = vadd.f32 %v3930_v23, %v1964_v12  ;;  %v2390_v23 = vmul.f32 %v4971_v9, %v4763_v45 }
0x10fa   :  { %v4233_v17 = vpop.f32.mrf.mxu0 }
0x1169   :  { %v1971_v18 = vpop.permute.xlu0 %1970 }
0x116a   :  { %4235 = vmatpush3.xpose.msk.msra.mxu0 %vm71_vm0, %v1971_v18 }
0x116b   :  { %4239 = vmatprep.subr.mxu0 %v4510_v15 }
0x116d   :  { %4237 = vmatmul.mubr.msk.f32.vlgmr.msra.gmra.mxu0 %vm71_vm0, %v1968_v19 }
0x116e   :  { %4240 = vmatpush3.xpose.msk.msra.mxu0 %vm71_vm0, %v1971_v18  ;;  %4241 = vmatprep.mubr.msk.f32.mxu0 %vm4511_vm1, %v4510_v15 }
0x116f   :  { %4249 = vmatprep.subr.mxu0 %v4510_v15 }
0x1171   :  { %4242 = vmatmul.mubr.msk.f32.vlgmr.msra.gmra.mxu0 %vm71_vm0, %v2061_v20 }
0x1172   :  { %4251 = vmatprep.mubr.msk.f32.mxu0 %vm4511_vm1, %v4510_v15 }
0x122d   :  { %v2043_v31 = vpop.f32.mrf.mxu0 }
0x122e   :  { %v2047_v21 = vmul.f32 0.35355338, %v2043_v31 }
0x122f   :  { %v4238_v22 = vpop.f32.mrf.mxu0 }
0x1230   :  { %v2048_v32 = vadd.f32 %v2047_v21, %v4706_v57  ;;  %v2635_v22 = vmul.f32 %v4674_v43, %v4975_v14 }
0x1231   :  { %v2131_v24 = vpop.f32.mrf.mxu0 }
0x1232   :  { %v2135_v25 = vmul.f32 0.35355338, %v2131_v24  ;;  %v2049_v26 = vsel %vm293_vm6, %v2048_v32, -inf }
0x1233   :  { %2050 = vmax.xlane.f32.xlu0 %v2049_v26  ;;  %v4243_v27 = vpop.f32.mrf.mxu0 }
0x1234   :  { %v2136_v29 = vadd.f32 %v2135_v25, %v4706_v57  ;;  %v2060_v27 = vmul.f32 %v4971_v9, %v4777_v56 }
0x1236   :  { %v2137_v30 = vsel %vm293_vm6, %v2136_v29, -inf }
0x1237   :  { %2138 = vmax.xlane.f32.xlu1 %v2137_v30 }
0x12bc   :  { %v2051_v47 = vpop.xlane.xlu0 %2050 }
0x12bd   :  { %v2052_v51 = vsub.f32 %v2048_v32, %v2051_v47 }
0x12bf   :  { %v2053_v53 = vmul.f32 1.442695, %v2052_v51 }
0x12c0   :  { %v2139_v33 = vpop.xlane.xlu1 %2138 }
0x12c1   :  { %v2140_v16 = vsub.f32 %v2136_v29, %v2139_v33 }
0x12c3   :  { %v2141_v34 = vmul.f32 1.442695, %v2140_v16 }
0x12c5   :  { %4442 = vpow2.f32 %v2141_v34 }
0x12d2   :  { %v4443_v35 = vpop.eup %4442 }
0x12d3   :  { %v2143_v37 = vsel %vm293_vm6, %v4443_v35, 0.0 }
0x12d4   :  { %2144 = vadd.xlane.f32.xlu1 %v2143_v37 }
0x12e5   :  { %2150 = vrot.lane.b32.xlu1 %v2148_v38, %s4513_s27 }
0x135d   :  { %v2145_v52 = vpop.xlane.xlu1 %2144 }
0x135e   :  { %4444 = vrcp.f32 %v2145_v52  ;;  %v2728_v52 = vmul.f32 %v4684_v46, %v4975_v14 }
0x135f   :  { %4446 = vpow2.f32 %v2053_v53 }
0x1361   :  { %v2151_v40 = vpop.permute.xlu1 %2150 }
0x1362   :  { %4245 = vmatpush3.msra.mxu1 %v2151_v40 }
0x1363   :  { %4254 = vmatprep.subr.mxu1 %v4510_v15 }
0x136b   :  { %v4445_v41 = vpop.eup %4444 }
0x136c   :  { %v2147_v39 = vmul.f32 %v4445_v41, %v4443_v35  ;;  %v4447_v61 = vpop.eup %4446 }
0x136d   :  { %v2055_v7 = vsel %vm293_vm6, %v4447_v61, 0.0 }
0x136e   :  { %4247 = vmatmul.mubr.msk.f32.vlgmr.msra.gmra.mxu1 %vm293_vm6, %v2147_v39 }
0x136f   :  { %4255 = vmatpush3.xpose.msk.msra.mxu1 %vm71_vm0, %v1971_v18  ;;  %4256 = vmatprep.mubr.msk.f32.mxu1 %vm4511_vm1, %v4510_v15 }
0x1370   :  { %4264 = vmatprep.subr.mxu1 %v4510_v15 }
0x1372   :  { %4257 = vmatmul.mubr.msk.f32.vlgmr.msra.gmra.mxu1 %vm71_vm0, %v2303_v44 }
0x1373   :  { %4265 = vmatpush3.xpose.msk.msra.mxu1 %vm71_vm0, %v1971_v18  ;;  %4266 = vmatprep.mubr.msk.f32.mxu1 %vm4511_vm1, %v4510_v15 }
0x1374   :  { %4274 = vmatprep.subr.mxu1 %v4510_v15 }
0x1376   :  { %4267 = vmatmul.mubr.msk.f32.vlgmr.msra.gmra.mxu1 %vm71_vm0, %v2469_v49 }
0x1377   :  { %4276 = vmatprep.mubr.msk.f32.mxu1 %vm4511_vm1, %v4510_v15 }
0x142e   :  { %v5017_v54 = vpop.f32.mrf.mxu1 }
0x1430   :  { %v4248_v55 = vpop.f32.mrf.mxu1 }
0x1432   :  { %v2373_v58 = vpop.f32.mrf.mxu1 }
0x1433   :  { %v2377_v59 = vmul.f32 0.35355338, %v2373_v58 }
0x1434   :  { %v4258_v60 = vpop.f32.mrf.mxu1 }
0x1435   :  { %v2378_v62 = vadd.f32 %v2377_v59, %v4706_v57 }
0x1436   :  { %v2539_v63 = vpop.f32.mrf.mxu1 }
0x1437   :  { %v2543_v36 = vmul.f32 0.35355338, %v2539_v63  ;;  %v2379_v1 = vsel %vm293_vm6, %v2378_v62, -inf }
0x1438   :  { %2380 = vmax.xlane.f32.xlu1 %v2379_v1  ;;  %v4268_v2 = vpop.f32.mrf.mxu1  ;;  %v2815_v1 = vmul.f32 %v4975_v14, %v4712_v0 }
0x1439   :  { %v2544_v3 = vadd.f32 %v2543_v36, %v4706_v57 }
0x143b   :  { %v2545_v4 = vsel %vm293_vm6, %v2544_v3, -inf }
0x143c   :  { %2546 = vmax.xlane.f32.xlu0 %v2545_v4 }
0x1440   :  { %2056 = vadd.xlane.f32.xlu0 %v2055_v7 }
0x1449   :  { %2392 = vrot.lane.b32.xlu1 %v2390_v23, %s4513_s27 }
0x144d   :  { %2558 = vrot.lane.b32.xlu1 %v2556_v8, %s4513_s27 }
0x1451   :  { %2637 = vrot.lane.b32.xlu1 %v4975_v14, %s4512_s24 }
0x14c1   :  { %v2381_v57 = vpop.xlane.xlu1 %2380 }
0x14c2   :  { %v2382_v10 = vsub.f32 %v2378_v62, %v2381_v57 }
0x14c4   :  { %v2383_v12 = vmul.f32 1.442695, %v2382_v10 }
0x14c5   :  { %v2393_v17 = vpop.permute.xlu1 %2392  ;;  %v2547_v18 = vpop.xlane.xlu0 %2546 }
0x14c6   :  { %4448 = vpow2.f32 %v2383_v12  ;;  %v2548_v19 = vsub.f32 %v2544_v3, %v2547_v18  ;;  %v3136_v18 = vmul.f32 %v4737_v13, %v4975_v14 }
0x14c8   :  { %v2549_v20 = vmul.f32 1.442695, %v2548_v19 }
0x14c9   :  { %v2559_v31 = vpop.permute.xlu1 %2558  ;;  %v2057_v43 = vpop.xlane.xlu0 %2056 }
0x14ca   :  { %4450 = vpow2.f32 %v2549_v20 }
0x14cb   :  { %4452 = vrcp.f32 %v2057_v43 }
0x14cd   :  { %v5032_v21 = vpop.permute.xlu1 %2637 }
0x14ce   :  { %4275 = vmatpush3.xpose.msk.msra.mxu1 %vm71_vm0, %v5032_v21 }
0x14cf   :  { %4284 = vmatprep.subr.mxu1 %v4510_v15 }
0x14d1   :  { %4277 = vmatmul.mubr.msk.f32.vlgmr.msra.gmra.mxu1 %vm71_vm0, %v2635_v22 }
0x14d2   :  { %4286 = vmatprep.mubr.msk.f32.mxu1 %vm4511_vm1, %v4510_v15 }
0x14d3   :  { %v4449_v32 = vpop.eup %4448 }
0x14d4   :  { %v2385_v24 = vsel %vm293_vm6, %v4449_v32, 0.0 }
0x14d5   :  { %2386 = vadd.xlane.f32.xlu0 %v2385_v24 }
0x14d7   :  { %v4451_v25 = vpop.eup %4450 }
0x14d8   :  { %v2551_v26 = vsel %vm293_vm6, %v4451_v25, 0.0  ;;  %v4453_v33 = vpop.eup %4452 }
0x14d9   :  { %2552 = vadd.xlane.f32.xlu0 %v2551_v26  ;;  %v2059_v34 = vmul.f32 %v4453_v33, %v4447_v61 }
0x14ef   :  { %2227 = vrot.lane.b32.xlu0 %v2060_v27, %s4513_s27 }
0x155e   :  { %v2387_v29 = vpop.xlane.xlu0 %2386 }
0x155f   :  { %4454 = vrcp.f32 %v2387_v29 }
0x1562   :  { %v2553_v30 = vpop.xlane.xlu0 %2552 }
0x1563   :  { %4456 = vrcp.f32 %v2553_v30 }
0x1566   :  { %v2228_v16 = vpop.permute.xlu0 %2227 }
0x1567   :  { %4250 = vmatpush3.msra.mxu0 %v2228_v16 }
0x1568   :  { %4252 = vmatmul.mubr.msk.f32.vlgmr.msra.gmra.mxu0 %vm293_vm6, %v2059_v34  ;;  %4259 = vmatprep.subr.mxu0 %v4510_v15  ;;  %v2727_v34 = vmul.f32 %v4975_v14, %v4777_v56 }
0x1569   :  { %4260 = vmatpush3.msra.mxu0 %v2393_v17  ;;  %4261 = vmatprep.mubr.msk.f32.mxu0 %vm4511_vm1, %v4510_v15  ;;  %v2970_v17 = vmul.f32 %v4726_v11, %v4975_v14 }
0x156a   :  { %4269 = vmatprep.subr.mxu0 %v4510_v15 }
0x156c   :  { %v4455_v9 = vpop.eup %4454 }
0x156d   :  { %v2389_v35 = vmul.f32 %v4455_v9, %v4449_v32  ;;  %v3057_v9 = vmul.f32 %v4975_v14, %v4763_v45 }
0x156f   :  { %4262 = vmatmul.mubr.msk.f32.vlgmr.msra.gmra.mxu0 %vm293_vm6, %v2389_v35 }
0x1570   :  { %v4457_v37 = vpop.eup %4456  ;;  %4270 = vmatpush3.msra.mxu0 %v2559_v31  ;;  %4271 = vmatprep.mubr.msk.f32.mxu0 %vm4511_vm1, %v4510_v15 }
0x1571   :  { %4279 = vmatprep.subr.mxu0 %v4510_v15  ;;  %v2555_v38 = vmul.f32 %v4457_v37, %v4451_v25 }
0x1573   :  { %4272 = vmatmul.mubr.msk.f32.vlgmr.msra.gmra.mxu0 %vm293_vm6, %v2555_v38 }
0x1574   :  { %4280 = vmatpush3.xpose.msk.msra.mxu0 %vm71_vm0, %v5032_v21  ;;  %4281 = vmatprep.mubr.msk.f32.mxu0 %vm4511_vm1, %v4510_v15 }
0x1575   :  { %4289 = vmatprep.subr.mxu0 %v4510_v15 }
0x1577   :  { %4282 = vmatmul.mubr.msk.f32.vlgmr.msra.gmra.mxu0 %vm71_vm0, %v2728_v52 }
0x1578   :  { %4291 = vmatprep.mubr.msk.f32.mxu0 %vm4511_vm1, %v4510_v15 }
0x1591   :  { %v2710_v40 = vpop.f32.mrf.mxu1 }
0x1592   :  { %v2714_v61 = vmul.f32 0.35355338, %v2710_v40 }
0x1593   :  { %v4278_v41 = vpop.f32.mrf.mxu1 }
0x1594   :  { %v2715_v8 = vadd.f32 %v2714_v61, %v4817_v28 }
0x1596   :  { %v2716_v57 = vsel %vm293_vm6, %v2715_v8, -inf }
0x1628   :  { %v2299_v39 = vpop.f32.mrf.mxu0 }
0x1629   :  { %v2300_v49 = vadd.f32 %v2299_v39, %v5017_v54 }
0x162a   :  { %v4253_v44 = vpop.f32.mrf.mxu0 }
0x162f   :  { %v2464_v47 = vpop.f32.mrf.mxu0 }
0x1630   :  { %v2468_v51 = vadd.f32 %v2464_v47, %v2300_v49 }
0x1631   :  { %v4263_v53 = vpop.f32.mrf.mxu0 }
0x1633   :  { %v2630_v55 = vpop.f32.mrf.mxu0 }
0x1634   :  { %v5068_v58 = vadd.f32 %v2630_v55, %v2468_v51  ;;  %v3223_v55 = vmul.f32 %v4975_v14, %v4768_v48 }
0x1635   :  { %v4273_v46 = vpop.f32.mrf.mxu0 }
0x1637   :  { %v2798_v59 = vpop.f32.mrf.mxu0 }
0x1638   :  { %v2802_v60 = vmul.f32 0.35355338, %v2798_v59 }
0x1639   :  { %v4283_v62 = vpop.f32.mrf.mxu0 }
0x163a   :  { %v2803_v63 = vadd.f32 %v2802_v60, %v4817_v28 }
0x163c   :  { %v2804_v36 = vsel %vm293_vm6, %v2803_v63, -inf }
0x163d   :  { %2805 = vmax.xlane.f32.xlu0 %v2804_v36 }
0x1653   :  { %2817 = vrot.lane.b32.xlu0 %v2815_v1, %s4513_s27 }
0x16c6   :  { %v2806_v54 = vpop.xlane.xlu0 %2805 }
0x16c7   :  { %v2807_v2 = vsub.f32 %v2803_v63, %v2806_v54  ;;  %v4382_v54 = vld [vmem:[%s5240_s6 + $0x18] sm:$0xff]  }
0x16c9   :  { %v2808_v3 = vmul.f32 1.442695, %v2807_v2  ;;  %v4383_v2 = vld [vmem:[%s5240_s6 + $0x10] sm:$0xff]  }
0x16ca   :  { %v2818_v4 = vpop.permute.xlu0 %2817 }
0x16cb   :  { %4458 = vpow2.f32 %v2808_v3  ;;  %4285 = vmatpush3.msra.mxu1 %v2818_v4 }
0x16cc   :  { %4294 = vmatprep.subr.mxu1 %v4510_v15 }
0x16d8   :  { %v4459_v7 = vpop.eup %4458 }
0x16d9   :  { %v2810_v23 = vsel %vm293_vm6, %v4459_v7, 0.0 }
0x16da   :  { %2811 = vadd.xlane.f32.xlu1 %v2810_v23 }
0x16de   :  { %2717 = vmax.xlane.f32.xlu1 %v2716_v57 }
0x1763   :  { %v2812_v0 = vpop.xlane.xlu1 %2811 }
0x1764   :  { %4460 = vrcp.f32 %v2812_v0 }
0x1767   :  { %v2718_v19 = vpop.xlane.xlu1 %2717 }
0x1768   :  { %v2719_v11 = vsub.f32 %v2715_v8, %v2718_v19 }
0x176a   :  { %v2720_v20 = vmul.f32 1.442695, %v2719_v11 }
0x176c   :  { %4462 = vpow2.f32 %v2720_v20 }
0x1771   :  { %v4461_v10 = vpop.eup %4460 }
0x1772   :  { %v2814_v12 = vmul.f32 %v4461_v10, %v4459_v7  ;;  %v3963_v10 = vld [vmem:[%s5241_s7 + $0x1] ss:$0 sm:$0xff] }
0x1774   :  { %4287 = vmatmul.mubr.msk.f32.vlgmr.msra.gmra.mxu1 %vm293_vm6, %v2814_v12 }
0x1775   :  { %4295 = vmatpush3.xpose.msk.msra.mxu1 %vm71_vm0, %v5032_v21  ;;  %4296 = vmatprep.mubr.msk.f32.mxu1 %vm4511_vm1, %v4510_v15 }
0x1776   :  { %4304 = vmatprep.subr.mxu1 %v4510_v15 }
0x1778   :  { %4297 = vmatmul.mubr.msk.f32.vlgmr.msra.gmra.mxu1 %vm71_vm0, %v2970_v17 }
0x1779   :  { %4305 = vmatpush3.xpose.msk.msra.mxu1 %vm71_vm0, %v5032_v21  ;;  %4306 = vmatprep.mubr.msk.f32.mxu1 %vm4511_vm1, %v4510_v15  ;;  %v4463_v33 = vpop.eup %4462 }
0x177a   :  { %4314 = vmatprep.subr.bf16.mxu1 %v4510_v15  ;;  %v2722_v16 = vsel %vm293_vm6, %v4463_v33, 0.0 }
0x177c   :  { %4307 = vmatmul.mubr.msk.f32.vlgmr.msra.gmra.mxu1 %vm71_vm0, %v3136_v18 }
0x177d   :  { %4318 = vmatprep.mubr.msk.bf16.mxu1 %vm4511_vm1, %v4510_v15  ;;  %4315 = vmatpush3.bf16.msra.mxu1 %v4382_v54 }
0x177e   :  { %4316 = vmatprep.subr.bf16.mxu1 %v4510_v15 }
0x1781   :  { %4317 = vmatpush3.bf16.msra.mxu1 %v4383_v2 }
0x1782   :  { %4330 = vmatprep.subr.bf16.mxu1 %v4510_v15 }
0x1834   :  { %v5098_v31 = vpop.f32.mrf.mxu1 }
0x1836   :  { %v4288_v21 = vpop.f32.mrf.mxu1 }
0x1838   :  { %v3040_v22 = vpop.f32.mrf.mxu1 }
0x1839   :  { %v3044_v32 = vmul.f32 0.35355338, %v3040_v22 }
0x183a   :  { %v4298_v24 = vpop.f32.mrf.mxu1 }
0x183b   :  { %v3045_v25 = vadd.f32 %v3044_v32, %v4817_v28 }
0x183c   :  { %v3206_v13 = vpop.f32.mrf.mxu1 }
0x183d   :  { %v3210_v26 = vmul.f32 0.35355338, %v3206_v13  ;;  %v3046_v27 = vsel %vm293_vm6, %v3045_v25, -inf }
0x183e   :  { %3047 = vmax.xlane.f32.xlu1 %v3046_v27  ;;  %v4308_v43 = vpop.f32.mrf.mxu1 }
0x183f   :  { %v3211_v29 = vadd.f32 %v3210_v26, %v4817_v28 }
0x1841   :  { %v3212_v30 = vsel %vm293_vm6, %v3211_v29, -inf }
0x1842   :  { %3213 = vmax.xlane.f32.xlu1 %v3212_v30 }
0x1846   :  { %2723 = vadd.xlane.f32.xlu1 %v2722_v16 }
0x1857   :  { %2894 = vrot.lane.b32.xlu1 %v2727_v34, %s4513_s27 }
0x185b   :  { %3059 = vrot.lane.b32.xlu1 %v3057_v9, %s4513_s27 }
0x18c7   :  { %v3048_v35 = vpop.xlane.xlu1 %3047 }
0x18c8   :  { %v3049_v37 = vsub.f32 %v3045_v25, %v3048_v35 }
0x18ca   :  { %v3050_v28 = vmul.f32 1.442695, %v3049_v37 }
0x18cb   :  { %v3214_v38 = vpop.xlane.xlu1 %3213 }
0x18cc   :  { %4464 = vpow2.f32 %v3050_v28  ;;  %v3215_v52 = vsub.f32 %v3211_v29, %v3214_v38 }
0x18ce   :  { %v3216_v40 = vmul.f32 1.442695, %v3215_v52 }
0x18cf   :  { %v2724_v41 = vpop.xlane.xlu1 %2723 }
0x18d0   :  { %4466 = vpow2.f32 %v3216_v40  ;;  %v3969_v40 = vld [vmem:[%s5242_s8 + $0x1] ss:$0 sm:$0xff] }
0x18d1   :  { %4468 = vrcp.f32 %v2724_v41 }
0x18d3   :  { %v2895_v39 = vpop.permute.xlu1 %2894 }
0x18d4   :  { %4290 = vmatpush3.msra.mxu0 %v2895_v39 }
0x18d5   :  { %4299 = vmatprep.subr.mxu0 %v4510_v15 }
0x18d7   :  { %v3060_v53 = vpop.permute.xlu1 %3059 }
0x18d9   :  { %v4465_v56 = vpop.eup %4464 }
0x18da   :  { %v3052_v44 = vsel %vm293_vm6, %v4465_v56, 0.0 }
0x18db   :  { %3053 = vadd.xlane.f32.xlu0 %v3052_v44  ;;  %v3970_v44 = vld [vmem:[%s5243_s9 + $0x1] ss:$0 sm:$0xff] }
0x18dd   :  { %v4467_v45 = vpop.eup %4466 }
0x18de   :  { %v4469_v49 = vpop.eup %4468  ;;  %v3218_v47 = vsel %vm293_vm6, %v4467_v45, 0.0 }
0x18df   :  { %3219 = vadd.xlane.f32.xlu1 %v3218_v47  ;;  %v2726_v51 = vmul.f32 %v4469_v49, %v4463_v33  ;;  %v4385_v33 = vld [vmem:[%s5244_s10 + $0x10] sm:$0xff]  }
0x18e1   :  { %4292 = vmatmul.mubr.msk.f32.vlgmr.msra.gmra.mxu0 %vm293_vm6, %v2726_v51 }
0x18e2   :  { %4300 = vmatpush3.msra.mxu0 %v3060_v53  ;;  %4301 = vmatprep.mubr.msk.f32.mxu0 %vm4511_vm1, %v4510_v15  ;;  %v4386_v53 = vld [vmem:[%s5246_s12 + $0x38] sm:$0xff]  }
0x18e3   :  { %4309 = vmatprep.subr.mxu0 %v4510_v15 }
0x18f0   :  { %3225 = vrot.lane.b32.xlu1 %v3223_v55, %s4513_s27  ;;  %v4387_v55 = vld [vmem:[%s5246_s12 + $0x30] sm:$0xff]  }
0x1964   :  { %v3054_v46 = vpop.xlane.xlu0 %3053 }
0x1965   :  { %4470 = vrcp.f32 %v3054_v46  ;;  %v4388_v46 = vld [vmem:[%s5246_s12 + $0x28] sm:$0xff]  }
0x1968   :  { %v3220_v59 = vpop.xlane.xlu1 %3219 }
0x1969   :  { %4472 = vrcp.f32 %v3220_v59  ;;  %v4389_v59 = vld [vmem:[%s5246_s12 + $0x20] sm:$0xff]  }
0x196c   :  { %v3226_v63 = vpop.permute.xlu1 %3225 }
0x1972   :  { %v4471_v60 = vpop.eup %4470 }
0x1973   :  { %v3056_v62 = vmul.f32 %v4471_v60, %v4465_v56  ;;  %v3976_v60 = vld [vmem:[%s5245_s11 + $0x1] ss:$0 sm:$0xff] }
0x1975   :  { %4302 = vmatmul.mubr.msk.f32.vlgmr.msra.gmra.mxu0 %vm293_vm6, %v3056_v62 }
0x1976   :  { %v4473_v36 = vpop.eup %4472  ;;  %4310 = vmatpush3.msra.mxu0 %v3226_v63  ;;  %4311 = vmatprep.mubr.msk.f32.mxu0 %vm4511_vm1, %v4510_v15 }
0x1977   :  { %v3222_v1 = vmul.f32 %v4473_v36, %v4467_v45  ;;  %4322 = vmatprep.subr.bf16.mxu0 %v4510_v15 }
0x1979   :  { %4312 = vmatmul.mubr.msk.f32.vlgmr.msra.gmra.mxu0 %vm293_vm6, %v3222_v1 }
0x197a   :  { %4326 = vmatprep.mubr.msk.bf16.mxu0 %vm4511_vm1, %v4510_v15 }
0x19a1   :  { %v2966_v48 = vpop.f32.mrf.mxu0 }
0x19a2   :  { %v2967_v4 = vadd.f32 %v2966_v48, %v5098_v31 }
0x19a3   :  { %v4293_v14 = vpop.f32.mrf.mxu0 }
0x1a35   :  { %v3131_v3 = vpop.f32.mrf.mxu0 }
0x1a36   :  { %v3135_v7 = vadd.f32 %v3131_v3, %v2967_v4 }
0x1a37   :  { %v4303_v61 = vpop.f32.mrf.mxu0 }
0x1a39   :  { %v3297_v23 = vpop.f32.mrf.mxu0 }
0x1a3a   :  { %v3301_v8 = vadd.f32 %v3297_v23, %v3135_v7 }
0x1a3b   :  { %v4313_v57 = vpop.f32.mrf.mxu0 }
0x1a3c   :  { %v3307_v0 = vpack.c.bf16 %v3301_v8, %v5068_v58 }
0x1a3e   :  { %4319 = vmatmul.mubr.msk.bf16.vlgmr.msra.gmra.mxu1 %vm71_vm0, %v3307_v0 }
0x1a3f   :  { %4338 = vmatprep.mubr.msk.bf16.mxu1 %vm4511_vm1, %v4510_v15  ;;  %4331 = vmatpush3.bf16.msra.mxu1 %v4386_v53  ;;  %v3644_v53 = vmul.u32 8, %v4700_v50 }
0x1a40   :  { %4332 = vmatprep.subr.bf16.mxu1 %v4510_v15 }
0x1a41   :  { %vm3645_vm14 = vcmp.eq.s32.totalorder %v4668_v42, %v3644_v53  ;;  %v4391_v42 = vld [vmem:[%s5250_s16] sm:$0xff]  }
0x1a43   :  { %4333 = vmatpush3.bf16.msra.mxu1 %v4387_v55 }
0x1a44   :  { %4334 = vmatprep.subr.bf16.mxu1 %v4510_v15 }
0x1a47   :  { %4335 = vmatpush3.bf16.msra.mxu1 %v4388_v46 }
0x1a48   :  { %4336 = vmatprep.subr.bf16.mxu1 %v4510_v15 }
0x1a4b   :  { %4337 = vmatpush3.bf16.msra.mxu1 %v4389_v59 }
0x1a4c   :  { %4357 = vmatprep.subr.bf16.mxu1 %v4510_v15 }
0x1afe   :  { %v3365_v12 = vpop.f32.mrf.mxu1 }
0x1aff   :  { %v3366_v17 = vadd.f32 %v3963_v10, %v3365_v12 }
0x1b00   :  { %v4320_v18 = vpop.f32.mrf.mxu1 }
0x1b01   :  { %v3372_v19 = vadd.f32 %v3366_v17, %v4959_v5 }
0x1b02   :  { %v3368_v11 = vpop.f32.mrf.mxu1 }
0x1b03   :  { %v3369_v20 = vadd.f32 %v3963_v10, %v3368_v11  ;;  %v3378_v31 = vsel %vm71_vm0, %v3372_v19, 0.0 }
0x1b04   :  { %3379 = vadd.xlane.f32.xlu0 %v3378_v31  ;;  %v4321_v58 = vpop.f32.mrf.mxu1 }
0x1b05   :  { %v3373_v21 = vadd.f32 %v3369_v20, %v4961_v6  ;;  %v4384_v6 = vld [vmem:[%s5244_s10 + $0x18] sm:$0xff]  }
0x1b06   :  { %4323 = vmatpush3.bf16.msra.mxu0 %v4384_v6 }
0x1b07   :  { %v3381_v22 = vsel %vm71_vm0, %v3373_v21, 0.0  ;;  %4324 = vmatprep.subr.bf16.mxu0 %v4510_v15 }
0x1b08   :  { %3382 = vadd.xlane.f32.xlu1 %v3381_v22  ;;  %v3989_v22 = vld [vmem:[%s5247_s13 + $0x1] ss:$0 sm:$0xff] }
0x1b0a   :  { %4325 = vmatpush3.bf16.msra.mxu0 %v4385_v33 }
0x1b0b   :  { %4342 = vmatprep.subr.mxu0 %v4510_v15 }
0x1b8d   :  { %v3380_v32 = vpop.xlane.xlu0 %3379 }
0x1b8e   :  { %v3384_v24 = vmul.f32 0.03125, %v3380_v32 }
0x1b90   :  { %v3386_v25 = vsub.f32 %v3372_v19, %v3384_v24 }
0x1b91   :  { %v3383_v13 = vpop.xlane.xlu1 %3382 }
0x1b92   :  { %v3385_v26 = vmul.f32 0.03125, %v3383_v13  ;;  %v3388_v27 = vmul.f32 %v3386_v25, %v3386_v25 }
0x1b94   :  { %v3387_v43 = vsub.f32 %v3373_v21, %v3385_v26  ;;  %v3390_v5 = vsel %vm71_vm0, %v3388_v27, 0.0 }
0x1b95   :  { %3391 = vadd.xlane.f32.xlu0 %v3390_v5 }
0x1b96   :  { %v3389_v29 = vmul.f32 %v3387_v43, %v3387_v43 }
0x1b98   :  { %v3393_v30 = vsel %vm71_vm0, %v3389_v29, 0.0 }
0x1b99   :  { %3394 = vadd.xlane.f32.xlu0 %v3393_v30 }
0x1c1e   :  { %v3392_v16 = vpop.xlane.xlu0 %3391 }
0x1c1f   :  { %v3396_v34 = vmul.f32 0.03125, %v3392_v16 }
0x1c21   :  { %v3398_v9 = vadd.f32 1e-12, %v3396_v34 }
0x1c22   :  { %v3395_v35 = vpop.xlane.xlu0 %3394 }
0x1c23   :  { %4474 = vrsqrt.f32 %v3398_v9  ;;  %v3397_v37 = vmul.f32 0.03125, %v3395_v35 }
0x1c25   :  { %v3399_v28 = vadd.f32 1e-12, %v3397_v37 }
0x1c27   :  { %4476 = vrsqrt.f32 %v3399_v28 }
0x1c30   :  { %v4475_v38 = vpop.eup %4474 }
0x1c31   :  { %v3402_v52 = vmul.f32 %v4475_v38, %v3386_v25 }
0x1c33   :  { %v3410_v56 = vmul.f32 %v3969_v40, %v3402_v52 }
0x1c34   :  { %v4477_v41 = vpop.eup %4476 }
0x1c35   :  { %v3403_v39 = vmul.f32 %v4477_v41, %v3387_v43  ;;  %v3418_v49 = vadd.f32 %v3970_v44, %v3410_v56 }
0x1c37   :  { %v3411_v45 = vmul.f32 %v3969_v40, %v3403_v39 }
0x1c39   :  { %v3419_v47 = vadd.f32 %v3970_v44, %v3411_v45 }
0x1c3b   :  { %v3425_v51 = vpack.c.bf16 %v3419_v47, %v3418_v49 }
0x1c3d   :  { %4327 = vmatmul.mubr.msk.bf16.vlgmr.msra.gmra.mxu0 %vm71_vm0, %v3425_v51  ;;  %v3998_v51 = vld [vmem:[%s5249_s15 + $0x1] ss:$0 sm:$0xff] }
0x1c3e   :  { %4346 = vmatprep.mubr.msk.f32.mxu0 %vm4511_vm1, %v4510_v15 }
0x1cfd   :  { %v3483_v62 = vpop.f32.mrf.mxu0 }
0x1cfe   :  { %v3484_v63 = vadd.f32 %v3976_v60, %v3483_v62 }
0x1cff   :  { %v4328_v36 = vpop.f32.mrf.mxu0 }
0x1d00   :  { %v3492_v1 = vmul.f32 0.044715, %v3484_v63  ;;  %v3490_v18 = vmul.f32 0.5, %v3484_v63  ;;  %v3999_v36 = vsel %vm3645_vm14, 1.0, %v4510_v15 }
0x1d01   :  { %v3486_v48 = vpop.f32.mrf.mxu0 }
0x1d02   :  { %v3494_v14 = vmul.f32 %v3492_v1, %v3484_v63  ;;  %v3487_v54 = vadd.f32 %v3976_v60, %v3486_v48  ;;  %v4390_v1 = vld [vmem:[%s5250_s16 + $0x8] sm:$0xff]  }
0x1d03   :  { %v4329_v2 = vpop.f32.mrf.mxu0 }
0x1d04   :  { %v3496_v3 = vmul.f32 %v3494_v14, %v3484_v63  ;;  %v3493_v4 = vmul.f32 0.044715, %v3487_v54  ;;  %v3491_v19 = vmul.f32 0.5, %v3487_v54  ;;  %v4393_v2 = vld [vmem:[%s5252_s18] sm:$0xff]  }
0x1d06   :  { %v3498_v61 = vadd.f32 %v3496_v3, %v3484_v63  ;;  %v3495_v7 = vmul.f32 %v3493_v4, %v3487_v54  ;;  %v4001_v3 = vld [vmem:[%s5251_s17] ss:$0 sm:$0xff] }
0x1d08   :  { %v3500_v23 = vmul.f32 0.7978846, %v3498_v61  ;;  %v3497_v8 = vmul.f32 %v3495_v7, %v3487_v54 }
0x1d0a   :  { %4478 = vtanh.f32 %v3500_v23  ;;  %v3499_v57 = vadd.f32 %v3497_v8, %v3487_v54  ;;  %v4392_v54 = vld [vmem:[%s5252_s18 + $0x8] sm:$0xff]   ;;  %s4514_s18 = smov [#allocation2]  }
0x1d0b   :  { %s3865_s26 = sshll.u32 %s4514_s18, 4  ;;  %s3866_s26 = int_to_ptr.vmem [resolvable:$true] %s3865_s26 }
0x1d0c   :  { %v3501_v0 = vmul.f32 0.7978846, %v3499_v57  ;;  %s4488_s17 = scalar_lea.vmem %s3866_s26, 32  ;;  %p4493_p1 = scmp.lt.s32.totalorder %s3866_s26, %s3866_s26 }
0x1d0d   :  { %p4489_p0 = scmp.ne.s32.totalorder %s3866_s26, %s4488_s17  ;;  %p4494_p2 = scmp.lt.s32.totalorder %s4488_s17, %s4488_s17 }
0x1d0e   :  { %4480 = vtanh.f32 %v3501_v0 }
0x1d0f   :  { %p4495_p3 = por %p4494_p2, %p4493_p1 }
0x1d11   :  { %p4496_p4 = pnand %p4495_p3, %p4489_p0 }
0x1d17   :  { %v4479_v10 = vpop.eup %4478 }
0x1d18   :  { %v3504_v12 = vadd.f32 1.0, %v4479_v10 }
0x1d1a   :  { %v3506_v20 = vmul.f32 %v3504_v12, %v3490_v18 }
0x1d1b   :  { %v4481_v17 = vpop.eup %4480 }
0x1d1c   :  { %v3505_v11 = vadd.f32 1.0, %v4481_v17 }
0x1d1e   :  { %v3507_v31 = vmul.f32 %v3505_v11, %v3491_v19 }
0x1d20   :  { %v3517_v58 = vpack.c.bf16 %v3507_v31, %v3506_v20 }
0x1d22   :  { %4339 = vmatmul.mubr.msk.bf16.vlgmr.msra.gmra.mxu1 %vm1807_vm13, %v3517_v58 }
0x1d23   :  { %4361 = vmatprep.mubr.msk.bf16.mxu1 %vm4511_vm1, %v4510_v15  ;;  %4358 = vmatpush3.bf16.msra.mxu1 %v4392_v54 }
0x1d24   :  { %4359 = vmatprep.subr.bf16.mxu1 %v4510_v15 }
0x1d27   :  { %4360 = vmatpush3.bf16.msra.mxu1 %v4393_v2 }
0x1de2   :  { %v3587_v21 = vpop.f32.mrf.mxu1 }
0x1de3   :  { %v3588_v25 = vadd.f32 %v3989_v22, %v3587_v21 }
0x1de4   :  { %v4340_v32 = vpop.f32.mrf.mxu1 }
0x1de5   :  { %v3594_v5 = vadd.f32 %v3588_v25, %v3418_v49  ;;  %v3997_v49 = vld [vmem:[%s5248_s14 + $0x1] ss:$0 sm:$0xff] }
0x1de6   :  { %v3590_v24 = vpop.f32.mrf.mxu1 }
0x1de7   :  { %v3591_v13 = vadd.f32 %v3989_v22, %v3590_v24  ;;  %v3600_v29 = vsel %vm71_vm0, %v3594_v5, 0.0 }
0x1de8   :  { %v4341_v26 = vpop.f32.mrf.mxu1 }
0x1de9   :  { %v3595_v27 = vadd.f32 %v3591_v13, %v3419_v47 }
0x1deb   :  { %v3603_v43 = vsel %vm71_vm0, %v3595_v27, 0.0 }
0x1dec   :  { %3604 = vadd.xlane.f32.xlu0 %v3603_v43 }
0x1df0   :  { %3601 = vadd.xlane.f32.xlu0 %v3600_v29 }
0x1e75   :  { %v3605_v30 = vpop.xlane.xlu0 %3604 }
0x1e76   :  { %v3607_v6 = vmul.f32 0.03125, %v3605_v30 }
0x1e78   :  { %v3609_v33 = vsub.f32 %v3595_v27, %v3607_v6 }
0x1e79   :  { %v3602_v16 = vpop.xlane.xlu0 %3601 }
0x1e7a   :  { %v3606_v34 = vmul.f32 0.03125, %v3602_v16  ;;  %v3611_v9 = vmul.f32 %v3609_v33, %v3609_v33 }
0x1e7c   :  { %v3608_v35 = vsub.f32 %v3594_v5, %v3606_v34  ;;  %v3615_v37 = vsel %vm71_vm0, %v3611_v9, 0.0 }
0x1e7d   :  { %3616 = vadd.xlane.f32.xlu0 %v3615_v37 }
0x1e7e   :  { %v3610_v28 = vmul.f32 %v3608_v35, %v3608_v35 }
0x1e80   :  { %v3612_v38 = vsel %vm71_vm0, %v3610_v28, 0.0 }
0x1e81   :  { %3613 = vadd.xlane.f32.xlu0 %v3612_v38 }
0x1f06   :  { %v3617_v52 = vpop.xlane.xlu0 %3616 }
0x1f07   :  { %v3619_v40 = vmul.f32 0.03125, %v3617_v52 }
0x1f09   :  { %v3621_v41 = vadd.f32 1e-12, %v3619_v40 }
0x1f0a   :  { %v3614_v39 = vpop.xlane.xlu0 %3613 }
0x1f0b   :  { %4482 = vrsqrt.f32 %v3621_v41  ;;  %v3618_v56 = vmul.f32 0.03125, %v3614_v39 }
0x1f0d   :  { %v3620_v44 = vadd.f32 1e-12, %v3618_v56 }
0x1f0f   :  { %4484 = vrsqrt.f32 %v3620_v44 }
0x1f18   :  { %v4483_v45 = vpop.eup %4482 }
0x1f19   :  { %v3625_v47 = vmul.f32 %v4483_v45, %v3609_v33 }
0x1f1b   :  { %v3633_v55 = vmul.f32 %v3997_v49, %v3625_v47 }
0x1f1c   :  { %v4485_v46 = vpop.eup %4484 }
0x1f1d   :  { %v3641_v59 = vadd.f32 %v3998_v51, %v3633_v55  ;;  %v3624_v60 = vmul.f32 %v4485_v46, %v3608_v35 }
0x1f1f   :  { %4343 = vmatpush3.msra.mxu0 %v3641_v59  ;;  %v3632_v62 = vmul.f32 %v3997_v49, %v3624_v60 }
0x1f20   :  { %4344 = vmatprep.subr.mxu0 %v4510_v15 }
0x1f21   :  { %v3640_v63 = vadd.f32 %v3998_v51, %v3632_v62 }
0x1f23   :  { %4345 = vmatpush3.msra.mxu0 %v3640_v63 }
0x1f24   :  { %4347 = vmatmul.mubr.msk.f32.vlgmr.msra.gmra.mxu0 %vm3648_vm15, %v3999_v36  ;;  %4349 = vmatprep.subr.bf16.mxu0 %v4510_v15 }
0x1f25   :  { %4350 = vmatpush3.bf16.msra.mxu0 %v4390_v1  ;;  %4353 = vmatprep.mubr.msk.bf16.mxu0 %vm4511_vm1, %v4510_v15  ;;  %vm3857_vm1 = vcmask 33792  }
0x1f26   :  { %4351 = vmatprep.subr.bf16.mxu0 %v4510_v15  ;;  %v4005_v15 = vld [vmem:[%s5253_s19] ss:$0 sm:$0xff] }
0x1f29   :  { %4352 = vmatpush3.bf16.msra.mxu0 %v4391_v42 }
0x1fe4   :  { %v3718_v50 = vpop.f32.mrf.mxu0 }
0x1fe5   :  { %v3726_v48 = vpack.c.bf16 %v3718_v50, %v3718_v50 }
0x1fe6   :  { %v4348_v14 = vpop.f32.mrf.mxu0 }
0x1fe7   :  { %4354 = vmatmul.mubr.msk.bf16.vlgmr.msra.gmra.mxu0 %vm71_vm0, %v3726_v48 }
0x20a7   :  { %v3783_v4 = vpop.f32.mrf.mxu0 }
0x20a8   :  { %v3784_v61 = vadd.f32 %v4001_v3, %v3783_v4 }
0x20a9   :  { %v4355_v7 = vpop.f32.mrf.mxu0 }
0x20aa   :  { %4486 = vtanh.f32 %v3784_v61 }
0x20ab   :  { %v3786_v23 = vpop.f32.mrf.mxu0 }
0x20ad   :  { %v4356_v8 = vpop.f32.mrf.mxu0 }
0x20b7   :  { %v4487_v57 = vpop.eup %4486 }
0x20b8   :  { %v3794_v0 = vpack.c.bf16 %v4487_v57, %v4487_v57 }
0x20ba   :  { %4362 = vmatmul.mubr.msk.bf16.vlgmr.msra.gmra.mxu1 %vm71_vm0, %v3794_v0 }
0x217a   :  { %v3851_v10 = vpop.f32.mrf.mxu1 }
0x217b   :  { %v3852_v12 = vadd.f32 %v4005_v15, %v3851_v10 }
0x217c   :  { %v4363_v17 = vpop.f32.mrf.mxu1 }
0x217d   :  { %3858 = vst.msk [vmem:[#allocation2] sm:$0x3] %vm3857_vm1, %v3852_v12 }
0x217e   :  { %v3854_v18 = vpop.f32.mrf.mxu1 }
0x217f   :  { %4499 = shalt.err (!%p4496_p4)
}
0x2180   :  { %3868 = dma.vmem_to_hbm [thread:$0]  %s3866_s26, 32, %s5254_s20, [#allocation3]   ;;  %v4364_v19 = vpop.f32.mrf.mxu1 }
0x2181   :  { %4508 = dma.done.wait [#allocation3], 32  }
0x2182   :  { %4509 = vsyncadd [#allocation3], 4294967264 }
0x2183   :  { %3872 = vsyncpa [#allocation3], 1 }

</bundles_post_ra>
